<compile_context>
chip_gen: v6e
topology: v6e:2x2x1
jax: 0.10.0
libtpu: 0.0.40
codegen_flags: <defaults>
</compile_context>

<pallas_src>
import jax
import jax.numpy as jnp
from jax.experimental import pallas as pl
from jax.experimental.pallas import tpu as pltpu

CLASSES = 10
IMAGE_SIZE = 28 * 28   # 784
H1 = 500
H2 = 256

# Lane-aligned (multiple-of-128) dims used inside the kernel.
KP = 896     # fc1 contraction dim   (784 -> 896)
H1P = 512    # fc1 out / fc2 in      (500 -> 512)
OUTP = 128   # logits lane dim       (10  -> 128)


def mlp_kernel(x_ref, w1_ref, b1_ref, w2_ref, b2_ref, w3_ref, b3_ref, o_ref):
    # fc1 + ReLU (bf16 in, f32 accumulate, bias + ReLU in f32)
    h1 = jnp.dot(x_ref[...], w1_ref[...], preferred_element_type=jnp.float32)
    h1 = jnp.maximum(h1 + b1_ref[...], 0.0)
    # fc2 + ReLU
    h2 = jnp.dot(h1.astype(w2_ref.dtype), w2_ref[...],
                 preferred_element_type=jnp.float32)
    h2 = jnp.maximum(h2 + b2_ref[...], 0.0)
    # fc3 (logits, no activation); lane-dense (tm, 128) store
    out = jnp.dot(h2.astype(w3_ref.dtype), w3_ref[...],
                  preferred_element_type=jnp.float32)
    o_ref[...] = (out + b3_ref[...]).astype(o_ref.dtype)


def _pad_params(params, compute_dtype):
    """Zero-pad weights/biases to lane-aligned shapes; weights in compute_dtype,
    biases in f32 (added after the f32-accumulated dot)."""
    w1, b1, w2, b2, w3, b3 = params
    w1p = jnp.zeros((KP, H1P), compute_dtype).at[:IMAGE_SIZE, :H1].set(
        w1.astype(compute_dtype))
    b1p = jnp.zeros((1, H1P), jnp.float32).at[:, :H1].set(
        b1.reshape(1, H1).astype(jnp.float32))
    w2p = jnp.zeros((H1P, H2), compute_dtype).at[:H1, :].set(
        w2.astype(compute_dtype))
    b2p = b2.reshape(1, H2).astype(jnp.float32)
    w3p = jnp.zeros((H2, OUTP), compute_dtype).at[:, :CLASSES].set(
        w3.astype(compute_dtype))
    b3p = jnp.zeros((1, OUTP), jnp.float32).at[:, :CLASSES].set(
        b3.reshape(1, CLASSES).astype(jnp.float32))
    return w1p, b1p, w2p, b2p, w3p, b3p


def net_forward(x, params, *, tm=128, compute_dtype=jnp.bfloat16):
    """x: any shape whose trailing dims flatten to IMAGE_SIZE (e.g. (B,1,28,28)).
    tm=128 saturates the MXU M-dim on v5e; use tm=256 on v6e/v7x for larger batches."""
    x2d = x.reshape(-1, IMAGE_SIZE)
    B = x2d.shape[0]

    # Pad batch to a tile multiple and the feature dim to KP (zeros contribute 0).
    Bp = max(tm, ((B + tm - 1) // tm) * tm)
    xp = jnp.zeros((Bp, KP), compute_dtype).at[:B, :IMAGE_SIZE].set(
        x2d.astype(compute_dtype))

    w1p, b1p, w2p, b2p, w3p, b3p = _pad_params(params, compute_dtype)

    grid = (Bp // tm,)   # >= 2 steps at realistic batch sizes -> both TCs on v7x
    out = pl.pallas_call(
        mlp_kernel,
        out_shape=jax.ShapeDtypeStruct((Bp, OUTP), jnp.float32),
        grid_spec=pltpu.PrefetchScalarGridSpec(
            num_scalar_prefetch=0,
            grid=grid,
            in_specs=[
                # batch tile of activations
                pl.BlockSpec((tm, KP), lambda i: (i, 0)),
                # full (lane-aligned) weight / bias tensors, resident in VMEM
                pl.BlockSpec((KP, H1P), lambda i: (0, 0)),
                pl.BlockSpec((1, H1P), lambda i: (0, 0)),
                pl.BlockSpec((H1P, H2), lambda i: (0, 0)),
                pl.BlockSpec((1, H2), lambda i: (0, 0)),
                pl.BlockSpec((H2, OUTP), lambda i: (0, 0)),
                pl.BlockSpec((1, OUTP), lambda i: (0, 0)),
            ],
            out_specs=pl.BlockSpec((tm, OUTP), lambda i: (i, 0)),
        ),
        compiler_params=pltpu.CompilerParams(
            dimension_semantics=("parallel",),
        ),
    )(xp, w1p, b1p, w2p, b2p, w3p, b3p)

    # Strip batch / lane padding.
    return out[:B, :CLASSES]


def init_params(key):
    """nn.Linear-style init: U(-1/sqrt(fan_in), 1/sqrt(fan_in)).
    Weights stored as (in_features, out_features)."""
    ks = jax.random.split(key, 6)

    def linear(kw, kb, fan_in, fan_out):
        bound = 1.0 / jnp.sqrt(jnp.float32(fan_in))
        w = jax.random.uniform(kw, (fan_in, fan_out), jnp.float32, -bound, bound)
        b = jax.random.uniform(kb, (1, fan_out), jnp.float32, -bound, bound)
        return w, b

    w1, b1 = linear(ks[0], ks[1], IMAGE_SIZE, H1)
    w2, b2 = linear(ks[2], ks[3], H1, H2)
    w3, b3 = linear(ks[4], ks[5], H2, CLASSES)
    return (w1, b1, w2, b2, w3, b3)


def _reference(x, params):
    w1, b1, w2, b2, w3, b3 = params
    x2d = x.reshape(-1, IMAGE_SIZE).astype(jnp.float32)
    h = jnp.maximum(x2d @ w1 + b1, 0.0)
    h = jnp.maximum(h @ w2 + b2, 0.0)
    return h @ w3 + b3


if __name__ == "__main__":
    key = jax.random.PRNGKey(0)
    kp, kx = jax.random.split(key)
    params = init_params(kp)

    # MNIST-like batch (B,1,28,28). B=256 with tm=128 -> 2 grid steps, so the
    # "parallel" batch axis can shard across both TensorCores on v7x.
    x = jax.random.normal(kx, (256, 1, 28, 28), jnp.float32)
    logits = net_forward(x, params)
    jax.block_until_ready(logits)

    ref = _reference(x, params)
    assert logits.shape == (256, CLASSES)
    assert jnp.allclose(logits, ref, atol=5e-2, rtol=5e-2), float(
        jnp.max(jnp.abs(logits - ref)))

    # Odd batch exercises the batch-pad / slice path.
    x_small = jax.random.normal(jax.random.PRNGKey(1), (3, 1, 28, 28), jnp.float32)
    logits_small = net_forward(x_small, params)
    jax.block_until_ready(logits_small)
    ref_small = _reference(x_small, params)
    assert logits_small.shape == (3, CLASSES)
    assert jnp.allclose(logits_small, ref_small, atol=5e-2, rtol=5e-2)

    print("KERNEL_OK")
</pallas_src>

<mosaic_0001>
module attributes {stable_mosaic.version = 11 : i64} {
  func.func @mlp_kernel(%arg0: i32, %arg1: memref<128x896xbf16, #tpu.memory_space<vmem>>, %arg2: memref<896x512xbf16, #tpu.memory_space<vmem>>, %arg3: memref<1x512xf32, #tpu.memory_space<vmem>>, %arg4: memref<512x256xbf16, #tpu.memory_space<vmem>>, %arg5: memref<1x256xf32, #tpu.memory_space<vmem>>, %arg6: memref<256x128xbf16, #tpu.memory_space<vmem>>, %arg7: memref<1x128xf32, #tpu.memory_space<vmem>>, %arg8: memref<128x128xf32, #tpu.memory_space<vmem>>) attributes {dimension_semantics = [#tpu.dimension_semantics<parallel>], iteration_bounds = array<i64: 2>, scalar_prefetch = 0 : i64, scratch_operands = 0 : i64, tpu.core_type = #tpu.core_type<tc>, window_params = [{transform_indices = @transform_0, window_bounds = array<i64: 128, 896>}, {pipeline_mode = #tpu.pipeline_mode<synchronous>, transform_indices = @transform_1, window_bounds = array<i64: 896, 512>}, {pipeline_mode = #tpu.pipeline_mode<synchronous>, transform_indices = @transform_2, window_bounds = array<i64: 1, 512>}, {pipeline_mode = #tpu.pipeline_mode<synchronous>, transform_indices = @transform_3, window_bounds = array<i64: 512, 256>}, {pipeline_mode = #tpu.pipeline_mode<synchronous>, transform_indices = @transform_4, window_bounds = array<i64: 1, 256>}, {pipeline_mode = #tpu.pipeline_mode<synchronous>, transform_indices = @transform_5, window_bounds = array<i64: 256, 128>}, {pipeline_mode = #tpu.pipeline_mode<synchronous>, transform_indices = @transform_6, window_bounds = array<i64: 1, 128>}, {transform_indices = @transform_7, window_bounds = array<i64: 128, 128>}]} {
    %c0 = arith.constant 0 : index
    %c0_0 = arith.constant 0 : index
    %0 = vector.load %arg1[%c0, %c0_0] : memref<128x896xbf16, #tpu.memory_space<vmem>>, vector<128x896xbf16>
    %c0_1 = arith.constant 0 : index
    %c0_2 = arith.constant 0 : index
    %1 = vector.load %arg2[%c0_1, %c0_2] : memref<896x512xbf16, #tpu.memory_space<vmem>>, vector<896x512xbf16>
    %cst = arith.constant dense<0.000000e+00> : vector<128x512xf32>
    %2 = tpu.matmul %0, %1, %cst {dimension_numbers = #tpu.dot_dimension_numbers<[1], [0], [0], [1], [0, 0, 1, 1], [], []>} : vector<128x896xbf16>, vector<896x512xbf16>, vector<128x512xf32> -> vector<128x512xf32>
    %c0_3 = arith.constant 0 : index
    %c0_4 = arith.constant 0 : index
    %3 = vector.load %arg3[%c0_3, %c0_4] : memref<1x512xf32, #tpu.memory_space<vmem>>, vector<1x512xf32>
    %4 = vector.broadcast %3 : vector<1x512xf32> to vector<128x512xf32>
    %5 = arith.addf %2, %4 : vector<128x512xf32>
    %cst_5 = arith.constant 0.000000e+00 : f32
    %6 = vector.broadcast %cst_5 : f32 to vector<128x512xf32>
    %7 = arith.maximumf %5, %6 : vector<128x512xf32>
    %8 = arith.truncf %7 : vector<128x512xf32> to vector<128x512xbf16>
    %c0_6 = arith.constant 0 : index
    %c0_7 = arith.constant 0 : index
    %9 = vector.load %arg4[%c0_6, %c0_7] : memref<512x256xbf16, #tpu.memory_space<vmem>>, vector<512x256xbf16>
    %cst_8 = arith.constant dense<0.000000e+00> : vector<128x256xf32>
    %10 = tpu.matmul %8, %9, %cst_8 {dimension_numbers = #tpu.dot_dimension_numbers<[1], [0], [0], [1], [0, 0, 1, 1], [], []>} : vector<128x512xbf16>, vector<512x256xbf16>, vector<128x256xf32> -> vector<128x256xf32>
    %c0_9 = arith.constant 0 : index
    %c0_10 = arith.constant 0 : index
    %11 = vector.load %arg5[%c0_9, %c0_10] : memref<1x256xf32, #tpu.memory_space<vmem>>, vector<1x256xf32>
    %12 = vector.broadcast %11 : vector<1x256xf32> to vector<128x256xf32>
    %13 = arith.addf %10, %12 : vector<128x256xf32>
    %cst_11 = arith.constant 0.000000e+00 : f32
    %14 = vector.broadcast %cst_11 : f32 to vector<128x256xf32>
    %15 = arith.maximumf %13, %14 : vector<128x256xf32>
    %16 = arith.truncf %15 : vector<128x256xf32> to vector<128x256xbf16>
    %c0_12 = arith.constant 0 : index
    %c0_13 = arith.constant 0 : index
    %17 = vector.load %arg6[%c0_12, %c0_13] : memref<256x128xbf16, #tpu.memory_space<vmem>>, vector<256x128xbf16>
    %cst_14 = arith.constant dense<0.000000e+00> : vector<128x128xf32>
    %18 = tpu.matmul %16, %17, %cst_14 {dimension_numbers = #tpu.dot_dimension_numbers<[1], [0], [0], [1], [0, 0, 1, 1], [], []>} : vector<128x256xbf16>, vector<256x128xbf16>, vector<128x128xf32> -> vector<128x128xf32>
    %c0_15 = arith.constant 0 : index
    %c0_16 = arith.constant 0 : index
    %19 = vector.load %arg7[%c0_15, %c0_16] : memref<1x128xf32, #tpu.memory_space<vmem>>, vector<1x128xf32>
    %20 = vector.broadcast %19 : vector<1x128xf32> to vector<128x128xf32>
    %21 = arith.addf %18, %20 : vector<128x128xf32>
    %c0_17 = arith.constant 0 : index
    %c0_18 = arith.constant 0 : index
    %22 = vector.load %arg8[%c0_17, %c0_18] : memref<128x128xf32, #tpu.memory_space<vmem>>, vector<128x128xf32>
    tpu.vector_store %arg8[%c0_17, %c0_18], %21 {strides = array<i32>} : memref<128x128xf32, #tpu.memory_space<vmem>>, vector<128x128xf32>,
    return
  }
  func.func @transform_0(%arg0: i32) -> (i32, i32) {
    %c0_i32 = arith.constant 0 : i32
    %c0_i32_0 = arith.constant 0 : i32
    return %arg0, %c0_i32 : i32, i32
  }
  func.func @transform_1(%arg0: i32) -> (i32, i32) {
    %c0_i32 = arith.constant 0 : i32
    %c0_i32_0 = arith.constant 0 : i32
    %c0_i32_1 = arith.constant 0 : i32
    return %c0_i32, %c0_i32_0 : i32, i32
  }
  func.func @transform_2(%arg0: i32) -> (i32, i32) {
    %c0_i32 = arith.constant 0 : i32
    %c0_i32_0 = arith.constant 0 : i32
    %c0_i32_1 = arith.constant 0 : i32
    return %c0_i32, %c0_i32_0 : i32, i32
  }
  func.func @transform_3(%arg0: i32) -> (i32, i32) {
    %c0_i32 = arith.constant 0 : i32
    %c0_i32_0 = arith.constant 0 : i32
    %c0_i32_1 = arith.constant 0 : i32
    return %c0_i32, %c0_i32_0 : i32, i32
  }
  func.func @transform_4(%arg0: i32) -> (i32, i32) {
    %c0_i32 = arith.constant 0 : i32
    %c0_i32_0 = arith.constant 0 : i32
    %c0_i32_1 = arith.constant 0 : i32
    return %c0_i32, %c0_i32_0 : i32, i32
  }
  func.func @transform_5(%arg0: i32) -> (i32, i32) {
    %c0_i32 = arith.constant 0 : i32
    %c0_i32_0 = arith.constant 0 : i32
    %c0_i32_1 = arith.constant 0 : i32
    return %c0_i32, %c0_i32_0 : i32, i32
  }
  func.func @transform_6(%arg0: i32) -> (i32, i32) {
    %c0_i32 = arith.constant 0 : i32
    %c0_i32_0 = arith.constant 0 : i32
    %c0_i32_1 = arith.constant 0 : i32
    return %c0_i32, %c0_i32_0 : i32, i32
  }
  func.func @transform_7(%arg0: i32) -> (i32, i32) {
    %c0_i32 = arith.constant 0 : i32
    %c0_i32_0 = arith.constant 0 : i32
    return %arg0, %c0_i32 : i32, i32
  }
}

</mosaic_0001>

<bundles_post_ra>
// kernel: tpu_custom_call.1
= control target key start
LH: loop header
LB: loop body
LE: loop exit
PB: predicated region body
PF: predicated region fallthrough
CT: control target
= control target key end

     0   :  { %s6399_s0 = inlined_call_operand.hbm [shape: bf16[256,896], index: 0, kind: input, shape index: {}]   ;;  %s6400_s1 = inlined_call_operand.hbm [shape: bf16[896,512], index: 1, kind: input, shape index: {}]   ;;  %s6401_s2 = inlined_call_operand.hbm [shape: f32[1,512], index: 2, kind: input, shape index: {}]   ;;  %s6402_s3 = inlined_call_operand.hbm [shape: bf16[512,256], index: 3, kind: input, shape index: {}]   ;;  %s6403_s4 = inlined_call_operand.vmem [shape: f32[1,256], index: 4, kind: input, shape index: {}]   ;;  %s6404_s5 = inlined_call_operand.hbm [shape: bf16[256,128], index: 5, kind: input, shape index: {}]   ;;  %s6405_s6 = inlined_call_operand.vmem [shape: f32[1,128], index: 6, kind: input, shape index: {}]   ;;  %s6406_s7 = inlined_call_operand.hbm [shape: f32[256,128], index: 7, kind: output, shape index: {}]  }
   0x1   :  { %6418 = sst [smem:[#allocation24_spill]] %s6400_s1 }
   0x2   :  { %12 = vsyncpa [#allocation3], 0 }
   0x3   :  { %14 = vsyncpa [#allocation3 + $0x1], 0 }
   0x4   :  { %15 = vsyncpa [#allocation6], 0 }
   0x5   :  { %16 = vsyncpa [#allocation9], 0 }
   0x6   :  { %17 = vsyncpa [#allocation4], 0 }
   0x7   :  { %19 = vsyncpa [#allocation4 + $0x1], 0  ;;  %s5508_s24 = smov 0   ;;  %s5510_s25 = smov 0  }
   0x8   :  { %s5512_s26 = smov 0   ;;  %s5514_s27 = smov 0  }
   0x9 LB: > { %s5529_s28 = sadd.s32 4294967295, %s5449_s27   ;;  %s4118_s29 = sadd.s32 4294967294, %s5449_s27   ;;  %s5449_s27 = sphi %s5514_s27, %s6468_s27   ;;  %s5445_s26 = sphi %s5512_s26, %s6467_s26   ;;  %s5441_s25 = sphi %s5510_s25, %s6466_s25   ;;  %s5437_s24 = sphi %s5508_s24, %s6465_s24  }
   0xa   : > { %p45_p0 = scmp.ne.s32.totalorder %s5441_s25, %s5437_s24  ;;  %p6407_p1 = scmp.eq.s32.totalorder %s5529_s28, 0 }
   0xb   : > { %p201_p3 = scmp.eq.s32.totalorder %s4118_s29, 1  ;;  %p4119_p5 = scmp.ge.s32.totalorder %s5449_s27, 1 }
   0xc   : > { %p5538_p4 = por %p6407_p1, %p45_p0  ;;  %p208_p7 = scmp.lt.s32.totalorder %s5449_s27, 3 }
   0xd   : > { %p5543_p6 = por %p201_p3, %p45_p0  ;;  %s5451_s10 = smov [#allocation5]  }
   0xe   : > { %s6419_s30 = scalar_select %p5538_p4, 1, 0 }
   0xf   : > { %s6420_s8 = scalar_select %p5543_p6, 1, 0 }
  0x10   : > { %p5548_p8 = pnand %p4119_p5, %p208_p7  ;;  %s220_s11 = sshll.u32 %s5451_s10, 4  ;;  %s221_s11 = int_to_ptr.vmem [resolvable:$true] %s220_s11 }
  0x11   : > { %s5452_s13 = smov [#allocation8]   ;;  %s5256_s15 = scalar_lea.vmem %s221_s11, 28672 }
  0x12   : > { %s6421_s9 = scalar_select %p5548_p8, 1, 0 }
  0x13   : > { %p4604_p9 = pneg %p5548_p8  ;;  %s244_s14 = sshll.u32 %s5452_s13, 4  ;;  %s245_s14 = int_to_ptr.vmem [resolvable:$true] %s244_s14 }
  0x14   : > { %p5257_p13 = scmp.ne.s32.totalorder %s221_s11, %s5256_s15  ;;  %p5264_p5 = scmp.lt.s32.totalorder %s221_s11, %s221_s11 }
  0x15   : > { %p5557_p11 = pnand %p4604_p9, %p6407_p1  ;;  %p5265_p7 = scmp.lt.s32.totalorder %s5256_s15, %s5256_s15 }
  0x17   : > { %p5247_p12 = pneg %p5557_p11  ;;  %p5266_p10 = por %p5265_p7, %p5264_p5 }
  0x19   : > { %p5259_p0 = pnand %p5257_p13, %p5247_p12 }
  0x1b   : > { %p5260_p3 = pneg %p5259_p0 }
  0x1d   : > { %p5267_p9 = pnand %p5266_p10, %p5260_p3 }
  0x1f   : > { %5270 = shalt.err (!%p5267_p9)
}
  0x20   : > { %s5453_s16 = smov 256   ;;  %s5454_s17 = smov 16  }
  0x21   : > { %s6423_s1 = sld [smem:[#allocation24_spill]]  ;;  %s5282_s20 = scalar_lea.vmem %s245_s14, 8192 }
  0x22   : > { %p5283_p1 = scmp.ne.s32.totalorder %s245_s14, %s5282_s20  ;;  %p5290_p2 = scmp.lt.s32.totalorder %s245_s14, %s245_s14 }
  0x23   : > { %p5291_p6 = scmp.lt.s32.totalorder %s5282_s20, %s5282_s20 }
  0x24   : > { %p5285_p13 = pnand %p5283_p1, %p5247_p12 }
  0x25   : > { %p5292_p5 = por %p5291_p6, %p5290_p2 }
  0x26   : > { %p5286_p0 = pneg %p5285_p13 }
  0x27   : > { %4607 = dma.hbm_to_vmem [thread:$0]  (!%p5557_p11), %s6423_s1, 28672, %s221_s11, [#allocation6], %s5453_s16, %s5453_s16, %s5454_s17  }
  0x28   : > { %p5293_p10 = pnand %p5292_p5, %p5286_p0 }
  0x2a   : > { %5296 = shalt.err (!%p5293_p10)
}
  0x2b   : > { %s5455_s21 = smov 128   ;;  %s5456_s22 = smov 8  }
  0x2c   : > { %4613 = dma.hbm_to_vmem [thread:$0]  (!%p5557_p11), %s6402_s3, 8192, %s245_s14, [#allocation9], %s5455_s21, %s5455_s21, %s5456_s22  }
  0x2d   : > { %s5457_s10 = smov [#allocation7]   ;;  %s5458_s13 = smov [#allocation10]  }
  0x2e   : > { %s234_s11 = sshll.u32 %s5457_s10, 4  ;;  %s260_s15 = sshll.u32 %s5458_s13, 4  ;;  %s235_s11 = int_to_ptr.vmem [resolvable:$true] %s234_s11  ;;  %s261_s15 = int_to_ptr.vmem [resolvable:$true] %s260_s15 }
  0x2f   : > { %s5308_s16 = scalar_lea.vmem %s235_s11, 64  ;;  %p5316_p3 = scmp.lt.s32.totalorder %s235_s11, %s235_s11 }
  0x30   : > { %p5309_p1 = scmp.ne.s32.totalorder %s235_s11, %s5308_s16  ;;  %p5317_p7 = scmp.lt.s32.totalorder %s5308_s16, %s5308_s16 }
  0x32   : > { %p5311_p2 = pnand %p5309_p1, %p5247_p12  ;;  %p5318_p9 = por %p5317_p7, %p5316_p3 }
  0x34   : > { %p5312_p6 = pneg %p5311_p2 }
  0x36   : > { %p5319_p13 = pnand %p5318_p9, %p5312_p6 }
  0x38   : > { %5322 = shalt.err (!%p5319_p13)
}
  0x39   : > { %4610 = dma.hbm_to_vmem [thread:$0]  (!%p5557_p11), %s6401_s2, 64, %s235_s11, [#allocation6]  }
  0x3a   : > { %s5334_s18 = scalar_lea.vmem %s261_s15, 2048  ;;  %p5342_p1 = scmp.lt.s32.totalorder %s261_s15, %s261_s15 }
  0x3b   : > { %p5335_p0 = scmp.ne.s32.totalorder %s261_s15, %s5334_s18  ;;  %p5343_p2 = scmp.lt.s32.totalorder %s5334_s18, %s5334_s18 }
  0x3d   : > { %p5337_p5 = pnand %p5335_p0, %p5247_p12  ;;  %p5344_p4 = por %p5343_p2, %p5342_p1 }
  0x3f   : > { %p5338_p10 = pneg %p5337_p5 }
  0x41   : > { %p5345_p8 = pnand %p5344_p4, %p5338_p10 }
  0x43   : > { %5348 = shalt.err (!%p5345_p8)
}
  0x44   : > { %s5459_s19 = smov 64   ;;  %s5460_s20 = smov 4  }
  0x45   : > { %4616 = dma.hbm_to_vmem [thread:$0]  (!%p5557_p11), %s6404_s5, 2048, %s261_s15, [#allocation9], %s5459_s19, %s5459_s19, %s5460_s20  }
  0x46   : > { %s5596_s23 = sadd.s32 1, %s5449_s27   ;;  %s32_s10 = sadd.s32 1, %s5445_s26 }
  0x47   : > { %s29_s29 = ssub.s32 %s5449_s27, %s5596_s23  ;;  %p39_p8 = scmp.ne.s32.totalorder %s5445_s26, %s5441_s25 }
  0x48   : > { %p30_p4 = scmp.eq.s32.totalorder %s29_s29, 0  ;;  %p40_p12 = scmp.eq.s32.totalorder %s5449_s27, 0 }
  0x49   : > { %p6424_p3 = scmp.eq.s32.totalorder %s5529_s28, 1  ;;  %p4629_p9 = scmp.lt.s32.totalorder %s5449_s27, 2 }
  0x4a   : > { %s5605_s11 = scalar_select %p30_p4, %s5445_s26, %s32_s10  }
  0x4b   : > { %p41_p6 = por %p40_p12, %p39_p8  ;;  %p5609_p7 = por %p6424_p3, %p39_p8 }
  0x4c   : > { %s277_s12 = sand.u32 1, %s5445_s26   ;;  %s4582_s15 = smul.u32 7168, %s5449_s27 }
  0x4d   : > { %s6425_s13 = scalar_select %p5609_p7, 1, 0 }
  0x4e   : > { %s4581_s16 = smul.u32 448, %s277_s12  ;;  %p5616_p11 = pnand %p4629_p9, %p41_p6 }
  0x4f   : > { %s5623_s19 = scalar_lea.hbm %s6399_s0, %s4582_s15  ;;  %s5627_s22 = scalar_lea.sflag [#allocation3], %s277_s12 }
  0x50   : > { %s281_s20 = scalar_lea.vmem [#allocation2], %s4581_s16  ;;  %s5349_s29 = scalar_lea.hbm %s5623_s19, 7168 }
  0x51   : > { %s289_s21 = sshll.u32 %s281_s20, 4  ;;  %p5350_p13 = scmp.ne.s32.totalorder %s5623_s19, %s5349_s29  ;;  %s5625_s21 = int_to_ptr.vmem [resolvable:$true] %s289_s21 }
  0x52   : > { %p5351_p0 = pneg %p5616_p11  ;;  %s5354_s15 = scalar_lea.hbm %s6399_s0, 14336 }
  0x53   : > { %p5355_p1 = scmp.lt.s32.totalorder %s5623_s19, %s6399_s0  ;;  %p5356_p2 = scmp.lt.s32.totalorder %s5354_s15, %s5349_s29 }
  0x54   : > { %p5352_p5 = pnand %p5351_p0, %p5350_p13 }
  0x55   : > { %p5357_p4 = por %p5356_p2, %p5355_p1 }
  0x56   : > { %p5353_p10 = pneg %p5352_p5 }
  0x58   : > { %p5358_p8 = pnand %p5357_p4, %p5353_p10 }
  0x5a   : > { %5361 = shalt.err (!%p5358_p8)
}
  0x5b   : > { %s5362_s12 = scalar_lea.vmem %s5625_s21, 7168  ;;  %s5461_s16 = smov [#allocation2]  }
  0x5c   : > { %p5363_p12 = scmp.ne.s32.totalorder %s5625_s21, %s5362_s12  ;;  %s5367_s20 = sshll.u32 %s5461_s16, 4  ;;  %s5368_s20 = int_to_ptr.vmem [resolvable:$false] %s5367_s20 }
  0x5d   : > { %s5369_s10 = scalar_lea.vmem %s5368_s20, 14336  ;;  %p5370_p9 = scmp.lt.s32.totalorder %s5625_s21, %s5368_s20 }
  0x5e   : > { %p5365_p6 = pnand %p5363_p12, %p5351_p0  ;;  %p5371_p13 = scmp.lt.s32.totalorder %s5369_s10, %s5362_s12 }
  0x60   : > { %p5366_p3 = pneg %p5365_p6  ;;  %p5372_p5 = por %p5371_p13, %p5370_p9 }
  0x62   : > { %p5373_p7 = pnand %p5372_p5, %p5366_p3 }
  0x64   : > { %5376 = shalt.err (!%p5373_p7)
}
  0x65   : > { %s5462_s1 = smov 448   ;;  %s5463_s29 = smov 28  }
  0x66   : > { %4620 = dma.hbm_to_vmem [thread:$0]  (!%p5616_p11), %s5623_s19, 7168, %s5625_s21, %s5627_s22, %s5462_s1, %s5462_s1, %s5463_s29  }
  0x67   : > { %p6427_p0 = scmp.ne.s32.totalorder %s6421_s9, 0 }
  0x69   : > { %301 = sbr.rel (%p6427_p0) target bundleno = 1066 (0x42a), region = 48 }
  0x6e   : > { %s5651_s17 = sand.u32 1, %s5441_s25   ;;  %p6428_p7 = scmp.ne.s32.totalorder %s6419_s30, 0 }
  0x6f   : > { %s4583_s15 = smul.u32 448, %s5651_s17  ;;  %s304_s18 = scalar_lea.sflag [#allocation3], %s5651_s17 }
  0x71   : > { %s5655_s12 = scalar_lea.vmem [#allocation2], %s4583_s15 }
  0x72   : > { %5420 = dma.done.wait (%p6428_p7), %s304_s18, 7168  }
  0x73   : > { %5422 = vsyncadd (%p6428_p7), %s304_s18, 4294960128  ;;  %p6429_p11 = scmp.eq.s32.totalorder %s5529_s28, 0 }
  0x75   : > { %5424 = dma.done.wait (%p6429_p11), [#allocation6], 28736   ;;  %p6430_p10 = pmov %p6429_p11 }
  0x77   : > { %5426 = vsyncadd (%p6430_p10), [#allocation6], 4294938560  ;;  %p6431_p1 = pmov %p6430_p10 }
  0x79   : > { %5428 = dma.done.wait (%p6431_p1), [#allocation9], 10240   ;;  %p6432_p2 = pmov %p6431_p1 }
  0x7a   : > { %v4682_v0 = vld [vmem:[#allocation5 + $0xe4] ss:$16 sps:$4 sm:$0xff]   ;;  %v4686_v2 = vld [vmem:[#allocation5 + $0xe0] ss:$16 sps:$4 sm:$0xff]   ;;  %v4783_v51 = vld [vmem:[%s5655_s12 + $0xc] ss:$28 sps:$4 sm:$0xff]  }
  0x7b   : > { %5430 = vsyncadd (%p6432_p2), [#allocation9], 4294957056  ;;  %v4684_v1 = vld [vmem:[#allocation5 + $0x2e4] ss:$16 sps:$4 sm:$0xff]   ;;  %2075 = vmatprep.subr.bf16.mxu0 %v4682_v0  ;;  %v4687_v3 = vld [vmem:[#allocation5 + $0x2e0] ss:$16 sps:$4 sm:$0xff]   ;;  %2220 = vmatprep.mubr.bf16.mxu1 %v4783_v51 }
  0x7c   : > { %2188 = vmatprep.subr.bf16.mxu1 %v4684_v1  ;;  %v4688_v4 = vld [vmem:[#allocation5 + $0xc4] ss:$16 sps:$4 sm:$0xff]   ;;  %2076 = vmatpush1.bf16.msra.mxu0 %v4686_v2  ;;  %v4692_v6 = vld [vmem:[#allocation5 + $0xc0] ss:$16 sps:$4 sm:$0xff]   ;;  %s4133_s14 = sshll.u32 %s5651_s17, 7  ;;  %s4500_s16 = sshll.u32 %s5529_s28, 11 }
  0x7d   : > { %2189 = vmatpush1.bf16.msra.mxu1 %v4687_v3  ;;  %v4690_v5 = vld [vmem:[#allocation5 + $0x2c4] ss:$16 sps:$4 sm:$0xff]   ;;  %2077 = vmatprep.subr.bf16.mxu0 %v4688_v4  ;;  %v4693_v7 = vld [vmem:[#allocation5 + $0x2c0] ss:$16 sps:$4 sm:$0xff]   ;;  %s6316_s22 = scalar_lea.vmem [#allocation11], %s4133_s14  ;;  %s6352_s29 = scalar_lea.hbm %s6406_s7, %s4500_s16 }
  0x7e   : > { %2190 = vmatprep.subr.bf16.mxu1 %v4690_v5  ;;  %v4694_v8 = vld [vmem:[#allocation5 + $0xa4] ss:$16 sps:$4 sm:$0xff]   ;;  %v4698_v10 = vld [vmem:[#allocation5 + $0xa0] ss:$16 sps:$4 sm:$0xff]   ;;  %s4007_s20 = sshll.u32 %s6316_s22, 4  ;;  %s3994_s15 = scalar_lea.sflag [#allocation4], %s5651_s17  ;;  %s6354_s20 = int_to_ptr.vmem [resolvable:$true] %s4007_s20 }
  0x7f   : > { %v4696_v9 = vld [vmem:[#allocation5 + $0x2a4] ss:$16 sps:$4 sm:$0xff]   ;;  %v4699_v11 = vld [vmem:[#allocation5 + $0x2a0] ss:$16 sps:$4 sm:$0xff]   ;;  %s5377_s18 = scalar_lea.vmem %s6354_s20, 2048  ;;  %p6462_p8 = scmp.ne.s32.totalorder %s6425_s13, 0 }
  0x80   : > { %2078 = vmatpush1.bf16.msra.mxu0 %v4692_v6  ;;  %v4700_v12 = vld [vmem:[#allocation5 + $0x84] ss:$16 sps:$4 sm:$0xff]   ;;  %v4704_v14 = vld [vmem:[#allocation5 + $0x80] ss:$16 sps:$4 sm:$0xff]   ;;  %p5378_p4 = scmp.ne.s32.totalorder %s6354_s20, %s5377_s18  ;;  %s5465_s28 = smov [#allocation11]  }
  0x81   : > { %2191 = vmatpush1.bf16.msra.mxu1 %v4693_v7  ;;  %2079 = vmatprep.subr.bf16.mxu0 %v4694_v8  ;;  %v4702_v13 = vld [vmem:[#allocation5 + $0x284] ss:$16 sps:$4 sm:$0xff]   ;;  %v4705_v15 = vld [vmem:[#allocation5 + $0x280] ss:$16 sps:$4 sm:$0xff]  }
  0x82   : > { %2192 = vmatprep.subr.bf16.mxu1 %v4696_v9  ;;  %v4706_v16 = vld [vmem:[#allocation5 + $0x64] ss:$16 sps:$4 sm:$0xff]   ;;  %v4710_v18 = vld [vmem:[#allocation5 + $0x60] ss:$16 sps:$4 sm:$0xff]   ;;  %v4793_v9 = vld [vmem:[%s5655_s12 + $0x3c] ss:$28 sps:$4 sm:$0xff]   ;;  %p5379_p12 = pnand %p5378_p4, %p6462_p8 }
  0x83   : > { %v4708_v17 = vld [vmem:[#allocation5 + $0x264] ss:$16 sps:$4 sm:$0xff]   ;;  %v4711_v19 = vld [vmem:[#allocation5 + $0x260] ss:$16 sps:$4 sm:$0xff]  }
  0x84   : > { %2080 = vmatpush1.bf16.msra.mxu0 %v4698_v10  ;;  %v4712_v20 = vld [vmem:[#allocation5 + $0x44] ss:$16 sps:$4 sm:$0xff]   ;;  %v4716_v22 = vld [vmem:[#allocation5 + $0x40] ss:$16 sps:$4 sm:$0xff]   ;;  %p5380_p6 = pneg %p5379_p12 }
  0x85   : > { %2193 = vmatpush1.bf16.msra.mxu1 %v4699_v11  ;;  %2081 = vmatprep.subr.bf16.mxu0 %v4700_v12  ;;  %v4714_v21 = vld [vmem:[#allocation5 + $0x244] ss:$16 sps:$4 sm:$0xff]   ;;  %v4717_v23 = vld [vmem:[#allocation5 + $0x240] ss:$16 sps:$4 sm:$0xff]  }
  0x86   : > { %2194 = vmatprep.subr.bf16.mxu1 %v4702_v13  ;;  %v4718_v24 = vld [vmem:[#allocation5 + $0x24] ss:$16 sps:$4 sm:$0xff]   ;;  %v4722_v26 = vld [vmem:[#allocation5 + $0x20] ss:$16 sps:$4 sm:$0xff]  }
  0x87   : > { %v4720_v25 = vld [vmem:[#allocation5 + $0x224] ss:$16 sps:$4 sm:$0xff]   ;;  %v4723_v27 = vld [vmem:[#allocation5 + $0x220] ss:$16 sps:$4 sm:$0xff]  }
  0x88   : > { %2082 = vmatpush1.bf16.msra.mxu0 %v4704_v14  ;;  %v4724_v28 = vld [vmem:[#allocation5 + $0x4] ss:$16 sps:$4 sm:$0xff]   ;;  %v4728_v30 = vld [vmem:[#allocation5] ss:$16 sps:$4 sm:$0xff]  }
  0x89   : > { %2195 = vmatpush1.bf16.msra.mxu1 %v4705_v15  ;;  %2083 = vmatprep.subr.bf16.mxu0 %v4706_v16  ;;  %v4726_v29 = vld [vmem:[#allocation5 + $0x204] ss:$16 sps:$4 sm:$0xff]   ;;  %v4729_v31 = vld [vmem:[#allocation5 + $0x200] ss:$16 sps:$4 sm:$0xff]  }
  0x8a   : > { %2196 = vmatprep.subr.bf16.mxu1 %v4708_v17  ;;  %v4730_v32 = vld [vmem:[#allocation5 + $0x1e4] ss:$16 sps:$4 sm:$0xff]   ;;  %v4734_v34 = vld [vmem:[#allocation5 + $0x1e0] ss:$16 sps:$4 sm:$0xff]  }
  0x8b   : > { %v4732_v33 = vld [vmem:[#allocation5 + $0x3e4] ss:$16 sps:$4 sm:$0xff]   ;;  %v4735_v35 = vld [vmem:[#allocation5 + $0x3e0] ss:$16 sps:$4 sm:$0xff]  }
  0x8c   : > { %2084 = vmatpush1.bf16.msra.mxu0 %v4710_v18  ;;  %v4736_v36 = vld [vmem:[#allocation5 + $0x1c4] ss:$16 sps:$4 sm:$0xff]   ;;  %v4740_v38 = vld [vmem:[#allocation5 + $0x1c0] ss:$16 sps:$4 sm:$0xff]  }
  0x8d   : > { %2197 = vmatpush1.bf16.msra.mxu1 %v4711_v19  ;;  %2085 = vmatprep.subr.bf16.mxu0 %v4712_v20  ;;  %v4738_v37 = vld [vmem:[#allocation5 + $0x3c4] ss:$16 sps:$4 sm:$0xff]   ;;  %v4741_v39 = vld [vmem:[#allocation5 + $0x3c0] ss:$16 sps:$4 sm:$0xff]  }
  0x8e   : > { %2198 = vmatprep.subr.bf16.mxu1 %v4714_v21  ;;  %v4742_v40 = vld [vmem:[#allocation5 + $0x1a4] ss:$16 sps:$4 sm:$0xff]   ;;  %v4746_v42 = vld [vmem:[#allocation5 + $0x1a0] ss:$16 sps:$4 sm:$0xff]   ;;  %v4810_v21 = vld [vmem:[%s5655_s12 + $0x7c] ss:$28 sps:$4 sm:$0xff]  }
  0x8f   : > { %v4744_v41 = vld [vmem:[#allocation5 + $0x3a4] ss:$16 sps:$4 sm:$0xff]   ;;  %v4747_v43 = vld [vmem:[#allocation5 + $0x3a0] ss:$16 sps:$4 sm:$0xff]  }
  0x90   : > { %2086 = vmatpush1.bf16.msra.mxu0 %v4716_v22  ;;  %v4748_v44 = vld [vmem:[#allocation5 + $0x184] ss:$16 sps:$4 sm:$0xff]   ;;  %v4752_v46 = vld [vmem:[#allocation5 + $0x180] ss:$16 sps:$4 sm:$0xff]  }
  0x91   : > { %2199 = vmatpush1.bf16.msra.mxu1 %v4717_v23  ;;  %2087 = vmatprep.subr.bf16.mxu0 %v4718_v24  ;;  %v4750_v45 = vld [vmem:[#allocation5 + $0x384] ss:$16 sps:$4 sm:$0xff]   ;;  %v4753_v47 = vld [vmem:[#allocation5 + $0x380] ss:$16 sps:$4 sm:$0xff]  }
  0x92   : > { %2200 = vmatprep.subr.bf16.mxu1 %v4720_v25  ;;  %v4754_v48 = vld [vmem:[#allocation5 + $0x164] ss:$16 sps:$4 sm:$0xff]   ;;  %v4758_v52 = vld [vmem:[#allocation5 + $0x160] ss:$16 sps:$4 sm:$0xff]  }
  0x93   : > { %v4780_v49 = vld [vmem:[%s5655_s12 + $0x4] ss:$28 sps:$4 sm:$0xff]   ;;  %v4797_v16 = vld [vmem:[%s5655_s12 + $0x38] ss:$28 sps:$4 sm:$0xff]   ;;  %v4812_v25 = vld [vmem:[%s5655_s12 + $0x70] ss:$28 sps:$4 sm:$0xff]  }
  0x94   : > { %2088 = vmatpush1.bf16.msra.mxu0 %v4722_v26  ;;  %v4756_v50 = vld [vmem:[#allocation5 + $0x364] ss:$16 sps:$4 sm:$0xff]   ;;  %2107 = vmatprep.mubr.bf16.mxu0 %v4780_v49  ;;  %v4759_v53 = vld [vmem:[#allocation5 + $0x360] ss:$16 sps:$4 sm:$0xff]  }
  0x95   : > { %2201 = vmatpush1.bf16.msra.mxu1 %v4723_v27  ;;  %2089 = vmatprep.subr.bf16.mxu0 %v4724_v28  ;;  %v4760_v54 = vld [vmem:[#allocation5 + $0x144] ss:$16 sps:$4 sm:$0xff]   ;;  %v4764_v56 = vld [vmem:[#allocation5 + $0x140] ss:$16 sps:$4 sm:$0xff]  }
  0x96   : > { %2202 = vmatprep.subr.bf16.mxu1 %v4726_v29  ;;  %v4762_v55 = vld [vmem:[#allocation5 + $0x344] ss:$16 sps:$4 sm:$0xff]   ;;  %v4765_v57 = vld [vmem:[#allocation5 + $0x340] ss:$16 sps:$4 sm:$0xff]  }
  0x97   : > { %v4766_v58 = vld [vmem:[#allocation5 + $0x124] ss:$16 sps:$4 sm:$0xff]   ;;  %v4770_v60 = vld [vmem:[#allocation5 + $0x120] ss:$16 sps:$4 sm:$0xff]  }
  0x98   : > { %2090 = vmatpush1.bf16.msra.mxu0 %v4728_v30  ;;  %v4768_v59 = vld [vmem:[#allocation5 + $0x324] ss:$16 sps:$4 sm:$0xff]   ;;  %v4771_v61 = vld [vmem:[#allocation5 + $0x320] ss:$16 sps:$4 sm:$0xff]  }
  0x99   : > { %2203 = vmatpush1.bf16.msra.mxu1 %v4729_v31  ;;  %2091 = vmatprep.subr.bf16.mxu0 %v4730_v32  ;;  %v4772_v62 = vld [vmem:[#allocation5 + $0x104] ss:$16 sps:$4 sm:$0xff]   ;;  %v4776_v0 = vld [vmem:[#allocation5 + $0x100] ss:$16 sps:$4 sm:$0xff]   ;;  %v4823_v31 = vld [vmem:[%s5655_s12 + $0xac] ss:$28 sps:$4 sm:$0xff]  }
  0x9a   : > { %2204 = vmatprep.subr.bf16.mxu1 %v4732_v33  ;;  %v4774_v63 = vld [vmem:[#allocation5 + $0x304] ss:$16 sps:$4 sm:$0xff]   ;;  %v4777_v1 = vld [vmem:[#allocation5 + $0x300] ss:$16 sps:$4 sm:$0xff]  }
  0x9b   : > { %v4786_v2 = vld [vmem:[#allocation5 + $0x4e4] ss:$16 sps:$4 sm:$0xff]   ;;  %v4778_v4 = vld [vmem:[%s5655_s12] ss:$28 sps:$4 sm:$0xff]  }
  0x9c   : > { %2092 = vmatpush2.bf16.msra.mxu0 %v4734_v34  ;;  %v4789_v3 = vld [vmem:[#allocation5 + $0x6e4] ss:$16 sps:$4 sm:$0xff]   ;;  %v4784_v6 = vld [vmem:[#allocation5 + $0x4e0] ss:$16 sps:$4 sm:$0xff]  }
  0x9d   : > { %2205 = vmatpush2.bf16.msra.mxu1 %v4735_v35  ;;  %2093 = vmatprep.subr.bf16.mxu0 %v4736_v36  ;;  %v4781_v5 = vld [vmem:[%s5655_s12 + $0x8] ss:$28 sps:$4 sm:$0xff]   ;;  %v4787_v7 = vld [vmem:[#allocation5 + $0x6e0] ss:$16 sps:$4 sm:$0xff]   ;;  %v4813_v27 = vld [vmem:[%s5655_s12 + $0x78] ss:$28 sps:$4 sm:$0xff]  }
  0x9e   : > { %2206 = vmatprep.subr.bf16.mxu1 %v4738_v37  ;;  %v4792_v8 = vld [vmem:[#allocation5 + $0x4c4] ss:$16 sps:$4 sm:$0xff]   ;;  %v4790_v12 = vld [vmem:[#allocation5 + $0x4c0] ss:$16 sps:$4 sm:$0xff]  }
  0x9f   : > { %v4795_v10 = vld [vmem:[%s5655_s12 + $0x44] ss:$28 sps:$4 sm:$0xff]   ;;  %v4808_v20 = vld [vmem:[%s5655_s12 + $0x74] ss:$28 sps:$4 sm:$0xff]  }
  0xa0   : > { %2094 = vmatpush2.bf16.msra.mxu0 %v4740_v38  ;;  %v4804_v11 = vld [vmem:[#allocation5 + $0x6c4] ss:$16 sps:$4 sm:$0xff]   ;;  %v4802_v14 = vld [vmem:[#allocation5 + $0x6c0] ss:$16 sps:$4 sm:$0xff]  }
  0xa1   : > { %2207 = vmatpush2.bf16.msra.mxu1 %v4741_v39  ;;  %2095 = vmatprep.subr.bf16.mxu0 %v4742_v40  ;;  %v4801_v13 = vld [vmem:[#allocation5 + $0x4a4] ss:$16 sps:$4 sm:$0xff]   ;;  %v4798_v17 = vld [vmem:[%s5655_s12 + $0x40] ss:$28 sps:$4 sm:$0xff]   ;;  %v4828_v39 = vld [vmem:[%s5655_s12 + $0xb0] ss:$28 sps:$4 sm:$0xff]  }
  0xa2   : > { %2208 = vmatprep.subr.bf16.mxu1 %v4744_v41  ;;  %v4819_v15 = vld [vmem:[#allocation5 + $0x6a4] ss:$16 sps:$4 sm:$0xff]   ;;  %v4799_v18 = vld [vmem:[#allocation5 + $0x4a0] ss:$16 sps:$4 sm:$0xff]  }
  0xa3   : > { %v4807_v19 = vld [vmem:[#allocation5 + $0x484] ss:$16 sps:$4 sm:$0xff]   ;;  %v4817_v22 = vld [vmem:[#allocation5 + $0x6a0] ss:$16 sps:$4 sm:$0xff]  }
  0xa4   : > { %2096 = vmatpush2.bf16.msra.mxu0 %v4746_v42  ;;  %v4834_v23 = vld [vmem:[#allocation5 + $0x684] ss:$16 sps:$4 sm:$0xff]   ;;  %v4805_v24 = vld [vmem:[#allocation5 + $0x480] ss:$16 sps:$4 sm:$0xff]  }
  0xa5   : > { %2209 = vmatpush2.bf16.msra.mxu1 %v4747_v43  ;;  %2097 = vmatprep.subr.bf16.mxu0 %v4748_v44  ;;  %v4816_v26 = vld [vmem:[#allocation5 + $0x464] ss:$16 sps:$4 sm:$0xff]   ;;  %v4832_v28 = vld [vmem:[#allocation5 + $0x680] ss:$16 sps:$4 sm:$0xff]   ;;  %v4840_v43 = vld [vmem:[%s5655_s12 + $0xec] ss:$28 sps:$4 sm:$0xff]  }
  0xa6   : > { %2210 = vmatprep.subr.bf16.mxu1 %v4750_v45  ;;  %v4814_v29 = vld [vmem:[#allocation5 + $0x460] ss:$16 sps:$4 sm:$0xff]   ;;  %v4822_v30 = vld [vmem:[#allocation5 + $0x444] ss:$16 sps:$4 sm:$0xff]  }
  0xa7   : > { %v4825_v32 = vld [vmem:[%s5655_s12 + $0xb4] ss:$28 sps:$4 sm:$0xff]   ;;  %v4827_v38 = vld [vmem:[%s5655_s12 + $0xa8] ss:$28 sps:$4 sm:$0xff]  }
  0xa8   : > { %2098 = vmatpush2.bf16.msra.mxu0 %v4752_v46  ;;  %v4849_v33 = vld [vmem:[#allocation5 + $0x664] ss:$16 sps:$4 sm:$0xff]   ;;  %v4847_v34 = vld [vmem:[#allocation5 + $0x660] ss:$16 sps:$4 sm:$0xff]  }
  0xa9   : > { %2211 = vmatpush2.bf16.msra.mxu1 %v4753_v47  ;;  %2099 = vmatprep.subr.bf16.mxu0 %v4754_v48  ;;  %v4820_v35 = vld [vmem:[#allocation5 + $0x440] ss:$16 sps:$4 sm:$0xff]   ;;  %v4864_v36 = vld [vmem:[#allocation5 + $0x644] ss:$16 sps:$4 sm:$0xff]  }
  0xaa   : > { %2212 = vmatprep.subr.bf16.mxu1 %v4756_v50  ;;  %v4831_v37 = vld [vmem:[#allocation5 + $0x424] ss:$16 sps:$4 sm:$0xff]   ;;  %v4829_v40 = vld [vmem:[#allocation5 + $0x420] ss:$16 sps:$4 sm:$0xff]  }
  0xab   : > { %v4837_v41 = vld [vmem:[#allocation5 + $0x404] ss:$16 sps:$4 sm:$0xff]   ;;  %v4862_v44 = vld [vmem:[#allocation5 + $0x640] ss:$16 sps:$4 sm:$0xff]  }
  0xac   : > { %2100 = vmatpush2.bf16.msra.mxu0 %v4758_v52  ;;  %v4838_v42 = vld [vmem:[%s5655_s12 + $0xe4] ss:$28 sps:$4 sm:$0xff]  }
  0xad   : > { %2213 = vmatpush2.bf16.msra.mxu1 %v4759_v53  ;;  %2101 = vmatprep.subr.bf16.mxu0 %v4760_v54  ;;  %v4879_v45 = vld [vmem:[#allocation5 + $0x624] ss:$16 sps:$4 sm:$0xff]   ;;  %v4835_v46 = vld [vmem:[#allocation5 + $0x400] ss:$16 sps:$4 sm:$0xff]   ;;  %v4853_v53 = vld [vmem:[%s5655_s12 + $0x11c] ss:$28 sps:$4 sm:$0xff]  }
  0xae   : > { %2214 = vmatprep.subr.bf16.mxu1 %v4762_v55  ;;  %v4842_v47 = vld [vmem:[%s5655_s12 + $0xe0] ss:$28 sps:$4 sm:$0xff]   ;;  %v4846_v48 = vld [vmem:[#allocation5 + $0x5e4] ss:$16 sps:$4 sm:$0xff]  }
  0xaf   : > { %v4843_v49 = vld [vmem:[%s5655_s12 + $0xe8] ss:$28 sps:$4 sm:$0xff]   ;;  %v4877_v50 = vld [vmem:[#allocation5 + $0x620] ss:$16 sps:$4 sm:$0xff]  }
  0xb0   : > { %2102 = vmatpush2.bf16.msra.mxu0 %v4764_v56  ;;  %v4844_v51 = vld [vmem:[#allocation5 + $0x5e0] ss:$16 sps:$4 sm:$0xff]   ;;  %v4852_v52 = vld [vmem:[#allocation5 + $0x5c4] ss:$16 sps:$4 sm:$0xff]  }
  0xb1   : > { %2215 = vmatpush2.bf16.msra.mxu1 %v4765_v57  ;;  %2103 = vmatprep.subr.bf16.mxu0 %v4766_v58  ;;  %v4855_v54 = vld [vmem:[%s5655_s12 + $0x124] ss:$28 sps:$4 sm:$0xff]   ;;  %v4907_v58 = vld [vmem:[#allocation5 + $0x2ec] ss:$16 sps:$4 sm:$0xff]  }
  0xb2   : > { %2216 = vmatprep.subr.bf16.mxu1 %v4768_v59  ;;  %v4894_v55 = vld [vmem:[#allocation5 + $0x604] ss:$16 sps:$4 sm:$0xff]   ;;  %v4892_v56 = vld [vmem:[#allocation5 + $0x600] ss:$16 sps:$4 sm:$0xff]  }
  0xb3   : > { %v4850_v57 = vld [vmem:[#allocation5 + $0x5c0] ss:$16 sps:$4 sm:$0xff]   ;;  %v4861_v59 = vld [vmem:[#allocation5 + $0x5a4] ss:$16 sps:$4 sm:$0xff]  }
  0xb4   : > { %2104 = vmatpush2.bf16.msra.mxu0 %v4770_v60  ;;  %v4857_v60 = vld [vmem:[%s5655_s12 + $0x118] ss:$28 sps:$4 sm:$0xff]  }
  0xb5   : > { %2217 = vmatpush2.bf16.msra.mxu1 %v4771_v61  ;;  %2105 = vmatprep.subr.bf16.mxu0 %v4772_v62  ;;  %v4858_v61 = vld [vmem:[%s5655_s12 + $0x120] ss:$28 sps:$4 sm:$0xff]  }
  0xb6   : > { %2218 = vmatprep.subr.bf16.mxu1 %v4774_v63  ;;  %v4859_v62 = vld [vmem:[#allocation5 + $0x5a0] ss:$16 sps:$4 sm:$0xff]   ;;  %v4867_v63 = vld [vmem:[#allocation5 + $0x584] ss:$16 sps:$4 sm:$0xff]  }
  0xb8   : > { %2106 = vmatpush2.bf16.msra.mxu0 %v4776_v0  ;;  %v4868_v0 = vld [vmem:[%s5655_s12 + $0x154] ss:$28 sps:$4 sm:$0xff]  }
  0xb9   : > { %2219 = vmatpush2.bf16.msra.mxu1 %v4777_v1  ;;  %2301 = vmatprep.subr.bf16.mxu0 %v4786_v2  ;;  %v4870_v1 = vld [vmem:[%s5655_s12 + $0x15c] ss:$28 sps:$4 sm:$0xff]   ;;  %v4865_v2 = vld [vmem:[#allocation5 + $0x580] ss:$16 sps:$4 sm:$0xff]  }
  0xba   : > { %2414 = vmatprep.subr.bf16.mxu1 %v4789_v3  ;;  %v4872_v3 = vld [vmem:[%s5655_s12 + $0x150] ss:$28 sps:$4 sm:$0xff]  }
  0xbb   : > { %2108 = vmatmul.mubr.bf16.vlgmr.msra.gmra.mxu0 %v4778_v4  ;;  %v4876_v4 = vld [vmem:[#allocation5 + $0x564] ss:$16 sps:$4 sm:$0xff]  }
  0xbc   : > { %2221 = vmatmul.mubr.bf16.vlgmr.msra.gmra.mxu1 %v4781_v5  ;;  %2302 = vmatpush1.bf16.msra.mxu0 %v4784_v6  ;;  %v4873_v5 = vld [vmem:[%s5655_s12 + $0x158] ss:$28 sps:$4 sm:$0xff]   ;;  %v4874_v6 = vld [vmem:[#allocation5 + $0x560] ss:$16 sps:$4 sm:$0xff]  }
  0xbd   : > { %2415 = vmatpush1.bf16.msra.mxu1 %v4787_v7  ;;  %2303 = vmatprep.subr.bf16.mxu0 %v4792_v8  ;;  %v4882_v7 = vld [vmem:[#allocation5 + $0x544] ss:$16 sps:$4 sm:$0xff]   ;;  %v4883_v8 = vld [vmem:[%s5655_s12 + $0x18c] ss:$28 sps:$4 sm:$0xff]  }
  0xbe   : > { %2117 = vmatprep.mubr.bf16.mxu0 %v4793_v9  ;;  %2230 = vmatprep.mubr.bf16.mxu1 %v4795_v10  ;;  %v4885_v9 = vld [vmem:[%s5655_s12 + $0x194] ss:$28 sps:$4 sm:$0xff]  }
  0xbf   : > { %2416 = vmatprep.subr.bf16.mxu1 %v4804_v11  ;;  %v4880_v10 = vld [vmem:[#allocation5 + $0x540] ss:$16 sps:$4 sm:$0xff]   ;;  %v4891_v11 = vld [vmem:[#allocation5 + $0x524] ss:$16 sps:$4 sm:$0xff]  }
  0xc0   : > { %2304 = vmatpush1.bf16.msra.mxu0 %v4790_v12  ;;  %v4887_v12 = vld [vmem:[%s5655_s12 + $0x188] ss:$28 sps:$4 sm:$0xff]  }
  0xc1   : > { %2417 = vmatpush1.bf16.msra.mxu1 %v4802_v14  ;;  %2305 = vmatprep.subr.bf16.mxu0 %v4801_v13  ;;  %v4888_v13 = vld [vmem:[%s5655_s12 + $0x190] ss:$28 sps:$4 sm:$0xff]  }
  0xc2   : > { %2418 = vmatprep.subr.bf16.mxu1 %v4819_v15  ;;  %v4889_v14 = vld [vmem:[#allocation5 + $0x520] ss:$16 sps:$4 sm:$0xff]  }
  0xc3   : > { %2118 = vmatmul.mubr.bf16.gmra.mxu0 %v4797_v16  ;;  %v4900_v15 = vld [vmem:[%s5655_s12 + $0x14] ss:$28 sps:$4 sm:$0xff]  }
  0xc4   : > { %2231 = vmatmul.mubr.bf16.gmra.mxu1 %v4798_v17  ;;  %2306 = vmatpush1.bf16.msra.mxu0 %v4799_v18  ;;  %v4897_v16 = vld [vmem:[#allocation5 + $0x504] ss:$16 sps:$4 sm:$0xff]   ;;  %v4895_v17 = vld [vmem:[#allocation5 + $0x500] ss:$16 sps:$4 sm:$0xff]   ;;  %v5464_v18 = vmov 0  }
  0xc5   : > { %2127 = vmatprep.mubr.bf16.mxu0 %v4808_v20  ;;  %2307 = vmatprep.subr.bf16.mxu0 %v4807_v19  ;;  %v4904_v19 = vld [vmem:[#allocation5 + $0xec] ss:$16 sps:$4 sm:$0xff]  }
  0xc6   : > { %2240 = vmatprep.mubr.bf16.mxu1 %v4810_v21  ;;  %2419 = vmatpush1.bf16.msra.mxu1 %v4817_v22  ;;  %v4898_v20 = vld [vmem:[%s5655_s12 + $0x10] ss:$28 sps:$4 sm:$0xff]   ;;  %v4901_v21 = vld [vmem:[%s5655_s12 + $0x18] ss:$28 sps:$4 sm:$0xff]  }
  0xc7   : > { %2420 = vmatprep.subr.bf16.mxu1 %v4834_v23  ;;  %v4902_v22 = vld [vmem:[#allocation5 + $0xe8] ss:$16 sps:$4 sm:$0xff]  }
  0xc8   : > { %2308 = vmatpush1.bf16.msra.mxu0 %v4805_v24  ;;  %v4905_v23 = vld [vmem:[#allocation5 + $0x2e8] ss:$16 sps:$4 sm:$0xff]   ;;  %v4910_v24 = vld [vmem:[#allocation5 + $0xcc] ss:$16 sps:$4 sm:$0xff]  }
  0xc9   : > { %2309 = vmatprep.subr.bf16.mxu0 %v4816_v26  ;;  %v5706_v26 = vld [vmem:[%s5655_s12 + $0x4c] ss:$28 sps:$4 sm:$0xff]  }
  0xca   : > { %2421 = vmatpush1.bf16.msra.mxu1 %v4832_v28  ;;  %v4911_v28 = vld [vmem:[#allocation5 + $0x2c8] ss:$16 sps:$4 sm:$0xff]  }
  0xcb   : > { %2128 = vmatmul.mubr.bf16.gmra.mxu0 %v4812_v25  ;;  %2422 = vmatprep.subr.bf16.mxu1 %v4849_v33  ;;  %v4913_v25 = vld [vmem:[#allocation5 + $0x2cc] ss:$16 sps:$4 sm:$0xff]   ;;  %v4918_v33 = vld [vmem:[#allocation5 + $0xa8] ss:$16 sps:$4 sm:$0xff]  }
  0xcc   : > { %2241 = vmatmul.mubr.bf16.gmra.mxu1 %v4813_v27  ;;  %2310 = vmatpush1.bf16.msra.mxu0 %v4814_v29  ;;  %v4908_v27 = vld [vmem:[#allocation5 + $0xc8] ss:$16 sps:$4 sm:$0xff]   ;;  %v4920_v29 = vld [vmem:[#allocation5 + $0xac] ss:$16 sps:$4 sm:$0xff]  }
  0xcd   : > { %2137 = vmatprep.mubr.bf16.mxu0 %v4823_v31  ;;  %2311 = vmatprep.subr.bf16.mxu0 %v4822_v30  ;;  %v4923_v30 = vld [vmem:[#allocation5 + $0x2ac] ss:$16 sps:$4 sm:$0xff]   ;;  %v5711_v31 = vld [vmem:[%s5655_s12 + $0x48] ss:$28 sps:$4 sm:$0xff]  }
  0xce   : > { %2250 = vmatprep.mubr.bf16.mxu1 %v4825_v32  ;;  %2423 = vmatpush1.bf16.msra.mxu1 %v4847_v34  ;;  %v5714_v32 = vld [vmem:[%s5655_s12 + $0x50] ss:$28 sps:$4 sm:$0xff]   ;;  %v4921_v34 = vld [vmem:[#allocation5 + $0x2a8] ss:$16 sps:$4 sm:$0xff]  }
  0xcf   : > { %2424 = vmatprep.subr.bf16.mxu1 %v4864_v36  ;;  %v4929_v36 = vld [vmem:[#allocation5 + $0x28c] ss:$16 sps:$4 sm:$0xff]  }
  0xd0   : > { %2312 = vmatpush1.bf16.msra.mxu0 %v4820_v35  ;;  %v4926_v35 = vld [vmem:[#allocation5 + $0x8c] ss:$16 sps:$4 sm:$0xff]  }
  0xd1   : > { %2313 = vmatprep.subr.bf16.mxu0 %v4831_v37  ;;  %v5717_v37 = vld [vmem:[%s5655_s12 + $0x84] ss:$28 sps:$4 sm:$0xff]  }
  0xd2   : > { %2425 = vmatpush1.bf16.msra.mxu1 %v4862_v44  ;;  %v4934_v44 = vld [vmem:[#allocation5 + $0x68] ss:$16 sps:$4 sm:$0xff]  }
  0xd3   : > { %2138 = vmatmul.mubr.bf16.gmra.mxu0 %v4827_v38  ;;  %2426 = vmatprep.subr.bf16.mxu1 %v4879_v45  ;;  %v4924_v38 = vld [vmem:[#allocation5 + $0x88] ss:$16 sps:$4 sm:$0xff]  }
  0xd4   : > { %2251 = vmatmul.mubr.bf16.gmra.mxu1 %v4828_v39  ;;  %2314 = vmatpush1.bf16.msra.mxu0 %v4829_v40  ;;  %v4927_v39 = vld [vmem:[#allocation5 + $0x288] ss:$16 sps:$4 sm:$0xff]   ;;  %v5722_v40 = vld [vmem:[%s5655_s12 + $0x80] ss:$28 sps:$4 sm:$0xff]  }
  0xd5   : > { %2147 = vmatprep.mubr.bf16.mxu0 %v4838_v42  ;;  %2315 = vmatprep.subr.bf16.mxu0 %v4837_v41  ;;  %v4936_v41 = vld [vmem:[#allocation5 + $0x6c] ss:$16 sps:$4 sm:$0xff]   ;;  %v4937_v45 = vld [vmem:[#allocation5 + $0x268] ss:$16 sps:$4 sm:$0xff]  }
  0xd6   : > { %2260 = vmatprep.mubr.bf16.mxu1 %v4840_v43  ;;  %2427 = vmatpush1.bf16.msra.mxu1 %v4877_v50  ;;  %v4939_v42 = vld [vmem:[#allocation5 + $0x26c] ss:$16 sps:$4 sm:$0xff]   ;;  %v5727_v43 = vld [vmem:[%s5655_s12 + $0x88] ss:$28 sps:$4 sm:$0xff]  }
  0xd7   : > { %2428 = vmatprep.subr.bf16.mxu1 %v4894_v55  ;;  %v4943_v50 = vld [vmem:[#allocation5 + $0x248] ss:$16 sps:$4 sm:$0xff]  }
  0xd8   : > { %2316 = vmatpush1.bf16.msra.mxu0 %v4835_v46  ;;  %v4942_v46 = vld [vmem:[#allocation5 + $0x4c] ss:$16 sps:$4 sm:$0xff]   ;;  %v4950_v55 = vld [vmem:[#allocation5 + $0x28] ss:$16 sps:$4 sm:$0xff]  }
  0xd9   : > { %2317 = vmatprep.subr.bf16.mxu0 %v4846_v48  ;;  %v5730_v48 = vld [vmem:[%s5655_s12 + $0xbc] ss:$28 sps:$4 sm:$0xff]  }
  0xda   : > { %2429 = vmatpush1.bf16.msra.mxu1 %v4892_v56  ;;  %v4953_v56 = vld [vmem:[#allocation5 + $0x228] ss:$16 sps:$4 sm:$0xff]  }
  0xdb   : > { %2148 = vmatmul.mubr.bf16.gmra.mxu0 %v4842_v47  ;;  %2640 = vmatprep.subr.bf16.mxu1 %v4907_v58  ;;  %v4945_v47 = vld [vmem:[#allocation5 + $0x24c] ss:$16 sps:$4 sm:$0xff]  }
  0xdc   : > { %2261 = vmatmul.mubr.bf16.gmra.mxu1 %v4843_v49  ;;  %2318 = vmatpush2.bf16.msra.mxu0 %v4844_v51  ;;  %v4940_v49 = vld [vmem:[#allocation5 + $0x48] ss:$16 sps:$4 sm:$0xff]   ;;  %v4961_v58 = vld [vmem:[#allocation5 + $0x20c] ss:$16 sps:$4 sm:$0xff]  }
  0xdd   : > { %2157 = vmatprep.mubr.bf16.mxu0 %v4853_v53  ;;  %2319 = vmatprep.subr.bf16.mxu0 %v4852_v52  ;;  %v5735_v51 = vld [vmem:[%s5655_s12 + $0xb8] ss:$28 sps:$4 sm:$0xff]   ;;  %v4952_v52 = vld [vmem:[#allocation5 + $0x2c] ss:$16 sps:$4 sm:$0xff]  }
  0xde   : > { %2270 = vmatprep.mubr.bf16.mxu1 %v4855_v54  ;;  %v4955_v53 = vld [vmem:[#allocation5 + $0x22c] ss:$16 sps:$4 sm:$0xff]  }
  0xdf   : > { %v5740_v54 = vld [vmem:[%s5655_s12 + $0xc0] ss:$28 sps:$4 sm:$0xff]  }
  0xe0   : > { %2320 = vmatpush2.bf16.msra.mxu0 %v4850_v57  ;;  %v4958_v57 = vld [vmem:[#allocation5 + $0xc] ss:$16 sps:$4 sm:$0xff]  }
  0xe1   : > { %2321 = vmatprep.subr.bf16.mxu0 %v4861_v59  ;;  %v5743_v59 = vld [vmem:[%s5655_s12 + $0xf4] ss:$28 sps:$4 sm:$0xff]  }
  0xe3   : > { %2158 = vmatmul.mubr.bf16.gmra.mxu0 %v4857_v60  ;;  %v4956_v60 = vld [vmem:[#allocation5 + $0x8] ss:$16 sps:$4 sm:$0xff]  }
  0xe4   : > { %2271 = vmatmul.mubr.bf16.gmra.mxu1 %v4858_v61  ;;  %2322 = vmatpush2.bf16.msra.mxu0 %v4859_v62  ;;  %v4959_v61 = vld [vmem:[#allocation5 + $0x208] ss:$16 sps:$4 sm:$0xff]   ;;  %v4968_v62 = vld [vmem:[#allocation5 + $0x1ec] ss:$16 sps:$4 sm:$0xff]  }
  0xe5   : > { %2167 = vmatprep.mubr.bf16.mxu0 %v4868_v0  ;;  %2323 = vmatprep.subr.bf16.mxu0 %v4867_v63  ;;  %v4971_v63 = vld [vmem:[#allocation5 + $0x3ec] ss:$16 sps:$4 sm:$0xff]  }
  0xe6   : > { %2280 = vmatprep.mubr.bf16.mxu1 %v4870_v1  ;;  %v5750_v0 = vld [vmem:[%s5655_s12 + $0xf0] ss:$28 sps:$4 sm:$0xff]   ;;  %v5753_v1 = vld [vmem:[%s5655_s12 + $0xf8] ss:$28 sps:$4 sm:$0xff]  }
  0xe8   : > { %2324 = vmatpush2.bf16.msra.mxu0 %v4865_v2  ;;  %v4966_v2 = vld [vmem:[#allocation5 + $0x1e8] ss:$16 sps:$4 sm:$0xff]  }
  0xe9   : > { %2325 = vmatprep.subr.bf16.mxu0 %v4876_v4  ;;  %v4974_v4 = vld [vmem:[#allocation5 + $0x1cc] ss:$16 sps:$4 sm:$0xff]  }
  0xeb   : > { %2168 = vmatmul.mubr.bf16.gmra.mxu0 %v4872_v3  ;;  %v4969_v3 = vld [vmem:[#allocation5 + $0x3e8] ss:$16 sps:$4 sm:$0xff]  }
  0xec   : > { %2281 = vmatmul.mubr.bf16.gmra.mxu1 %v4873_v5  ;;  %2326 = vmatpush2.bf16.msra.mxu0 %v4874_v6  ;;  %v4977_v5 = vld [vmem:[#allocation5 + $0x3cc] ss:$16 sps:$4 sm:$0xff]  }
  0xed   : > { %2177 = vmatprep.mubr.bf16.mxu0 %v4883_v8  ;;  %2327 = vmatprep.subr.bf16.mxu0 %v4882_v7  ;;  %v5756_v6 = vld [vmem:[%s5655_s12 + $0x12c] ss:$28 sps:$4 sm:$0xff]  }
  0xee   : > { %2290 = vmatprep.mubr.bf16.mxu1 %v4885_v9  ;;  %v4972_v7 = vld [vmem:[#allocation5 + $0x1c8] ss:$16 sps:$4 sm:$0xff]   ;;  %v4984_v9 = vld [vmem:[#allocation5 + $0x1ac] ss:$16 sps:$4 sm:$0xff]  }
  0xef   : > { %v4975_v8 = vld [vmem:[#allocation5 + $0x3c8] ss:$16 sps:$4 sm:$0xff]  }
  0xf0   : > { %2328 = vmatpush2.bf16.msra.mxu0 %v4880_v10  ;;  %v4987_v10 = vld [vmem:[#allocation5 + $0x3ac] ss:$16 sps:$4 sm:$0xff]  }
  0xf1   : > { %2329 = vmatprep.subr.bf16.mxu0 %v4891_v11  ;;  %v5763_v11 = vld [vmem:[%s5655_s12 + $0x128] ss:$28 sps:$4 sm:$0xff]  }
  0xf3   : > { %2178 = vmatmul.mubr.bf16.gmra.mxu0 %v4887_v12  ;;  %v5766_v12 = vld [vmem:[%s5655_s12 + $0x130] ss:$28 sps:$4 sm:$0xff]  }
  0xf4   : > { %2291 = vmatmul.mubr.bf16.gmra.mxu1 %v4888_v13  ;;  %2330 = vmatpush2.bf16.msra.mxu0 %v4889_v14  ;;  %v4982_v13 = vld [vmem:[#allocation5 + $0x1a8] ss:$16 sps:$4 sm:$0xff]  }
  0xf5   : > { %2333 = vmatprep.mubr.bf16.mxu0 %v4900_v15  ;;  %2331 = vmatprep.subr.bf16.mxu0 %v4897_v16  ;;  %v4985_v14 = vld [vmem:[#allocation5 + $0x3a8] ss:$16 sps:$4 sm:$0xff]   ;;  %v4990_v15 = vld [vmem:[#allocation5 + $0x18c] ss:$16 sps:$4 sm:$0xff]  }
  0xf6   : > { %2446 = vmatprep.mubr.bf16.mxu1 %v5464_v18  ;;  %v4993_v16 = vld [vmem:[#allocation5 + $0x38c] ss:$16 sps:$4 sm:$0xff]  }
  0xf8   : > { %2332 = vmatpush2.bf16.msra.mxu0 %v4895_v17  ;;  %v5769_v17 = vld [vmem:[%s5655_s12 + $0x164] ss:$28 sps:$4 sm:$0xff]  }
  0xf9   : > { %2527 = vmatprep.subr.bf16.mxu0 %v4904_v19  ;;  %v4988_v19 = vld [vmem:[#allocation5 + $0x188] ss:$16 sps:$4 sm:$0xff]  }
  0xfb   : > { %2334 = vmatmul.mubr.bf16.vlgmr.msra.gmra.mxu0 %v4898_v20  ;;  %v4991_v20 = vld [vmem:[#allocation5 + $0x388] ss:$16 sps:$4 sm:$0xff]  }
  0xfc   : > { %2447 = vmatmul.mubr.bf16.vlgmr.msra.gmra.mxu1 %v4901_v21  ;;  %2528 = vmatpush1.bf16.msra.mxu0 %v4902_v22  ;;  %v5000_v21 = vld [vmem:[#allocation5 + $0x16c] ss:$16 sps:$4 sm:$0xff]  }
  0xfd   : > { %2641 = vmatpush1.bf16.msra.mxu1 %v4905_v23  ;;  %2529 = vmatprep.subr.bf16.mxu0 %v4910_v24  ;;  %v5003_v22 = vld [vmem:[#allocation5 + $0x36c] ss:$16 sps:$4 sm:$0xff]   ;;  %v5779_v24 = vld [vmem:[%s5655_s12 + $0x168] ss:$28 sps:$4 sm:$0xff]  }
  0xfe   : > { %2642 = vmatprep.subr.bf16.mxu1 %v4913_v25  ;;  %2343 = vmatprep.mubr.bf16.mxu0 %v5706_v26  ;;  %v5776_v23 = vld [vmem:[%s5655_s12 + $0x160] ss:$28 sps:$4 sm:$0xff]   ;;  %v4998_v25 = vld [vmem:[#allocation5 + $0x168] ss:$16 sps:$4 sm:$0xff]  }
  0xff   : > { %2456 = vmatprep.mubr.bf16.mxu1 %v5464_v18 }
 0x100   : > { %2530 = vmatpush1.bf16.msra.mxu0 %v4908_v27  ;;  %v5001_v27 = vld [vmem:[#allocation5 + $0x368] ss:$16 sps:$4 sm:$0xff]  }
 0x101   : > { %2643 = vmatpush1.bf16.msra.mxu1 %v4911_v28  ;;  %2531 = vmatprep.subr.bf16.mxu0 %v4920_v29  ;;  %v5006_v28 = vld [vmem:[#allocation5 + $0x14c] ss:$16 sps:$4 sm:$0xff]  }
 0x102   : > { %2644 = vmatprep.subr.bf16.mxu1 %v4923_v30  ;;  %v5009_v29 = vld [vmem:[#allocation5 + $0x34c] ss:$16 sps:$4 sm:$0xff]  }
 0x103   : > { %2344 = vmatmul.mubr.bf16.gmra.mxu0 %v5711_v31  ;;  %v5782_v30 = vld [vmem:[%s5655_s12 + $0x19c] ss:$28 sps:$4 sm:$0xff]  }
 0x104   : > { %2457 = vmatmul.mubr.bf16.gmra.mxu1 %v5714_v32  ;;  %2532 = vmatpush1.bf16.msra.mxu0 %v4918_v33  ;;  %v5004_v33 = vld [vmem:[#allocation5 + $0x148] ss:$16 sps:$4 sm:$0xff]  }
 0x105   : > { %2645 = vmatpush1.bf16.msra.mxu1 %v4921_v34  ;;  %2533 = vmatprep.subr.bf16.mxu0 %v4926_v35  ;;  %v5007_v34 = vld [vmem:[#allocation5 + $0x348] ss:$16 sps:$4 sm:$0xff]   ;;  %v5016_v35 = vld [vmem:[#allocation5 + $0x12c] ss:$16 sps:$4 sm:$0xff]  }
 0x106   : > { %2646 = vmatprep.subr.bf16.mxu1 %v4929_v36  ;;  %2353 = vmatprep.mubr.bf16.mxu0 %v5717_v37  ;;  %v5019_v36 = vld [vmem:[#allocation5 + $0x32c] ss:$16 sps:$4 sm:$0xff]  }
 0x107   : > { %2466 = vmatprep.mubr.bf16.mxu1 %v5464_v18 }
 0x108   : > { %2534 = vmatpush1.bf16.msra.mxu0 %v4924_v38  ;;  %v5789_v38 = vld [vmem:[%s5655_s12 + $0x198] ss:$28 sps:$4 sm:$0xff]  }
 0x109   : > { %2647 = vmatpush1.bf16.msra.mxu1 %v4927_v39  ;;  %2535 = vmatprep.subr.bf16.mxu0 %v4936_v41  ;;  %v5792_v39 = vld [vmem:[%s5655_s12 + $0x1a0] ss:$28 sps:$4 sm:$0xff]   ;;  %v5014_v41 = vld [vmem:[#allocation5 + $0x128] ss:$16 sps:$4 sm:$0xff]  }
 0x10a   : > { %2648 = vmatprep.subr.bf16.mxu1 %v4939_v42  ;;  %v5017_v42 = vld [vmem:[#allocation5 + $0x328] ss:$16 sps:$4 sm:$0xff]  }
 0x10b   : > { %2354 = vmatmul.mubr.bf16.gmra.mxu0 %v5722_v40 }
 0x10c   : > { %2467 = vmatmul.mubr.bf16.gmra.mxu1 %v5727_v43  ;;  %2536 = vmatpush1.bf16.msra.mxu0 %v4934_v44  ;;  %v5022_v44 = vld [vmem:[#allocation5 + $0x10c] ss:$16 sps:$4 sm:$0xff]  }
 0x10d   : > { %2649 = vmatpush1.bf16.msra.mxu1 %v4937_v45  ;;  %2537 = vmatprep.subr.bf16.mxu0 %v4942_v46  ;;  %v5025_v45 = vld [vmem:[#allocation5 + $0x30c] ss:$16 sps:$4 sm:$0xff]   ;;  %v5020_v46 = vld [vmem:[#allocation5 + $0x108] ss:$16 sps:$4 sm:$0xff]  }
 0x10e   : > { %2650 = vmatprep.subr.bf16.mxu1 %v4945_v47  ;;  %2363 = vmatprep.mubr.bf16.mxu0 %v5730_v48  ;;  %v5023_v47 = vld [vmem:[#allocation5 + $0x308] ss:$16 sps:$4 sm:$0xff]  }
 0x10f   : > { %2476 = vmatprep.mubr.bf16.mxu1 %v5464_v18 }
 0x110   : > { %2538 = vmatpush1.bf16.msra.mxu0 %v4940_v49  ;;  %v5028_v49 = vld [vmem:[#allocation5 + $0x4ec] ss:$16 sps:$4 sm:$0xff]  }
 0x111   : > { %2651 = vmatpush1.bf16.msra.mxu1 %v4943_v50  ;;  %2539 = vmatprep.subr.bf16.mxu0 %v4952_v52  ;;  %v5031_v50 = vld [vmem:[#allocation5 + $0x6ec] ss:$16 sps:$4 sm:$0xff]   ;;  %v5210_v52 = vld [vmem:[%s5655_s12 + $0x4] ss:$28 sps:$4 sm:$0xff]  }
 0x112   : > { %2652 = vmatprep.subr.bf16.mxu1 %v4955_v53  ;;  %v5211_v53 = vld [vmem:[%s5655_s12 + $0xc] ss:$28 sps:$4 sm:$0xff]  }
 0x113   : > { %2364 = vmatmul.mubr.bf16.gmra.mxu0 %v5735_v51 }
 0x114   : > { %2477 = vmatmul.mubr.bf16.gmra.mxu1 %v5740_v54  ;;  %2540 = vmatpush1.bf16.msra.mxu0 %v4950_v55  ;;  %v5026_v55 = vld [vmem:[#allocation5 + $0x4e8] ss:$16 sps:$4 sm:$0xff]  }
 0x115   : > { %2653 = vmatpush1.bf16.msra.mxu1 %v4953_v56  ;;  %2541 = vmatprep.subr.bf16.mxu0 %v4958_v57  ;;  %v5029_v56 = vld [vmem:[#allocation5 + $0x6e8] ss:$16 sps:$4 sm:$0xff]   ;;  %v5034_v57 = vld [vmem:[#allocation5 + $0x4cc] ss:$16 sps:$4 sm:$0xff]  }
 0x116   : > { %2654 = vmatprep.subr.bf16.mxu1 %v4961_v58  ;;  %2373 = vmatprep.mubr.bf16.mxu0 %v5743_v59  ;;  %v5040_v58 = vld [vmem:[#allocation5 + $0x6cc] ss:$16 sps:$4 sm:$0xff]  }
 0x117   : > { %2486 = vmatprep.mubr.bf16.mxu1 %v5464_v18 }
 0x118   : > { %2542 = vmatpush1.bf16.msra.mxu0 %v4956_v60  ;;  %v5212_v60 = vld [vmem:[%s5655_s12] ss:$28 sps:$4 sm:$0xff]  }
 0x119   : > { %2655 = vmatpush1.bf16.msra.mxu1 %v4959_v61  ;;  %2543 = vmatprep.subr.bf16.mxu0 %v4968_v62  ;;  %v5213_v61 = vld [vmem:[%s5655_s12 + $0x8] ss:$28 sps:$4 sm:$0xff]  }
 0x11a   : > { %2656 = vmatprep.subr.bf16.mxu1 %v4971_v63  ;;  %v5032_v62 = vld [vmem:[#allocation5 + $0x4c8] ss:$16 sps:$4 sm:$0xff]  }
 0x11b   : > { %2374 = vmatmul.mubr.bf16.gmra.mxu0 %v5750_v0  ;;  %v5038_v63 = vld [vmem:[#allocation5 + $0x6c8] ss:$16 sps:$4 sm:$0xff]  }
 0x11c   : > { %2487 = vmatmul.mubr.bf16.gmra.mxu1 %v5753_v1  ;;  %2544 = vmatpush2.bf16.msra.mxu0 %v4966_v2  ;;  %v5214_v2 = vld [vmem:[%s5655_s12 + $0x3c] ss:$28 sps:$4 sm:$0xff]  }
 0x11d   : > { %2657 = vmatpush2.bf16.msra.mxu1 %v4969_v3  ;;  %2545 = vmatprep.subr.bf16.mxu0 %v4974_v4  ;;  %v5037_v3 = vld [vmem:[#allocation5 + $0x4ac] ss:$16 sps:$4 sm:$0xff]  }
 0x11e   : > { %2658 = vmatprep.subr.bf16.mxu1 %v4977_v5  ;;  %2383 = vmatprep.mubr.bf16.mxu0 %v5756_v6  ;;  %v5049_v4 = vld [vmem:[#allocation5 + $0x6ac] ss:$16 sps:$4 sm:$0xff]   ;;  %v5215_v5 = vld [vmem:[%s5655_s12 + $0x44] ss:$28 sps:$4 sm:$0xff]  }
 0x11f   : > { %2496 = vmatprep.mubr.bf16.mxu1 %v5464_v18 }
 0x120   : > { %2546 = vmatpush2.bf16.msra.mxu0 %v4972_v7  ;;  %v5035_v7 = vld [vmem:[#allocation5 + $0x4a8] ss:$16 sps:$4 sm:$0xff]  }
 0x121   : > { %2659 = vmatpush2.bf16.msra.mxu1 %v4975_v8  ;;  %2547 = vmatprep.subr.bf16.mxu0 %v4984_v9  ;;  %v5043_v8 = vld [vmem:[#allocation5 + $0x48c] ss:$16 sps:$4 sm:$0xff]   ;;  %v5047_v9 = vld [vmem:[#allocation5 + $0x6a8] ss:$16 sps:$4 sm:$0xff]  }
 0x122   : > { %2660 = vmatprep.subr.bf16.mxu1 %v4987_v10  ;;  %v5216_v10 = vld [vmem:[%s5655_s12 + $0x38] ss:$28 sps:$4 sm:$0xff]  }
 0x123   : > { %2384 = vmatmul.mubr.bf16.gmra.mxu0 %v5763_v11 }
 0x124   : > { %2497 = vmatmul.mubr.bf16.gmra.mxu1 %v5766_v12  ;;  %2548 = vmatpush2.bf16.msra.mxu0 %v4982_v13  ;;  %v5217_v13 = vld [vmem:[%s5655_s12 + $0x40] ss:$28 sps:$4 sm:$0xff]  }
 0x125   : > { %2661 = vmatpush2.bf16.msra.mxu1 %v4985_v14  ;;  %2549 = vmatprep.subr.bf16.mxu0 %v4990_v15  ;;  %v5058_v14 = vld [vmem:[#allocation5 + $0x68c] ss:$16 sps:$4 sm:$0xff]   ;;  %v5041_v15 = vld [vmem:[#allocation5 + $0x488] ss:$16 sps:$4 sm:$0xff]  }
 0x126   : > { %2662 = vmatprep.subr.bf16.mxu1 %v4993_v16  ;;  %2393 = vmatprep.mubr.bf16.mxu0 %v5769_v17  ;;  %v5218_v16 = vld [vmem:[%s5655_s12 + $0x74] ss:$28 sps:$4 sm:$0xff]  }
 0x127   : > { %2506 = vmatprep.mubr.bf16.mxu1 %v5464_v18 }
 0x128   : > { %2550 = vmatpush2.bf16.msra.mxu0 %v4988_v19  ;;  %v5219_v19 = vld [vmem:[%s5655_s12 + $0x7c] ss:$28 sps:$4 sm:$0xff]  }
 0x129   : > { %2663 = vmatpush2.bf16.msra.mxu1 %v4991_v20  ;;  %2551 = vmatprep.subr.bf16.mxu0 %v5000_v21  ;;  %v5046_v20 = vld [vmem:[#allocation5 + $0x46c] ss:$16 sps:$4 sm:$0xff]   ;;  %v5056_v21 = vld [vmem:[#allocation5 + $0x688] ss:$16 sps:$4 sm:$0xff]  }
 0x12a   : > { %2664 = vmatprep.subr.bf16.mxu1 %v5003_v22  ;;  %v5044_v22 = vld [vmem:[#allocation5 + $0x468] ss:$16 sps:$4 sm:$0xff]  }
 0x12b   : > { %2394 = vmatmul.mubr.bf16.gmra.mxu0 %v5776_v23 }
 0x12c   : > { %2507 = vmatmul.mubr.bf16.gmra.mxu1 %v5779_v24  ;;  %2552 = vmatpush2.bf16.msra.mxu0 %v4998_v25  ;;  %v5052_v25 = vld [vmem:[#allocation5 + $0x44c] ss:$16 sps:$4 sm:$0xff]  }
 0x12d   : > { %2665 = vmatpush2.bf16.msra.mxu1 %v5001_v27  ;;  %2553 = vmatprep.subr.bf16.mxu0 %v5006_v28  ;;  %v5065_v27 = vld [vmem:[#allocation5 + $0x668] ss:$16 sps:$4 sm:$0xff]  }
 0x12e   : > { %2666 = vmatprep.subr.bf16.mxu1 %v5009_v29  ;;  %2403 = vmatprep.mubr.bf16.mxu0 %v5782_v30  ;;  %v5050_v28 = vld [vmem:[#allocation5 + $0x448] ss:$16 sps:$4 sm:$0xff]   ;;  %v5067_v29 = vld [vmem:[#allocation5 + $0x66c] ss:$16 sps:$4 sm:$0xff]  }
 0x12f   : > { %2516 = vmatprep.mubr.bf16.mxu1 %v5464_v18 }
 0x130   : > { %2554 = vmatpush2.bf16.msra.mxu0 %v5004_v33  ;;  %v5076_v33 = vld [vmem:[#allocation5 + $0x64c] ss:$16 sps:$4 sm:$0xff]  }
 0x131   : > { %2667 = vmatpush2.bf16.msra.mxu1 %v5007_v34  ;;  %2555 = vmatprep.subr.bf16.mxu0 %v5016_v35  ;;  %v5220_v34 = vld [vmem:[%s5655_s12 + $0x70] ss:$28 sps:$4 sm:$0xff]   ;;  %v5221_v35 = vld [vmem:[%s5655_s12 + $0x78] ss:$28 sps:$4 sm:$0xff]  }
 0x132   : > { %2668 = vmatprep.subr.bf16.mxu1 %v5019_v36  ;;  %v5055_v36 = vld [vmem:[#allocation5 + $0x42c] ss:$16 sps:$4 sm:$0xff]  }
 0x133   : > { %2404 = vmatmul.mubr.bf16.gmra.mxu0 %v5789_v38 }
 0x134   : > { %2517 = vmatmul.mubr.bf16.gmra.mxu1 %v5792_v39  ;;  %2556 = vmatpush2.bf16.msra.mxu0 %v5014_v41  ;;  %v5222_v41 = vld [vmem:[%s5655_s12 + $0xac] ss:$28 sps:$4 sm:$0xff]  }
 0x135   : > { %2669 = vmatpush2.bf16.msra.mxu1 %v5017_v42  ;;  %2557 = vmatprep.subr.bf16.mxu0 %v5022_v44  ;;  %v5223_v42 = vld [vmem:[%s5655_s12 + $0xb4] ss:$28 sps:$4 sm:$0xff]   ;;  %v5053_v44 = vld [vmem:[#allocation5 + $0x428] ss:$16 sps:$4 sm:$0xff]  }
 0x136   : > { %2670 = vmatprep.subr.bf16.mxu1 %v5025_v45  ;;  %2559 = vmatprep.mubr.bf16.mxu0 %v5210_v52  ;;  %v5061_v45 = vld [vmem:[#allocation5 + $0x40c] ss:$16 sps:$4 sm:$0xff]  }
 0x137   : > { %2672 = vmatprep.mubr.bf16.mxu1 %v5211_v53  ;;  %v5225_v52 = vld [vmem:[%s5655_s12 + $0xb0] ss:$28 sps:$4 sm:$0xff]  }
 0x138   : > { %2558 = vmatpush2.bf16.msra.mxu0 %v5020_v46  ;;  %v5074_v46 = vld [vmem:[#allocation5 + $0x648] ss:$16 sps:$4 sm:$0xff]   ;;  %v5064_v53 = vld [vmem:[#allocation5 + $0x5ec] ss:$16 sps:$4 sm:$0xff]  }
 0x139   : > { %2671 = vmatpush2.bf16.msra.mxu1 %v5023_v47  ;;  %2753 = vmatprep.subr.bf16.mxu0 %v5028_v49  ;;  %v5085_v47 = vld [vmem:[#allocation5 + $0x62c] ss:$16 sps:$4 sm:$0xff]   ;;  %v5059_v49 = vld [vmem:[#allocation5 + $0x408] ss:$16 sps:$4 sm:$0xff]  }
 0x13a   : > { %2866 = vmatprep.subr.bf16.mxu1 %v5031_v50  ;;  %v5224_v50 = vld [vmem:[%s5655_s12 + $0xa8] ss:$28 sps:$4 sm:$0xff]  }
 0x13b   : > { %2560 = vmatmul.mubr.bf16.vlgmr.msra.gmra.mxu0 %v5212_v60  ;;  %v5070_v60 = vld [vmem:[#allocation5 + $0x5cc] ss:$16 sps:$4 sm:$0xff]  }
 0x13c   : > { %2673 = vmatmul.mubr.bf16.vlgmr.msra.gmra.mxu1 %v5213_v61  ;;  %2754 = vmatpush1.bf16.msra.mxu0 %v5026_v55  ;;  %v5226_v55 = vld [vmem:[%s5655_s12 + $0xe4] ss:$28 sps:$4 sm:$0xff]   ;;  %v5094_v61 = vld [vmem:[#allocation5 + $0x60c] ss:$16 sps:$4 sm:$0xff]  }
 0x13d   : > { %2867 = vmatpush1.bf16.msra.mxu1 %v5029_v56  ;;  %2755 = vmatprep.subr.bf16.mxu0 %v5034_v57  ;;  %v5083_v56 = vld [vmem:[#allocation5 + $0x628] ss:$16 sps:$4 sm:$0xff]  }
 0x13e   : > { %2569 = vmatprep.mubr.bf16.mxu0 %v5214_v2  ;;  %2682 = vmatprep.mubr.bf16.mxu1 %v5215_v5  ;;  %v5227_v57 = vld [vmem:[%s5655_s12 + $0xec] ss:$28 sps:$4 sm:$0xff]   ;;  %v5228_v2 = vld [vmem:[%s5655_s12 + $0xe0] ss:$28 sps:$4 sm:$0xff]  }
 0x13f   : > { %2868 = vmatprep.subr.bf16.mxu1 %v5040_v58  ;;  %v5062_v58 = vld [vmem:[#allocation5 + $0x5e8] ss:$16 sps:$4 sm:$0xff]  }
 0x140   : > { %2756 = vmatpush1.bf16.msra.mxu0 %v5032_v62  ;;  %v5092_v62 = vld [vmem:[#allocation5 + $0x608] ss:$16 sps:$4 sm:$0xff]  }
 0x141   : > { %2869 = vmatpush1.bf16.msra.mxu1 %v5038_v63  ;;  %2757 = vmatprep.subr.bf16.mxu0 %v5037_v3  ;;  %v5068_v63 = vld [vmem:[#allocation5 + $0x5c8] ss:$16 sps:$4 sm:$0xff]  }
 0x142   : > { %2870 = vmatprep.subr.bf16.mxu1 %v5049_v4  ;;  %v5229_v3 = vld [vmem:[%s5655_s12 + $0xe8] ss:$28 sps:$4 sm:$0xff]   ;;  %v5073_v4 = vld [vmem:[#allocation5 + $0x5ac] ss:$16 sps:$4 sm:$0xff]  }
 0x143   : > { %2570 = vmatmul.mubr.bf16.gmra.mxu0 %v5216_v10  ;;  %v5230_v5 = vld [vmem:[%s5655_s12 + $0x11c] ss:$28 sps:$4 sm:$0xff]  }
 0x144   : > { %2683 = vmatmul.mubr.bf16.gmra.mxu1 %v5217_v13  ;;  %2758 = vmatpush1.bf16.msra.mxu0 %v5035_v7  ;;  %v5231_v7 = vld [vmem:[%s5655_s12 + $0x124] ss:$28 sps:$4 sm:$0xff]   ;;  %v5232_v10 = vld [vmem:[%s5655_s12 + $0x118] ss:$28 sps:$4 sm:$0xff]  }
 0x145   : > { %2579 = vmatprep.mubr.bf16.mxu0 %v5218_v16  ;;  %2759 = vmatprep.subr.bf16.mxu0 %v5043_v8  ;;  %v5071_v8 = vld [vmem:[#allocation5 + $0x5a8] ss:$16 sps:$4 sm:$0xff]   ;;  %v5233_v13 = vld [vmem:[%s5655_s12 + $0x120] ss:$28 sps:$4 sm:$0xff]  }
 0x146   : > { %2692 = vmatprep.mubr.bf16.mxu1 %v5219_v19  ;;  %2871 = vmatpush1.bf16.msra.mxu1 %v5047_v9  ;;  %v5079_v9 = vld [vmem:[#allocation5 + $0x58c] ss:$16 sps:$4 sm:$0xff]  }
 0x147   : > { %2872 = vmatprep.subr.bf16.mxu1 %v5058_v14  ;;  %v5077_v14 = vld [vmem:[#allocation5 + $0x588] ss:$16 sps:$4 sm:$0xff]   ;;  %v5082_v19 = vld [vmem:[#allocation5 + $0x56c] ss:$16 sps:$4 sm:$0xff]  }
 0x148   : > { %2760 = vmatpush1.bf16.msra.mxu0 %v5041_v15  ;;  %v5234_v15 = vld [vmem:[%s5655_s12 + $0x154] ss:$28 sps:$4 sm:$0xff]   ;;  %v5235_v16 = vld [vmem:[%s5655_s12 + $0x15c] ss:$28 sps:$4 sm:$0xff]  }
 0x149   : > { %2761 = vmatprep.subr.bf16.mxu0 %v5046_v20  ;;  %v5080_v20 = vld [vmem:[#allocation5 + $0x568] ss:$16 sps:$4 sm:$0xff]  }
 0x14a   : > { %2873 = vmatpush1.bf16.msra.mxu1 %v5056_v21  ;;  %v5088_v21 = vld [vmem:[#allocation5 + $0x54c] ss:$16 sps:$4 sm:$0xff]  }
 0x14b   : > { %2580 = vmatmul.mubr.bf16.gmra.mxu0 %v5220_v34  ;;  %2874 = vmatprep.subr.bf16.mxu1 %v5067_v29  ;;  %v647_v29 = vlaneseq  ;;  %v5091_v34 = vld [vmem:[#allocation5 + $0x52c] ss:$16 sps:$4 sm:$0xff]  }
 0x14c   : > { %2693 = vmatmul.mubr.bf16.gmra.mxu1 %v5221_v35  ;;  %2762 = vmatpush1.bf16.msra.mxu0 %v5044_v22  ;;  %v5236_v22 = vld [vmem:[%s5655_s12 + $0x150] ss:$28 sps:$4 sm:$0xff]   ;;  %v5089_v35 = vld [vmem:[#allocation5 + $0x528] ss:$16 sps:$4 sm:$0xff]  }
 0x14d   : > { %2589 = vmatprep.mubr.bf16.mxu0 %v5222_v41  ;;  %2763 = vmatprep.subr.bf16.mxu0 %v5052_v25  ;;  %v5237_v25 = vld [vmem:[%s5655_s12 + $0x158] ss:$28 sps:$4 sm:$0xff]   ;;  %v5097_v41 = vld [vmem:[#allocation5 + $0x50c] ss:$16 sps:$4 sm:$0xff]  }
 0x14e   : > { %2702 = vmatprep.mubr.bf16.mxu1 %v5223_v42  ;;  %2875 = vmatpush1.bf16.msra.mxu1 %v5065_v27  ;;  %v5086_v27 = vld [vmem:[#allocation5 + $0x548] ss:$16 sps:$4 sm:$0xff]  }
 0x14f   : > { %2876 = vmatprep.subr.bf16.mxu1 %v5076_v33  ;;  %v5239_v33 = vld [vmem:[%s5655_s12 + $0x194] ss:$28 sps:$4 sm:$0xff]   ;;  %v5240_v42 = vld [vmem:[%s5655_s12 + $0x188] ss:$28 sps:$4 sm:$0xff]  }
 0x150   : > { %2764 = vmatpush1.bf16.msra.mxu0 %v5050_v28  ;;  %v5238_v28 = vld [vmem:[%s5655_s12 + $0x18c] ss:$28 sps:$4 sm:$0xff]  }
 0x151   : > { %2765 = vmatprep.subr.bf16.mxu0 %v5055_v36  ;;  %v5826_v36 = vshrl.u32 %v647_v29, 7 }
 0x152   : > { %2877 = vmatpush1.bf16.msra.mxu1 %v5074_v46  ;;  %v5242_v46 = vld [vmem:[%s5655_s12 + $0x14] ss:$28 sps:$4 sm:$0xff]  }
 0x153   : > { %2590 = vmatmul.mubr.bf16.gmra.mxu0 %v5224_v50  ;;  %2878 = vmatprep.subr.bf16.mxu1 %v5085_v47  ;;  %6433 = vst [vmem:[#allocation16_spill] sm:$0xff] %v5826_v36  ;;  %v6411_v47 = vsub.s32 0, %v5826_v36  ;;  %v5100_v50 = vld [vmem:[#allocation8 + $0x74] ss:$8 sps:$4 sm:$0xff]  }
 0x154   : > { %2703 = vmatmul.mubr.bf16.gmra.mxu1 %v5225_v52  ;;  %2766 = vmatpush1.bf16.msra.mxu0 %v5053_v44  ;;  %v5241_v44 = vld [vmem:[%s5655_s12 + $0x190] ss:$28 sps:$4 sm:$0xff]   ;;  %v6412_v52 = vsub.s32 1, %v5826_v36 }
 0x155   : > { %2599 = vmatprep.mubr.bf16.mxu0 %v5226_v55  ;;  %2767 = vmatprep.subr.bf16.mxu0 %v5061_v45  ;;  %v5095_v45 = vld [vmem:[#allocation5 + $0x508] ss:$16 sps:$4 sm:$0xff]   ;;  %v5098_v55 = vld [vmem:[#allocation8 + $0x70] ss:$8 sps:$4 sm:$0xff]  }
 0x156   : > { %2712 = vmatprep.mubr.bf16.mxu1 %v5227_v57  ;;  %2879 = vmatpush1.bf16.msra.mxu1 %v5083_v56  ;;  %v5103_v57 = vld [vmem:[#allocation8 + $0x64] ss:$8 sps:$4 sm:$0xff]  }
 0x157   : > { %2880 = vmatprep.subr.bf16.mxu1 %v5094_v61  ;;  %v5243_v61 = vld [vmem:[%s5655_s12 + $0x10] ss:$28 sps:$4 sm:$0xff]  }
 0x158   : > { %2768 = vmatpush1.bf16.msra.mxu0 %v5059_v49  ;;  %v5833_v49 = vld [vmem:[#allocation7] sm:$0xf] }
 0x159   : > { %2769 = vmatprep.subr.bf16.mxu0 %v5064_v53  ;;  %6434 = vst [vmem:[#allocation17_spill] sm:$0xff] %v5833_v49  ;;  %v5839_v53 = vrot.slane %v5833_v49, %v6411_v47  ;;  %v5844_v56 = vrot.slane %v5833_v49, %v6412_v52 }
 0x15a   : > { %2881 = vmatpush1.bf16.msra.mxu1 %v5092_v62  ;;  %v5244_v62 = vld [vmem:[%s5655_s12 + $0x18] ss:$28 sps:$4 sm:$0xff]   ;;  %s5381_s12 = sshll.u32 %s5465_s28, 4  ;;  %s5382_s12 = int_to_ptr.vmem [resolvable:$false] %s5381_s12 }
 0x15b   : > { %2600 = vmatmul.mubr.bf16.gmra.mxu0 %v5228_v2  ;;  %s5383_s30 = scalar_lea.vmem %s5382_s12, 4096  ;;  %p5384_p3 = scmp.lt.s32.totalorder %s6354_s20, %s5382_s12 }
 0x15c   : > { %2713 = vmatmul.mubr.bf16.gmra.mxu1 %v5229_v3  ;;  %2770 = vmatpush2.bf16.msra.mxu0 %v5062_v58  ;;  %p5385_p9 = scmp.lt.s32.totalorder %s5383_s30, %s5377_s18 }
 0x15d   : > { %2609 = vmatprep.mubr.bf16.mxu0 %v5230_v5  ;;  %2771 = vmatprep.subr.bf16.mxu0 %v5070_v60 }
 0x15e   : > { %2722 = vmatprep.mubr.bf16.mxu1 %v5231_v7  ;;  %p5386_p13 = por %p5385_p9, %p5384_p3 }
 0x160   : > { %2772 = vmatpush2.bf16.msra.mxu0 %v5068_v63  ;;  %p5387_p5 = pnand %p5386_p13, %p5380_p6 }
 0x161   : > { %2773 = vmatprep.subr.bf16.mxu0 %v5073_v4  ;;  %v5101_v4 = vld [vmem:[#allocation8 + $0x60] ss:$8 sps:$4 sm:$0xff]  }
 0x163   : > { %2610 = vmatmul.mubr.bf16.gmra.mxu0 %v5232_v10 }
 0x164   : > { %2723 = vmatmul.mubr.bf16.gmra.mxu1 %v5233_v13  ;;  %2774 = vmatpush2.bf16.msra.mxu0 %v5071_v8  ;;  %v5106_v8 = vld [vmem:[#allocation8 + $0x54] ss:$8 sps:$4 sm:$0xff]  }
 0x165   : > { %2619 = vmatprep.mubr.bf16.mxu0 %v5234_v15  ;;  %2775 = vmatprep.subr.bf16.mxu0 %v5079_v9  ;;  %v5104_v15 = vld [vmem:[#allocation8 + $0x50] ss:$8 sps:$4 sm:$0xff]  }
 0x166   : > { %2732 = vmatprep.mubr.bf16.mxu1 %v5235_v16  ;;  %v5109_v16 = vld [vmem:[#allocation8 + $0x44] ss:$8 sps:$4 sm:$0xff]  }
 0x168   : > { %2776 = vmatpush2.bf16.msra.mxu0 %v5077_v14 }
 0x169   : > { %2777 = vmatprep.subr.bf16.mxu0 %v5082_v19 }
 0x16b   : > { %2620 = vmatmul.mubr.bf16.gmra.mxu0 %v5236_v22 }
 0x16c   : > { %2733 = vmatmul.mubr.bf16.gmra.mxu1 %v5237_v25  ;;  %2778 = vmatpush2.bf16.msra.mxu0 %v5080_v20 }
 0x16d   : > { %2629 = vmatprep.mubr.bf16.mxu0 %v5238_v28  ;;  %2779 = vmatprep.subr.bf16.mxu0 %v5088_v21 }
 0x16e   : > { %2742 = vmatprep.mubr.bf16.mxu1 %v5239_v33  ;;  %v5112_v33 = vld [vmem:[#allocation8 + $0x34] ss:$8 sps:$4 sm:$0xff]  }
 0x170   : > { %2780 = vmatpush2.bf16.msra.mxu0 %v5086_v27  ;;  %v5107_v27 = vld [vmem:[#allocation8 + $0x40] ss:$8 sps:$4 sm:$0xff]  }
 0x171   : > { %2781 = vmatprep.subr.bf16.mxu0 %v5091_v34 }
 0x173   : > { %2630 = vmatmul.mubr.bf16.gmra.mxu0 %v5240_v42  ;;  %v5148_v42 = vld [vmem:[#allocation8 + $0x174] ss:$8 sps:$4 sm:$0xff]  }
 0x174   : > { %2743 = vmatmul.mubr.bf16.gmra.mxu1 %v5241_v44  ;;  %2782 = vmatpush2.bf16.msra.mxu0 %v5089_v35  ;;  %v5115_v44 = vld [vmem:[#allocation8 + $0x24] ss:$8 sps:$4 sm:$0xff]  }
 0x175   : > { %2785 = vmatprep.mubr.bf16.mxu0 %v5242_v46  ;;  %2783 = vmatprep.subr.bf16.mxu0 %v5097_v41  ;;  %v5110_v41 = vld [vmem:[#allocation8 + $0x30] ss:$8 sps:$4 sm:$0xff]  }
 0x176   : > { %2898 = vmatprep.mubr.bf16.mxu1 %v5464_v18  ;;  %3584 = vmatprep.subr.bf16.mxu1 %v5148_v42 }
 0x178   : > { %2784 = vmatpush2.bf16.msra.mxu0 %v5095_v45  ;;  %v5146_v45 = vld [vmem:[#allocation8 + $0x170] ss:$8 sps:$4 sm:$0xff]  }
 0x179   : > { %3471 = vmatprep.subr.bf16.mxu0 %v5100_v50 }
 0x17b   : > { %v2109_v58 = vpop.f32.mrf.mxu0  ;;  %2786 = vmatmul.mubr.bf16.vlgmr.msra.gmra.mxu0 %v5243_v61  ;;  %v5151_v61 = vld [vmem:[#allocation8 + $0x164] ss:$8 sps:$4 sm:$0xff]  }
 0x17c   : > { %v2222_v60 = vpop.f32.mrf.mxu1  ;;  %2899 = vmatmul.mubr.bf16.vlgmr.msra.gmra.mxu1 %v5244_v62  ;;  %v2110_v63 = vadd.f32 %v2109_v58, %v5839_v53  ;;  %2795 = vmatprep.mubr.bf16.mxu0 %v5706_v26 }
 0x17d   : > { %2908 = vmatprep.mubr.bf16.mxu1 %v5464_v18  ;;  %v2111_v2 = vpop.f32.mrf.mxu0  ;;  %3472 = vmatpush1.bf16.msra.mxu0 %v5098_v55 }
 0x17e   : > { %v2224_v3 = vpop.f32.mrf.mxu1  ;;  %v5851_v5 = vadd.f32 %v2222_v60, %v2110_v63  ;;  %v2112_v7 = vadd.f32 %v2111_v2, %v5844_v56  ;;  %3473 = vmatprep.subr.bf16.mxu0 %v5103_v57  ;;  %v5113_v60 = vld [vmem:[#allocation8 + $0x20] ss:$8 sps:$4 sm:$0xff]   ;;  %3585 = vmatpush1.bf16.msra.mxu1 %v5146_v45 }
 0x17f   : > { %v5854_v9 = vpop.f32.mrf.mxu0  ;;  %3586 = vmatprep.subr.bf16.mxu1 %v5151_v61 }
 0x180   : > { %v5856_v10 = vpop.f32.mrf.mxu1  ;;  %v5858_v13 = vadd.f32 %v2224_v3, %v2112_v7 }
 0x181   : > { %v5860_v14 = vpop.f32.mrf.mxu0  ;;  %3474 = vmatpush1.bf16.msra.mxu0 %v5101_v4 }
 0x182   : > { %v5862_v26 = vpop.f32.mrf.mxu1  ;;  %3475 = vmatprep.subr.bf16.mxu0 %v5106_v8  ;;  %v5116_v8 = vld [vmem:[#allocation8 + $0x10] ss:$8 sps:$4 sm:$0xff]  }
 0x183   : > { %v2119_v19 = vpop.f32.mrf.mxu0  ;;  %2796 = vmatmul.mubr.bf16.gmra.mxu0 %v5711_v31 }
 0x184   : > { %v2232_v20 = vpop.f32.mrf.mxu1  ;;  %2909 = vmatmul.mubr.bf16.gmra.mxu1 %v5714_v32  ;;  %v2120_v21 = vadd.f32 %v2119_v19, %v5839_v53  ;;  %2805 = vmatprep.mubr.bf16.mxu0 %v5717_v37  ;;  %v5152_v19 = vld [vmem:[#allocation8 + $0x150] ss:$8 sps:$4 sm:$0xff]  }
 0x185   : > { %2918 = vmatprep.mubr.bf16.mxu1 %v5464_v18  ;;  %v2121_v22 = vpop.f32.mrf.mxu0  ;;  %3476 = vmatpush1.bf16.msra.mxu0 %v5104_v15  ;;  %v5154_v15 = vld [vmem:[#allocation8 + $0x154] ss:$8 sps:$4 sm:$0xff]  }
 0x186   : > { %v2234_v25 = vpop.f32.mrf.mxu1  ;;  %v5869_v28 = vadd.f32 %v2232_v20, %v2120_v21  ;;  %v2122_v29 = vadd.f32 %v2121_v22, %v5844_v56  ;;  %3477 = vmatprep.subr.bf16.mxu0 %v5109_v16  ;;  %v5121_v16 = vld [vmem:[#allocation8 + $0x4] ss:$8 sps:$4 sm:$0xff]  }
 0x187   : > { %v5872_v34 = vpop.f32.mrf.mxu0 }
 0x188   : > { %v5874_v31 = vpop.f32.mrf.mxu1  ;;  %v5876_v32 = vadd.f32 %v2234_v25, %v2122_v29  ;;  %v5119_v29 = vld [vmem:[#allocation8] ss:$8 sps:$4 sm:$0xff]   ;;  %v2124_v36 = vadd.f32 %v5872_v34, %v5839_v53 }
 0x189   : > { %v5878_v35 = vpop.f32.mrf.mxu0  ;;  %3478 = vmatpush1.bf16.msra.mxu0 %v5107_v27 }
 0x18a   : > { %v5880_v37 = vpop.f32.mrf.mxu1  ;;  %3479 = vmatprep.subr.bf16.mxu0 %v5112_v33  ;;  %v5157_v33 = vld [vmem:[#allocation8 + $0x144] ss:$8 sps:$4 sm:$0xff]  }
 0x18b   : > { %v2129_v46 = vpop.f32.mrf.mxu0  ;;  %2806 = vmatmul.mubr.bf16.gmra.mxu0 %v5722_v40  ;;  %v5118_v40 = vld [vmem:[#allocation8 + $0x14] ss:$8 sps:$4 sm:$0xff]  }
 0x18c   : > { %v2242_v50 = vpop.f32.mrf.mxu1  ;;  %2919 = vmatmul.mubr.bf16.gmra.mxu1 %v5727_v43  ;;  %v2130_v55 = vadd.f32 %v2129_v46, %v5839_v53  ;;  %2815 = vmatprep.mubr.bf16.mxu0 %v5730_v48  ;;  %v5149_v43 = vld [vmem:[#allocation8 + $0x160] ss:$8 sps:$4 sm:$0xff]  }
 0x18d   : > { %2928 = vmatprep.mubr.bf16.mxu1 %v5464_v18  ;;  %v2131_v57 = vpop.f32.mrf.mxu0  ;;  %3480 = vmatpush1.bf16.msra.mxu0 %v5110_v41 }
 0x18e   : > { %v2244_v58 = vpop.f32.mrf.mxu1  ;;  %v5887_v62 = vadd.f32 %v2242_v50, %v2130_v55  ;;  %v2132_v63 = vadd.f32 %v2131_v57, %v5844_v56  ;;  %3481 = vmatprep.subr.bf16.mxu0 %v5115_v44  ;;  %3587 = vmatpush1.bf16.msra.mxu1 %v5149_v43  ;;  %v5122_v55 = vld [vmem:[#allocation8 + $0xf0] ss:$8 sps:$4 sm:$0xff]   ;;  %v5160_v57 = vld [vmem:[#allocation8 + $0x134] ss:$8 sps:$4 sm:$0xff]  }
 0x18f   : > { %v5890_v2 = vpop.f32.mrf.mxu0  ;;  %3588 = vmatprep.subr.bf16.mxu1 %v5154_v15  ;;  %v5125_v15 = vld [vmem:[#allocation8 + $0xe0] ss:$8 sps:$4 sm:$0xff]  }
 0x190   : > { %v5892_v3 = vpop.f32.mrf.mxu1  ;;  %v5894_v48 = vadd.f32 %v2244_v58, %v2132_v63  ;;  %v5127_v58 = vld [vmem:[#allocation8 + $0xe4] ss:$8 sps:$4 sm:$0xff]  }
 0x191   : > { %v5896_v4 = vpop.f32.mrf.mxu0  ;;  %3482 = vmatpush1.bf16.msra.mxu0 %v5113_v60  ;;  %v5158_v60 = vld [vmem:[#allocation8 + $0x130] ss:$8 sps:$4 sm:$0xff]  }
 0x192   : > { %v5898_v7 = vpop.f32.mrf.mxu1  ;;  %3483 = vmatprep.subr.bf16.mxu0 %v5118_v40  ;;  %3589 = vmatpush1.bf16.msra.mxu1 %v5152_v19 }
 0x193   : > { %v2139_v20 = vpop.f32.mrf.mxu0  ;;  %2816 = vmatmul.mubr.bf16.gmra.mxu0 %v5735_v51  ;;  %v5124_v51 = vld [vmem:[#allocation8 + $0xf4] ss:$8 sps:$4 sm:$0xff]   ;;  %3590 = vmatprep.subr.bf16.mxu1 %v5157_v33 }
 0x194   : > { %v2252_v21 = vpop.f32.mrf.mxu1  ;;  %2929 = vmatmul.mubr.bf16.gmra.mxu1 %v5740_v54  ;;  %v2140_v22 = vadd.f32 %v2139_v20, %v5839_v53  ;;  %2825 = vmatprep.mubr.bf16.mxu0 %v5743_v59  ;;  %v5155_v54 = vld [vmem:[#allocation8 + $0x140] ss:$8 sps:$4 sm:$0xff]   ;;  %v5166_v33 = vld [vmem:[#allocation8 + $0x114] ss:$8 sps:$4 sm:$0xff]  }
 0x195   : > { %2938 = vmatprep.mubr.bf16.mxu1 %v5464_v18  ;;  %v2141_v25 = vpop.f32.mrf.mxu0  ;;  %3484 = vmatpush1.bf16.msra.mxu0 %v5116_v8 }
 0x196   : > { %v2254_v27 = vpop.f32.mrf.mxu1  ;;  %v5905_v41 = vadd.f32 %v2252_v21, %v2140_v22  ;;  %v2142_v42 = vadd.f32 %v2141_v25, %v5844_v56  ;;  %3485 = vmatprep.subr.bf16.mxu0 %v5121_v16  ;;  %3591 = vmatpush1.bf16.msra.mxu1 %v5155_v54  ;;  %v5163_v16 = vld [vmem:[#allocation8 + $0x124] ss:$8 sps:$4 sm:$0xff]  }
 0x197   : > { %v5908_v44 = vpop.f32.mrf.mxu0  ;;  %3592 = vmatprep.subr.bf16.mxu1 %v5160_v57 }
 0x198   : > { %v5910_v45 = vpop.f32.mrf.mxu1  ;;  %v5912_v59 = vadd.f32 %v2254_v27, %v2142_v42  ;;  %v5133_v42 = vld [vmem:[#allocation8 + $0xc4] ss:$8 sps:$4 sm:$0xff]  }
 0x199   : > { %v5914_v46 = vpop.f32.mrf.mxu0  ;;  %3486 = vmatpush1.bf16.msra.mxu0 %v5119_v29  ;;  %v5128_v29 = vld [vmem:[#allocation8 + $0xd0] ss:$8 sps:$4 sm:$0xff]  }
 0x19a   : > { %v5916_v50 = vpop.f32.mrf.mxu1  ;;  %3487 = vmatprep.subr.bf16.mxu0 %v5124_v51  ;;  %3593 = vmatpush1.bf16.msra.mxu1 %v5158_v60  ;;  %v5164_v51 = vld [vmem:[#allocation8 + $0x110] ss:$8 sps:$4 sm:$0xff]  }
 0x19b   : > { %v2149_v61 = vpop.f32.mrf.mxu0  ;;  %2826 = vmatmul.mubr.bf16.gmra.mxu0 %v5750_v0  ;;  %v5130_v0 = vld [vmem:[#allocation8 + $0xd4] ss:$8 sps:$4 sm:$0xff]   ;;  %3594 = vmatprep.subr.bf16.mxu1 %v5163_v16 }
 0x19c   : > { %v2262_v63 = vpop.f32.mrf.mxu1  ;;  %2939 = vmatmul.mubr.bf16.gmra.mxu1 %v5753_v1  ;;  %v2150_v40 = vadd.f32 %v2149_v61, %v5839_v53  ;;  %2835 = vmatprep.mubr.bf16.mxu0 %v5756_v6  ;;  %v5161_v1 = vld [vmem:[#allocation8 + $0x120] ss:$8 sps:$4 sm:$0xff]  }
 0x19d   : > { %2948 = vmatprep.mubr.bf16.mxu1 %v5464_v18  ;;  %v2151_v43 = vpop.f32.mrf.mxu0  ;;  %3488 = vmatpush2.bf16.msra.mxu0 %v5122_v55  ;;  %v5131_v61 = vld [vmem:[#allocation8 + $0xc0] ss:$8 sps:$4 sm:$0xff]  }
 0x19e   : > { %v2264_v8 = vpop.f32.mrf.mxu1  ;;  %v5923_v19 = vadd.f32 %v2262_v63, %v2150_v40  ;;  %v2152_v20 = vadd.f32 %v2151_v43, %v5844_v56  ;;  %3489 = vmatprep.subr.bf16.mxu0 %v5127_v58  ;;  %3595 = vmatpush1.bf16.msra.mxu1 %v5161_v1  ;;  %v5169_v63 = vld [vmem:[#allocation8 + $0x104] ss:$8 sps:$4 sm:$0xff]   ;;  %v5172_v1 = vld [vmem:[#allocation8 + $0x1f4] ss:$8 sps:$4 sm:$0xff]  }
 0x19f   : > { %v5926_v21 = vpop.f32.mrf.mxu0  ;;  %3596 = vmatprep.subr.bf16.mxu1 %v5166_v33  ;;  %v5170_v33 = vld [vmem:[#allocation8 + $0x1f0] ss:$8 sps:$4 sm:$0xff]  }
 0x1a0   : > { %v5928_v22 = vpop.f32.mrf.mxu1  ;;  %v5930_v6 = vadd.f32 %v2264_v8, %v2152_v20 }
 0x1a1   : > { %v5932_v25 = vpop.f32.mrf.mxu0  ;;  %3490 = vmatpush2.bf16.msra.mxu0 %v5125_v15 }
 0x1a2   : > { %v5934_v27 = vpop.f32.mrf.mxu1  ;;  %3491 = vmatprep.subr.bf16.mxu0 %v5130_v0  ;;  %3597 = vmatpush1.bf16.msra.mxu1 %v5164_v51  ;;  %v5134_v0 = vld [vmem:[#allocation8 + $0xb0] ss:$8 sps:$4 sm:$0xff]  }
 0x1a3   : > { %v2159_v54 = vpop.f32.mrf.mxu0  ;;  %2836 = vmatmul.mubr.bf16.gmra.mxu0 %v5763_v11  ;;  %v5136_v11 = vld [vmem:[#allocation8 + $0xb4] ss:$8 sps:$4 sm:$0xff]   ;;  %3598 = vmatprep.subr.bf16.mxu1 %v5169_v63 }
 0x1a4   : > { %v2272_v55 = vpop.f32.mrf.mxu1  ;;  %2949 = vmatmul.mubr.bf16.gmra.mxu1 %v5766_v12  ;;  %v2160_v57 = vadd.f32 %v2159_v54, %v5839_v53  ;;  %2845 = vmatprep.mubr.bf16.mxu0 %v5769_v17  ;;  %v5167_v12 = vld [vmem:[#allocation8 + $0x100] ss:$8 sps:$4 sm:$0xff]  }
 0x1a5   : > { %2958 = vmatprep.mubr.bf16.mxu1 %v5464_v18  ;;  %v2161_v58 = vpop.f32.mrf.mxu0  ;;  %3492 = vmatpush2.bf16.msra.mxu0 %v5128_v29  ;;  %v5139_v29 = vld [vmem:[#allocation8 + $0xa4] ss:$8 sps:$4 sm:$0xff]  }
 0x1a6   : > { %v2274_v60 = vpop.f32.mrf.mxu1  ;;  %v5941_v40 = vadd.f32 %v2272_v55, %v2160_v57  ;;  %v2162_v43 = vadd.f32 %v2161_v58, %v5844_v56  ;;  %3493 = vmatprep.subr.bf16.mxu0 %v5133_v42  ;;  %3599 = vmatpush1.bf16.msra.mxu1 %v5167_v12  ;;  %v5137_v58 = vld [vmem:[#allocation8 + $0xa0] ss:$8 sps:$4 sm:$0xff]  }
 0x1a7   : > { %v5944_v8 = vpop.f32.mrf.mxu0  ;;  %3600 = vmatprep.subr.bf16.mxu1 %v5172_v1  ;;  %v5178_v1 = vld [vmem:[#allocation8 + $0x1d4] ss:$8 sps:$4 sm:$0xff]  }
 0x1a8   : > { %v5946_v15 = vpop.f32.mrf.mxu1  ;;  %v5948_v17 = vadd.f32 %v2274_v60, %v2162_v43  ;;  %v5175_v60 = vld [vmem:[#allocation8 + $0x1e4] ss:$8 sps:$4 sm:$0xff]  }
 0x1a9   : > { %v5950_v16 = vpop.f32.mrf.mxu0  ;;  %3494 = vmatpush2.bf16.msra.mxu0 %v5131_v61 }
 0x1aa   : > { %v5952_v20 = vpop.f32.mrf.mxu1  ;;  %3495 = vmatprep.subr.bf16.mxu0 %v5136_v11  ;;  %3601 = vmatpush2.bf16.msra.mxu1 %v5170_v33 }
 0x1ab   : > { %v2169_v42 = vpop.f32.mrf.mxu0  ;;  %2846 = vmatmul.mubr.bf16.gmra.mxu0 %v5776_v23  ;;  %v5142_v23 = vld [vmem:[#allocation8 + $0x94] ss:$8 sps:$4 sm:$0xff]   ;;  %3602 = vmatprep.subr.bf16.mxu1 %v5175_v60  ;;  %v5143_v60 = vld [vmem:[#allocation8 + $0x80] ss:$8 sps:$4 sm:$0xff]  }
 0x1ac   : > { %v2282_v51 = vpop.f32.mrf.mxu1  ;;  %2959 = vmatmul.mubr.bf16.gmra.mxu1 %v5779_v24  ;;  %v2170_v54 = vadd.f32 %v2169_v42, %v5839_v53  ;;  %2855 = vmatprep.mubr.bf16.mxu0 %v5782_v30  ;;  %v5173_v24 = vld [vmem:[#allocation8 + $0x1e0] ss:$8 sps:$4 sm:$0xff]   ;;  %v5145_v42 = vld [vmem:[#allocation8 + $0x84] ss:$8 sps:$4 sm:$0xff]  }
 0x1ad   : > { %2968 = vmatprep.mubr.bf16.mxu1 %v5464_v18  ;;  %v2171_v55 = vpop.f32.mrf.mxu0  ;;  %3496 = vmatpush2.bf16.msra.mxu0 %v5134_v0  ;;  %v5140_v0 = vld [vmem:[#allocation8 + $0x90] ss:$8 sps:$4 sm:$0xff]  }
 0x1ae   : > { %v2284_v57 = vpop.f32.mrf.mxu1  ;;  %v5959_v61 = vadd.f32 %v2282_v51, %v2170_v54  ;;  %v2172_v63 = vadd.f32 %v2171_v55, %v5844_v56  ;;  %3497 = vmatprep.subr.bf16.mxu0 %v5139_v29  ;;  %3603 = vmatpush2.bf16.msra.mxu1 %v5173_v24  ;;  %v5176_v29 = vld [vmem:[#allocation8 + $0x1d0] ss:$8 sps:$4 sm:$0xff]   ;;  %v5179_v24 = vld [vmem:[#allocation8 + $0x1c0] ss:$8 sps:$4 sm:$0xff]  }
 0x1af   : > { %v5962_v43 = vpop.f32.mrf.mxu0  ;;  %3604 = vmatprep.subr.bf16.mxu1 %v5178_v1 }
 0x1b0   : > { %v5964_v11 = vpop.f32.mrf.mxu1  ;;  %v5966_v18 = vadd.f32 %v2284_v57, %v2172_v63 }
 0x1b1   : > { %v5968_v30 = vpop.f32.mrf.mxu0  ;;  %3498 = vmatpush2.bf16.msra.mxu0 %v5137_v58  ;;  %v5181_v58 = vld [vmem:[#allocation8 + $0x1c4] ss:$8 sps:$4 sm:$0xff]  }
 0x1b2   : > { %v5970_v12 = vpop.f32.mrf.mxu1  ;;  %3499 = vmatprep.subr.bf16.mxu0 %v5142_v23  ;;  %3605 = vmatpush2.bf16.msra.mxu1 %v5176_v29 }
 0x1b3   : > { %v2179_v33 = vpop.f32.mrf.mxu0  ;;  %2856 = vmatmul.mubr.bf16.gmra.mxu0 %v5789_v38  ;;  %3606 = vmatprep.subr.bf16.mxu1 %v5181_v58 }
 0x1b4   : > { %v2292_v51 = vpop.f32.mrf.mxu1  ;;  %2969 = vmatmul.mubr.bf16.gmra.mxu1 %v5792_v39  ;;  %v2180_v54 = vadd.f32 %v2179_v33, %v5839_v53 }
 0x1b5   : > { %v2181_v55 = vpop.f32.mrf.mxu0  ;;  %3500 = vmatpush2.bf16.msra.mxu0 %v5140_v0  ;;  %v5184_v0 = vld [vmem:[#allocation8 + $0x1b4] ss:$8 sps:$4 sm:$0xff]  }
 0x1b6   : > { %v2294_v57 = vpop.f32.mrf.mxu1  ;;  %v5975_v63 = vadd.f32 %v2292_v51, %v2180_v54  ;;  %v2182_v23 = vadd.f32 %v2181_v55, %v5844_v56  ;;  %3501 = vmatprep.subr.bf16.mxu0 %v5145_v42  ;;  %v2114_v51 = vadd.f32 %v5854_v9, %v5839_v53  ;;  %3607 = vmatpush2.bf16.msra.mxu1 %v5179_v24  ;;  %v5182_v42 = vld [vmem:[#allocation8 + $0x1b0] ss:$8 sps:$4 sm:$0xff]  }
 0x1b7   : > { %v5978_v47 = vpop.f32.mrf.mxu0  ;;  %3608 = vmatprep.subr.bf16.mxu1 %v5184_v0  ;;  %v2116_v55 = vadd.f32 %v5860_v14, %v5844_v56  ;;  %v5190_v14 = vld [vmem:[#allocation8 + $0x194] ss:$8 sps:$4 sm:$0xff]  }
 0x1b8   : > { %6435 = vst [vmem:[#allocation18_spill] sm:$0xff] %v5975_v63  ;;  %6436 = vst [vmem:[#allocation19_spill] sm:$0xff] %v5978_v47  ;;  %v5980_v38 = vpop.f32.mrf.mxu1  ;;  %v5982_v39 = vadd.f32 %v2294_v57, %v2182_v23  ;;  %v5187_v23 = vld [vmem:[#allocation8 + $0x1a4] ss:$8 sps:$4 sm:$0xff]   ;;  %v2227_v52 = vadd.f32 %v5856_v10, %v2114_v51  ;;  %v2237_v47 = vadd.f32 %v5874_v31, %v2124_v36 }
 0x1b9   : > { %6437 = vst [vmem:[#allocation20_spill] sm:$0xff] %v5980_v38  ;;  %v5984_v1 = vpop.f32.mrf.mxu0  ;;  %3502 = vmatpush2.bf16.msra.mxu0 %v5143_v60  ;;  %v5185_v60 = vld [vmem:[#allocation8 + $0x1a0] ss:$8 sps:$4 sm:$0xff]   ;;  %v2229_v63 = vadd.f32 %v5862_v26, %v2116_v55 }
 0x1ba   : > { %6438 = vst [vmem:[#allocation21_spill] sm:$0xff] %v5982_v39  ;;  %6439 = vst [vmem:[#allocation22_spill] sm:$0xff] %v5984_v1  ;;  %v5986_v33 = vpop.f32.mrf.mxu1  ;;  %3609 = vmatpush2.bf16.msra.mxu1 %v5182_v42 }
 0x1bb   : > { %6440 = vst [vmem:[#allocation23_spill] sm:$0xff] %v5986_v33  ;;  %v2335_v29 = vpop.f32.mrf.mxu0  ;;  %3610 = vmatprep.subr.bf16.mxu1 %v5187_v23 }
 0x1bc   : > { %v2448_v54 = vpop.f32.mrf.mxu1  ;;  %v2336_v33 = vadd.f32 %v2335_v29, %v5851_v5  ;;  %v2126_v29 = vadd.f32 %v5878_v35, %v5844_v56 }
 0x1bd   : > { %v2337_v58 = vpop.f32.mrf.mxu0 }
 0x1be   : > { %v2450_v57 = vpop.f32.mrf.mxu1  ;;  %v2338_v49 = vadd.f32 %v2337_v58, %v5858_v13  ;;  %3611 = vmatpush2.bf16.msra.mxu1 %v5185_v60  ;;  %v5188_v13 = vld [vmem:[#allocation8 + $0x190] ss:$8 sps:$4 sm:$0xff]   ;;  %v2449_v42 = vadd.f32 %v2448_v54, %v2336_v33  ;;  %v2239_v35 = vadd.f32 %v5880_v37, %v2126_v29  ;;  %v2136_v37 = vadd.f32 %v5896_v4, %v5844_v56 }
 0x1bf   : > { %v2339_v9 = vpop.f32.mrf.mxu0  ;;  %3612 = vmatprep.subr.bf16.mxu1 %v5190_v14 }
 0x1c0   : > { %v2452_v24 = vpop.f32.mrf.mxu1  ;;  %v2340_v0 = vadd.f32 %v2339_v9, %v2227_v52  ;;  %v2451_v1 = vadd.f32 %v2450_v57, %v2338_v49  ;;  %v5193_v9 = vld [vmem:[#allocation8 + $0x184] ss:$8 sps:$4 sm:$0xff]   ;;  %v2979_v33 = vmax.f32 %v2449_v42, 0.0 }
 0x1c1   : > { %v2341_v39 = vpop.f32.mrf.mxu0 }
 0x1c2   : > { %v2454_v38 = vpop.f32.mrf.mxu1  ;;  %v2453_v10 = vadd.f32 %v2452_v24, %v2340_v0  ;;  %v2342_v51 = vadd.f32 %v2341_v39, %v2229_v63  ;;  %v2980_v34 = vmax.f32 %v2451_v1, 0.0  ;;  %3613 = vmatpush2.bf16.msra.mxu1 %v5188_v13  ;;  %v5191_v39 = vld [vmem:[#allocation8 + $0x180] ss:$8 sps:$4 sm:$0xff]   ;;  %v2134_v0 = vadd.f32 %v5890_v2, %v5839_v53 }
 0x1c3   : > { %v2345_v58 = vpop.f32.mrf.mxu0  ;;  %3614 = vmatprep.subr.bf16.mxu1 %v5193_v9 }
 0x1c4   : > { %v2458_v5 = vpop.f32.mrf.mxu1  ;;  %v2455_v26 = vadd.f32 %v2454_v38, %v2342_v51  ;;  %v2983_v52 = vmax.f32 %v2453_v10, 0.0  ;;  %v2346_v54 = vadd.f32 %v2345_v58, %v5869_v28  ;;  %v2247_v2 = vadd.f32 %v5892_v3, %v2134_v0 }
 0x1c5   : > { %v2347_v55 = vpop.f32.mrf.mxu0 }
 0x1c6   : > { %v2460_v23 = vpop.f32.mrf.mxu1  ;;  %v2984_v49 = vmax.f32 %v2455_v26, 0.0  ;;  %v2348_v63 = vadd.f32 %v2347_v55, %v5876_v32  ;;  %v3043_v36 = vpack.c.bf16 %v2983_v52, %v2979_v33  ;;  %3615 = vmatpush2.bf16.msra.mxu1 %v5191_v39  ;;  %v2459_v51 = vadd.f32 %v2458_v5, %v2346_v54 }
 0x1c7   : > { %v2349_v57 = vpop.f32.mrf.mxu0 }
 0x1c8   : > { %v2462_v60 = vpop.f32.mrf.mxu1  ;;  %v2350_v38 = vadd.f32 %v2349_v57, %v2237_v47  ;;  %v3044_v24 = vpack.c.bf16 %v2984_v49, %v2980_v34  ;;  %v2461_v14 = vadd.f32 %v2460_v23, %v2348_v63  ;;  %v2987_v23 = vmax.f32 %v2459_v51, 0.0 }
 0x1c9   : > { %v2351_v31 = vpop.f32.mrf.mxu0  ;;  %v2249_v49 = vadd.f32 %v5898_v7, %v2136_v37  ;;  %v2144_v57 = vadd.f32 %v5908_v44, %v5839_v53 }
 0x1ca   : > { %v2464_v1 = vpop.f32.mrf.mxu1  ;;  %v2463_v32 = vadd.f32 %v2462_v60, %v2350_v38  ;;  %v2352_v10 = vadd.f32 %v2351_v31, %v2239_v35  ;;  %3503 = vmatprep.mubr.bf16.mxu0 %v3044_v24  ;;  %v2988_v26 = vmax.f32 %v2461_v14, 0.0 }
 0x1cb   : > { %v2355_v28 = vpop.f32.mrf.mxu0  ;;  %3504 = vmatmul.mubr.bf16.vlgmr.msra.gmra.mxu0 %v3043_v36 }
 0x1cc   : > { %v2468_v13 = vpop.f32.mrf.mxu1  ;;  %v2465_v47 = vadd.f32 %v2464_v1, %v2352_v10  ;;  %v2991_v42 = vmax.f32 %v2463_v32, 0.0  ;;  %v2356_v9 = vadd.f32 %v2355_v28, %v5887_v62  ;;  %v2146_v62 = vadd.f32 %v5914_v46, %v5844_v56 }
 0x1cd   : > { %v2357_v58 = vpop.f32.mrf.mxu0  ;;  %v2257_v1 = vadd.f32 %v5910_v45, %v2144_v57 }
 0x1ce   : > { %v2470_v29 = vpop.f32.mrf.mxu1  ;;  %v2992_v52 = vmax.f32 %v2465_v47, 0.0  ;;  %v2358_v55 = vadd.f32 %v2357_v58, %v5894_v48  ;;  %v3047_v4 = vpack.c.bf16 %v2991_v42, %v2987_v23  ;;  %v2469_v48 = vadd.f32 %v2468_v13, %v2356_v9 }
 0x1cf   : > { %v2359_v5 = vpop.f32.mrf.mxu0  ;;  %v2259_v37 = vadd.f32 %v5916_v50, %v2146_v62 }
 0x1d0   : > { %v2472_v34 = vpop.f32.mrf.mxu1  ;;  %v2360_v63 = vadd.f32 %v2359_v5, %v2247_v2  ;;  %v3048_v39 = vpack.c.bf16 %v2992_v52, %v2988_v26  ;;  %v2471_v3 = vadd.f32 %v2470_v29, %v2358_v55  ;;  %v2995_v10 = vmax.f32 %v2469_v48, 0.0 }
 0x1d1   : > { %v2361_v33 = vpop.f32.mrf.mxu0  ;;  %v2154_v2 = vadd.f32 %v5926_v21, %v5839_v53 }
 0x1d2   : > { %v2474_v54 = vpop.f32.mrf.mxu1  ;;  %v2473_v60 = vadd.f32 %v2472_v34, %v2360_v63  ;;  %v2362_v35 = vadd.f32 %v2361_v33, %v2249_v49  ;;  %3513 = vmatprep.mubr.bf16.mxu0 %v3048_v39  ;;  %v2996_v14 = vmax.f32 %v2471_v3, 0.0 }
 0x1d3   : > { %v2365_v38 = vpop.f32.mrf.mxu0  ;;  %3514 = vmatmul.mubr.bf16.gmra.mxu0 %v3047_v4  ;;  %v2267_v49 = vadd.f32 %v5928_v22, %v2154_v2  ;;  %v2174_v2 = vadd.f32 %v5962_v43, %v5839_v53 }
 0x1d4   : > { %v2478_v24 = vpop.f32.mrf.mxu1  ;;  %v2475_v7 = vadd.f32 %v2474_v54, %v2362_v35  ;;  %v2999_v0 = vmax.f32 %v2473_v60, 0.0  ;;  %v2366_v51 = vadd.f32 %v2365_v38, %v5905_v41  ;;  %v2156_v41 = vadd.f32 %v5932_v25, %v5844_v56 }
 0x1d5   : > { %v2367_v36 = vpop.f32.mrf.mxu0 }
 0x1d6   : > { %v2480_v31 = vpop.f32.mrf.mxu1  ;;  %v3000_v32 = vmax.f32 %v2475_v7, 0.0  ;;  %v2368_v44 = vadd.f32 %v2367_v36, %v5912_v59  ;;  %v3051_v46 = vpack.c.bf16 %v2999_v0, %v2995_v10  ;;  %v2479_v59 = vadd.f32 %v2478_v24, %v2366_v51 }
 0x1d7   : > { %v2369_v28 = vpop.f32.mrf.mxu0  ;;  %v2269_v3 = vadd.f32 %v5934_v27, %v2156_v41  ;;  %v2164_v24 = vadd.f32 %v5944_v8, %v5839_v53 }
 0x1d8   : > { %v2482_v13 = vpop.f32.mrf.mxu1  ;;  %v2370_v47 = vadd.f32 %v2369_v28, %v2257_v1  ;;  %v3052_v42 = vpack.c.bf16 %v3000_v32, %v2996_v14  ;;  %v2481_v45 = vadd.f32 %v2480_v31, %v2368_v44  ;;  %v3003_v4 = vmax.f32 %v2479_v59, 0.0 }
 0x1d9   : > { %v2371_v58 = vpop.f32.mrf.mxu0  ;;  %v2277_v32 = vadd.f32 %v5946_v15, %v2164_v24 }
 0x1da   : > { %v2484_v29 = vpop.f32.mrf.mxu1  ;;  %v2483_v26 = vadd.f32 %v2482_v13, %v2370_v47  ;;  %v2372_v52 = vadd.f32 %v2371_v58, %v2259_v37  ;;  %3523 = vmatprep.mubr.bf16.mxu0 %v3052_v42  ;;  %v3004_v63 = vmax.f32 %v2481_v45, 0.0 }
 0x1db   : > { %v2375_v55 = vpop.f32.mrf.mxu0  ;;  %3524 = vmatmul.mubr.bf16.gmra.mxu0 %v3051_v46 }
 0x1dc   : > { %v2488_v23 = vpop.f32.mrf.mxu1  ;;  %v2485_v50 = vadd.f32 %v2484_v29, %v2372_v52  ;;  %v3007_v9 = vmax.f32 %v2483_v26, 0.0  ;;  %v2376_v33 = vadd.f32 %v2375_v55, %v5923_v19  ;;  %v2166_v19 = vadd.f32 %v5950_v16, %v5844_v56 }
 0x1dd   : > { %v2377_v5 = vpop.f32.mrf.mxu0 }
 0x1de   : > { %v2490_v34 = vpop.f32.mrf.mxu1  ;;  %v3008_v39 = vmax.f32 %v2485_v50, 0.0  ;;  %v2378_v21 = vadd.f32 %v2377_v5, %v5930_v6  ;;  %v3055_v25 = vpack.c.bf16 %v3007_v9, %v3003_v4  ;;  %v2489_v6 = vadd.f32 %v2488_v23, %v2376_v33 }
 0x1df   : > { %v2379_v54 = vpop.f32.mrf.mxu0  ;;  %v2279_v47 = vadd.f32 %v5952_v20, %v2166_v19  ;;  %v2287_v50 = vadd.f32 %v5964_v11, %v2174_v2 }
 0x1e0   : > { %v2492_v57 = vpop.f32.mrf.mxu1  ;;  %v2380_v60 = vadd.f32 %v2379_v54, %v2267_v49  ;;  %v3056_v35 = vpack.c.bf16 %v3008_v39, %v3004_v63  ;;  %v2491_v22 = vadd.f32 %v2490_v34, %v2378_v21  ;;  %v3011_v51 = vmax.f32 %v2489_v6, 0.0 }
 0x1e1   : > { %v2381_v48 = vpop.f32.mrf.mxu0 }
 0x1e2   : > { %v2494_v38 = vpop.f32.mrf.mxu1  ;;  %v2493_v62 = vadd.f32 %v2492_v57, %v2380_v60  ;;  %v2382_v7 = vadd.f32 %v2381_v48, %v2269_v3  ;;  %3533 = vmatprep.mubr.bf16.mxu0 %v3056_v35  ;;  %v3012_v44 = vmax.f32 %v2491_v22, 0.0  ;;  %v6441_v3 = vld [vmem:[#allocation19_spill] sm:$0xff]  ;;  %v6443_v22 = vld [vmem:[#allocation16_spill] sm:$0xff] }
 0x1e3   : > { %v2385_v0 = vpop.f32.mrf.mxu0  ;;  %3534 = vmatmul.mubr.bf16.gmra.mxu0 %v3055_v25  ;;  %v2184_v60 = vadd.f32 %v6441_v3, %v5839_v53  ;;  %v6444_v53 = vld [vmem:[#allocation20_spill] sm:$0xff] }
 0x1e4   : > { %v2498_v36 = vpop.f32.mrf.mxu1  ;;  %v2495_v27 = vadd.f32 %v2494_v38, %v2382_v7  ;;  %v3015_v31 = vmax.f32 %v2493_v62, 0.0  ;;  %v2386_v28 = vadd.f32 %v2385_v0, %v5941_v40  ;;  %v2176_v40 = vadd.f32 %v5968_v30, %v5844_v56 }
 0x1e5   : > { %v2387_v1 = vpop.f32.mrf.mxu0  ;;  %v657_v62 = vsub.s32 2, %v6443_v22  ;;  %v2297_v19 = vadd.f32 %v6444_v53, %v2184_v60 }
 0x1e6   : > { %v2500_v14 = vpop.f32.mrf.mxu1  ;;  %v3016_v10 = vmax.f32 %v2495_v27, 0.0  ;;  %v2388_v8 = vadd.f32 %v2387_v1, %v5948_v17  ;;  %v3059_v16 = vpack.c.bf16 %v3015_v31, %v3011_v51  ;;  %v2499_v17 = vadd.f32 %v2498_v36, %v2386_v28  ;;  %v6445_v1 = vld [vmem:[#allocation21_spill] sm:$0xff] }
 0x1e7   : > { %v2389_v13 = vpop.f32.mrf.mxu0  ;;  %v2289_v21 = vadd.f32 %v5970_v12, %v2176_v40  ;;  %v661_v36 = vsub.s32 3, %v6443_v22 }
 0x1e8   : > { %v2502_v37 = vpop.f32.mrf.mxu1  ;;  %v2390_v42 = vadd.f32 %v2389_v13, %v2277_v32  ;;  %v3060_v46 = vpack.c.bf16 %v3016_v10, %v3012_v44  ;;  %v2501_v15 = vadd.f32 %v2500_v14, %v2388_v8  ;;  %v3019_v34 = vmax.f32 %v2499_v17, 0.0  ;;  %v6446_v44 = vld [vmem:[#allocation18_spill] sm:$0xff] }
 0x1e9   : > { %v2391_v58 = vpop.f32.mrf.mxu0 }
 0x1ea   : > { %v2504_v29 = vpop.f32.mrf.mxu1  ;;  %v2503_v45 = vadd.f32 %v2502_v37, %v2390_v42  ;;  %v2392_v26 = vadd.f32 %v2391_v58, %v2279_v47  ;;  %3543 = vmatprep.mubr.bf16.mxu0 %v3060_v46  ;;  %v3020_v9 = vmax.f32 %v2501_v15, 0.0  ;;  %v6448_v47 = vld [vmem:[#allocation17_spill] sm:$0xff] }
 0x1eb   : > { %v2395_v52 = vpop.f32.mrf.mxu0  ;;  %3544 = vmatmul.mubr.bf16.gmra.mxu0 %v3059_v16  ;;  %v6055_v42 = vrot.slane %v6448_v47, %v657_v62 }
 0x1ec   : > { %v2508_v59 = vpop.f32.mrf.mxu1  ;;  %v2505_v20 = vadd.f32 %v2504_v29, %v2392_v26  ;;  %v3023_v55 = vmax.f32 %v2503_v45, 0.0  ;;  %v2396_v49 = vadd.f32 %v2395_v52, %v5959_v61  ;;  %v6442_v61 = vld [vmem:[#allocation22_spill] sm:$0xff]  ;;  %v6058_v45 = vrot.slane %v6448_v47, %v661_v36 }
 0x1ed   : > { %v2397_v23 = vpop.f32.mrf.mxu0  ;;  %v2186_v24 = vadd.f32 %v6442_v61, %v5844_v56  ;;  %v6447_v56 = vld [vmem:[#allocation23_spill] sm:$0xff] }
 0x1ee   : > { %v2510_v41 = vpop.f32.mrf.mxu1  ;;  %v3024_v5 = vmax.f32 %v2505_v20, 0.0  ;;  %v2398_v43 = vadd.f32 %v2397_v23, %v5966_v18  ;;  %v3063_v30 = vpack.c.bf16 %v3023_v55, %v3019_v34  ;;  %v2509_v18 = vadd.f32 %v2508_v59, %v2396_v49 }
 0x1ef   : > { %v2399_v63 = vpop.f32.mrf.mxu0  ;;  %v2299_v28 = vadd.f32 %v6447_v56, %v2186_v24 }
 0x1f0   : > { %v2512_v39 = vpop.f32.mrf.mxu1  ;;  %v2400_v4 = vadd.f32 %v2399_v63, %v2287_v50  ;;  %v3064_v33 = vpack.c.bf16 %v3024_v5, %v3020_v9  ;;  %v2511_v11 = vadd.f32 %v2510_v41, %v2398_v43  ;;  %v3027_v32 = vmax.f32 %v2509_v18, 0.0 }
 0x1f1   : > { %v2401_v54 = vpop.f32.mrf.mxu0 }
 0x1f2   : > { %v2514_v57 = vpop.f32.mrf.mxu1  ;;  %v2513_v35 = vadd.f32 %v2512_v39, %v2400_v4  ;;  %v2402_v25 = vadd.f32 %v2401_v54, %v2289_v21  ;;  %3553 = vmatprep.mubr.bf16.mxu0 %v3064_v33  ;;  %v3028_v27 = vmax.f32 %v2511_v11, 0.0 }
 0x1f3   : > { %v2405_v48 = vpop.f32.mrf.mxu0  ;;  %3554 = vmatmul.mubr.bf16.gmra.mxu0 %v3063_v30 }
 0x1f4   : > { %v2518_v38 = vpop.f32.mrf.mxu1  ;;  %v2515_v12 = vadd.f32 %v2514_v57, %v2402_v25  ;;  %v3031_v7 = vmax.f32 %v2513_v35, 0.0  ;;  %v2406_v10 = vadd.f32 %v2405_v48, %v6446_v44 }
 0x1f5   : > { %v2407_v6 = vpop.f32.mrf.mxu0 }
 0x1f6   : > { %v2520_v0 = vpop.f32.mrf.mxu1  ;;  %v3032_v31 = vmax.f32 %v2515_v12, 0.0  ;;  %v2408_v14 = vadd.f32 %v2407_v6, %v6445_v1  ;;  %v3067_v46 = vpack.c.bf16 %v3031_v7, %v3027_v32  ;;  %v2519_v26 = vadd.f32 %v2518_v38, %v2406_v10 }
 0x1f7   : > { %v2409_v8 = vpop.f32.mrf.mxu0 }
 0x1f8   : > { %v2522_v51 = vpop.f32.mrf.mxu1  ;;  %v2410_v13 = vadd.f32 %v2409_v8, %v2297_v19  ;;  %v3068_v37 = vpack.c.bf16 %v3032_v31, %v3028_v27  ;;  %v2521_v29 = vadd.f32 %v2520_v0, %v2408_v14  ;;  %v3035_v43 = vmax.f32 %v2519_v26, 0.0 }
 0x1f9   : > { %v2411_v16 = vpop.f32.mrf.mxu0 }
 0x1fa   : > { %v2524_v58 = vpop.f32.mrf.mxu1  ;;  %v2523_v2 = vadd.f32 %v2522_v51, %v2410_v13  ;;  %v2412_v15 = vadd.f32 %v2411_v16, %v2299_v28  ;;  %3563 = vmatprep.mubr.bf16.mxu0 %v3068_v37  ;;  %v3036_v41 = vmax.f32 %v2521_v29, 0.0 }
 0x1fb   : > { %v2561_v17 = vpop.f32.mrf.mxu0  ;;  %3564 = vmatmul.mubr.bf16.gmra.mxu0 %v3067_v46 }
 0x1fc   : > { %v2674_v52 = vpop.f32.mrf.mxu1  ;;  %v2525_v59 = vadd.f32 %v2524_v58, %v2412_v15  ;;  %v2562_v40 = vadd.f32 %v2561_v17, %v6055_v42  ;;  %v3039_v20 = vmax.f32 %v2523_v2, 0.0 }
 0x1fd   : > { %v2563_v55 = vpop.f32.mrf.mxu0 }
 0x1fe   : > { %v2676_v23 = vpop.f32.mrf.mxu1  ;;  %v3040_v50 = vmax.f32 %v2525_v59, 0.0  ;;  %v6061_v9 = vadd.f32 %v2674_v52, %v2562_v40  ;;  %v2564_v5 = vadd.f32 %v2563_v55, %v6058_v45  ;;  %v3071_v21 = vpack.c.bf16 %v3039_v20, %v3035_v43 }
 0x1ff   : > { %v6064_v34 = vpop.f32.mrf.mxu0 }
 0x200   : > { %v6066_v49 = vpop.f32.mrf.mxu1  ;;  %v6068_v63 = vadd.f32 %v2676_v23, %v2564_v5  ;;  %v3072_v39 = vpack.c.bf16 %v3040_v50, %v3036_v41 }
 0x201   : > { %v6070_v4 = vpop.f32.mrf.mxu0 }
 0x202   : > { %v6072_v33 = vpop.f32.mrf.mxu1  ;;  %3573 = vmatprep.mubr.bf16.mxu0 %v3072_v39 }
 0x203   : > { %v2571_v30 = vpop.f32.mrf.mxu0  ;;  %3574 = vmatmul.mubr.bf16.gmra.mxu0 %v3071_v21 }
 0x204   : > { %v2684_v54 = vpop.f32.mrf.mxu1  ;;  %v2572_v57 = vadd.f32 %v2571_v30, %v6055_v42 }
 0x205   : > { %v2573_v3 = vpop.f32.mrf.mxu0 }
 0x206   : > { %v2686_v60 = vpop.f32.mrf.mxu1  ;;  %v6075_v11 = vadd.f32 %v2684_v54, %v2572_v57  ;;  %v2574_v35 = vadd.f32 %v2573_v3, %v6058_v45 }
 0x207   : > { %v6078_v25 = vpop.f32.mrf.mxu0 }
 0x208   : > { %v6080_v18 = vpop.f32.mrf.mxu1  ;;  %v6082_v48 = vadd.f32 %v2686_v60, %v2574_v35 }
 0x209   : > { %v6084_v38 = vpop.f32.mrf.mxu0 }
 0x20a   : > { %v6086_v61 = vpop.f32.mrf.mxu1 }
 0x20b   : > { %v2581_v24 = vpop.f32.mrf.mxu0 }
 0x20c   : > { %v2694_v12 = vpop.f32.mrf.mxu1  ;;  %v2582_v62 = vadd.f32 %v2581_v24, %v6055_v42 }
 0x20d   : > { %v2583_v7 = vpop.f32.mrf.mxu0 }
 0x20e   : > { %v2696_v6 = vpop.f32.mrf.mxu1  ;;  %v6089_v0 = vadd.f32 %v2694_v12, %v2582_v62  ;;  %v2584_v36 = vadd.f32 %v2583_v7, %v6058_v45 }
 0x20f   : > { %v6092_v53 = vpop.f32.mrf.mxu0 }
 0x210   : > { %v6094_v19 = vpop.f32.mrf.mxu1  ;;  %v6096_v27 = vadd.f32 %v2696_v6, %v2584_v36 }
 0x211   : > { %v6098_v31 = vpop.f32.mrf.mxu0 }
 0x212   : > { %v6100_v1 = vpop.f32.mrf.mxu1 }
 0x213   : > { %v2591_v14 = vpop.f32.mrf.mxu0 }
 0x214   : > { %v2704_v32 = vpop.f32.mrf.mxu1  ;;  %v2592_v44 = vadd.f32 %v2591_v14, %v6055_v42 }
 0x215   : > { %v2593_v10 = vpop.f32.mrf.mxu0 }
 0x216   : > { %v2706_v8 = vpop.f32.mrf.mxu1  ;;  %v6103_v51 = vadd.f32 %v2704_v32, %v2592_v44  ;;  %v2594_v56 = vadd.f32 %v2593_v10, %v6058_v45 }
 0x217   : > { %v6106_v28 = vpop.f32.mrf.mxu0 }
 0x218   : > { %v6108_v13 = vpop.f32.mrf.mxu1  ;;  %v6110_v37 = vadd.f32 %v2706_v8, %v2594_v56 }
 0x219   : > { %v6112_v47 = vpop.f32.mrf.mxu0 }
 0x21a   : > { %v6114_v46 = vpop.f32.mrf.mxu1 }
 0x21b   : > { %v2601_v16 = vpop.f32.mrf.mxu0 }
 0x21c   : > { %v2714_v58 = vpop.f32.mrf.mxu1  ;;  %v2602_v29 = vadd.f32 %v2601_v16, %v6055_v42 }
 0x21d   : > { %v2603_v2 = vpop.f32.mrf.mxu0 }
 0x21e   : > { %v2716_v15 = vpop.f32.mrf.mxu1  ;;  %v6117_v26 = vadd.f32 %v2714_v58, %v2602_v29  ;;  %v2604_v17 = vadd.f32 %v2603_v2, %v6058_v45 }
 0x21f   : > { %v6120_v52 = vpop.f32.mrf.mxu0 }
 0x220   : > { %v6122_v59 = vpop.f32.mrf.mxu1  ;;  %v6124_v40 = vadd.f32 %v2716_v15, %v2604_v17 }
 0x221   : > { %v6126_v20 = vpop.f32.mrf.mxu0 }
 0x222   : > { %v6128_v55 = vpop.f32.mrf.mxu1 }
 0x223   : > { %v2611_v23 = vpop.f32.mrf.mxu0 }
 0x224   : > { %v2724_v41 = vpop.f32.mrf.mxu1  ;;  %v2612_v50 = vadd.f32 %v2611_v23, %v6055_v42 }
 0x225   : > { %v2613_v5 = vpop.f32.mrf.mxu0 }
 0x226   : > { %v2726_v43 = vpop.f32.mrf.mxu1  ;;  %v6131_v39 = vadd.f32 %v2724_v41, %v2612_v50  ;;  %v2614_v21 = vadd.f32 %v2613_v5, %v6058_v45 }
 0x227   : > { %v6134_v30 = vpop.f32.mrf.mxu0 }
 0x228   : > { %v6136_v54 = vpop.f32.mrf.mxu1  ;;  %v6138_v57 = vadd.f32 %v2726_v43, %v2614_v21  ;;  %v2566_v21 = vadd.f32 %v6064_v34, %v6055_v42 }
 0x229   : > { %v6140_v3 = vpop.f32.mrf.mxu0 }
 0x22a   : > { %v6142_v60 = vpop.f32.mrf.mxu1 }
 0x22b   : > { %v2621_v35 = vpop.f32.mrf.mxu0 }
 0x22c   : > { %v2734_v24 = vpop.f32.mrf.mxu1  ;;  %v2622_v12 = vadd.f32 %v2621_v35, %v6055_v42 }
 0x22d   : > { %v2623_v62 = vpop.f32.mrf.mxu0 }
 0x22e   : > { %v2736_v7 = vpop.f32.mrf.mxu1  ;;  %v6145_v6 = vadd.f32 %v2734_v24, %v2622_v12  ;;  %v2624_v36 = vadd.f32 %v2623_v62, %v6058_v45  ;;  %v2568_v12 = vadd.f32 %v6070_v4, %v6058_v45 }
 0x22f   : > { %v6148_v14 = vpop.f32.mrf.mxu0 }
 0x230   : > { %v6150_v32 = vpop.f32.mrf.mxu1  ;;  %v6152_v44 = vadd.f32 %v2736_v7, %v2624_v36  ;;  %v2679_v36 = vadd.f32 %v6066_v49, %v2566_v21 }
 0x231   : > { %v6154_v10 = vpop.f32.mrf.mxu0 }
 0x232   : > { %v6156_v8 = vpop.f32.mrf.mxu1 }
 0x233   : > { %v2631_v56 = vpop.f32.mrf.mxu0 }
 0x234   : > { %v2744_v16 = vpop.f32.mrf.mxu1  ;;  %v2632_v58 = vadd.f32 %v2631_v56, %v6055_v42 }
 0x235   : > { %v2633_v29 = vpop.f32.mrf.mxu0 }
 0x236   : > { %v2746_v2 = vpop.f32.mrf.mxu1  ;;  %v6159_v15 = vadd.f32 %v2744_v16, %v2632_v58  ;;  %v2634_v17 = vadd.f32 %v2633_v29, %v6058_v45 }
 0x237   : > { %v6162_v23 = vpop.f32.mrf.mxu0 }
 0x238   : > { %6449 = vst [vmem:[#allocation19_spill] sm:$0xff] %v6159_v15  ;;  %v6164_v41 = vpop.f32.mrf.mxu1  ;;  %v6166_v50 = vadd.f32 %v2746_v2, %v2634_v17  ;;  %v2681_v2 = vadd.f32 %v6072_v33, %v2568_v12 }
 0x239   : > { %6450 = vst [vmem:[#allocation22_spill] sm:$0xff] %v6164_v41  ;;  %v6168_v5 = vpop.f32.mrf.mxu0 }
 0x23a   : > { %6451 = vst [vmem:[#allocation20_spill] sm:$0xff] %v6166_v50  ;;  %6452 = vst [vmem:[#allocation21_spill] sm:$0xff] %v6168_v5  ;;  %v6170_v43 = vpop.f32.mrf.mxu1 }
 0x23b   : > { %6453 = vst [vmem:[#allocation18_spill] sm:$0xff] %v6170_v43  ;;  %v2787_v35 = vpop.f32.mrf.mxu0  ;;  %v2576_v43 = vadd.f32 %v6078_v25, %v6055_v42 }
 0x23c   : > { %v2900_v24 = vpop.f32.mrf.mxu1  ;;  %v2788_v16 = vadd.f32 %v2787_v35, %v6061_v9 }
 0x23d   : > { %v2789_v62 = vpop.f32.mrf.mxu0  ;;  %v2689_v33 = vadd.f32 %v6080_v18, %v2576_v43 }
 0x23e   : > { %v2902_v7 = vpop.f32.mrf.mxu1  ;;  %v2790_v56 = vadd.f32 %v2789_v62, %v6068_v63  ;;  %v2901_v41 = vadd.f32 %v2900_v24, %v2788_v16  ;;  %v2578_v63 = vadd.f32 %v6084_v38, %v6058_v45 }
 0x23f   : > { %v2791_v58 = vpop.f32.mrf.mxu0 }
 0x240   : > { %v2904_v29 = vpop.f32.mrf.mxu1  ;;  %v2792_v17 = vadd.f32 %v2791_v58, %v2679_v36  ;;  %v2903_v15 = vadd.f32 %v2902_v7, %v2790_v56  ;;  %v2981_v25 = vmax.f32 %v2901_v41, 0.0  ;;  %v2691_v56 = vadd.f32 %v6086_v61, %v2578_v63  ;;  %v5195_v41 = vld [vmem:[#allocation10 + $0x38] sm:$0xff]  }
 0x241   : > { %v2793_v22 = vpop.f32.mrf.mxu0  ;;  %v2588_v61 = vadd.f32 %v6098_v31, %v6058_v45 }
 0x242   : > { %v2906_v34 = vpop.f32.mrf.mxu1  ;;  %v2905_v4 = vadd.f32 %v2904_v29, %v2792_v17  ;;  %v2794_v50 = vadd.f32 %v2793_v22, %v2681_v2  ;;  %v2982_v12 = vmax.f32 %v2903_v15, 0.0  ;;  %v2586_v17 = vadd.f32 %v6092_v53, %v6055_v42 }
 0x243   : > { %v2797_v5 = vpop.f32.mrf.mxu0 }
 0x244   : > { %v2910_v49 = vpop.f32.mrf.mxu1  ;;  %v2907_v9 = vadd.f32 %v2906_v34, %v2794_v50  ;;  %v2985_v21 = vmax.f32 %v2905_v4, 0.0  ;;  %v2798_v7 = vadd.f32 %v2797_v5, %v6075_v11  ;;  %v5196_v34 = vld [vmem:[#allocation10 + $0x70] sm:$0xff]  }
 0x245   : > { %v2799_v35 = vpop.f32.mrf.mxu0 }
 0x246   : > { %v2912_v62 = vpop.f32.mrf.mxu1  ;;  %v2986_v36 = vmax.f32 %v2907_v9, 0.0  ;;  %v2800_v58 = vadd.f32 %v2799_v35, %v6082_v48  ;;  %v3045_v38 = vpack.c.bf16 %v2985_v21, %v2981_v25  ;;  %v5194_v48 = vld [vmem:[#allocation10 + $0x78] sm:$0xff]   ;;  %v2911_v11 = vadd.f32 %v2910_v49, %v2798_v7  ;;  %v5197_v35 = vld [vmem:[#allocation10 + $0x30] sm:$0xff]  }
 0x247   : > { %v2801_v22 = vpop.f32.mrf.mxu0  ;;  %4501 = vmatprep.subr.bf16.mxu0 %v5194_v48  ;;  %4565 = vmatprep.subr.bf16.mxu1 %v5194_v48 }
 0x248   : > { %v2914_v24 = vpop.f32.mrf.mxu1  ;;  %v3046_v16 = vpack.c.bf16 %v2986_v36, %v2982_v12  ;;  %v2802_v29 = vadd.f32 %v2801_v22, %v2689_v33  ;;  %v2913_v18 = vadd.f32 %v2912_v62, %v2800_v58  ;;  %4502 = vmatpush3.bf16.msra.mxu0 %v5195_v41  ;;  %v2699_v62 = vadd.f32 %v6094_v19, %v2586_v17  ;;  %v5198_v36 = vld [vmem:[#allocation10 + $0x68] sm:$0xff]  }
 0x249   : > { %v2803_v50 = vpop.f32.mrf.mxu0  ;;  %4503 = vmatprep.subr.bf16.mxu0 %v5196_v34  ;;  %v2989_v58 = vmax.f32 %v2911_v11, 0.0  ;;  %v2701_v22 = vadd.f32 %v6100_v1, %v2588_v61  ;;  %v5201_v11 = vld [vmem:[#allocation10 + $0x20] sm:$0xff]  }
 0x24a   : > { %v2916_v2 = vpop.f32.mrf.mxu1  ;;  %v2915_v15 = vadd.f32 %v2914_v24, %v2802_v29  ;;  %v2804_v43 = vadd.f32 %v2803_v50, %v2691_v56  ;;  %3616 = vmatprep.mubr.bf16.mxu1 %v3046_v16  ;;  %v2990_v33 = vmax.f32 %v2913_v18, 0.0  ;;  %v2596_v16 = vadd.f32 %v6106_v28, %v6055_v42 }
 0x24b   : > { %v2807_v5 = vpop.f32.mrf.mxu0  ;;  %3617 = vmatmul.mubr.bf16.vlgmr.msra.gmra.mxu1 %v3045_v38  ;;  %v2598_v28 = vadd.f32 %v6112_v47, %v6058_v45 }
 0x24c   : > { %v2920_v4 = vpop.f32.mrf.mxu1  ;;  %v2917_v63 = vadd.f32 %v2916_v2, %v2804_v43  ;;  %v2993_v9 = vmax.f32 %v2915_v15, 0.0  ;;  %4573 = vmatpush3.bf16.msra.mxu1 %v5195_v41  ;;  %v2808_v31 = vadd.f32 %v2807_v5, %v6089_v0  ;;  %4504 = vmatpush3.bf16.msra.mxu0 %v5197_v35  ;;  %v5200_v0 = vld [vmem:[#allocation10 + $0x60] sm:$0xff]   ;;  %v2709_v5 = vadd.f32 %v6108_v13, %v2596_v16 }
 0x24d   : > { %v2809_v21 = vpop.f32.mrf.mxu0  ;;  %4566 = vmatprep.subr.bf16.mxu1 %v5196_v34  ;;  %4505 = vmatprep.subr.bf16.mxu0 %v5198_v36 }
 0x24e   : > { %v2922_v53 = vpop.f32.mrf.mxu1  ;;  %v2994_v12 = vmax.f32 %v2917_v63, 0.0  ;;  %v2810_v49 = vadd.f32 %v2809_v21, %v6096_v27  ;;  %v3049_v19 = vpack.c.bf16 %v2993_v9, %v2989_v58  ;;  %v5199_v27 = vld [vmem:[#allocation10 + $0x28] sm:$0xff]   ;;  %v2921_v18 = vadd.f32 %v2920_v4, %v2808_v31  ;;  %v5202_v9 = vld [vmem:[#allocation10 + $0x58] sm:$0xff]  }
 0x24f   : > { %v2811_v25 = vpop.f32.mrf.mxu0 }
 0x250   : > { %v2924_v7 = vpop.f32.mrf.mxu1  ;;  %v3050_v24 = vpack.c.bf16 %v2994_v12, %v2990_v33  ;;  %v2812_v56 = vadd.f32 %v2811_v25, %v2699_v62  ;;  %4574 = vmatpush3.bf16.msra.mxu1 %v5197_v35  ;;  %v2923_v50 = vadd.f32 %v2922_v53, %v2810_v49  ;;  %4506 = vmatpush3.bf16.msra.mxu0 %v5199_v27  ;;  %v2997_v21 = vmax.f32 %v2921_v18, 0.0 }
 0x251   : > { %v2813_v29 = vpop.f32.mrf.mxu0  ;;  %4567 = vmatprep.subr.bf16.mxu1 %v5198_v36  ;;  %4507 = vmatprep.subr.bf16.mxu0 %v5200_v0  ;;  %v2711_v62 = vadd.f32 %v6114_v46, %v2598_v28  ;;  %v2606_v49 = vadd.f32 %v6120_v52, %v6055_v42  ;;  %v2608_v46 = vadd.f32 %v6126_v20, %v6058_v45 }
 0x252   : > { %v2926_v38 = vpop.f32.mrf.mxu1  ;;  %v2925_v2 = vadd.f32 %v2924_v7, %v2812_v56  ;;  %v2814_v17 = vadd.f32 %v2813_v29, %v2701_v22  ;;  %3626 = vmatprep.mubr.bf16.mxu1 %v3050_v24  ;;  %v2998_v61 = vmax.f32 %v2923_v50, 0.0 }
 0x253   : > { %v2817_v15 = vpop.f32.mrf.mxu0  ;;  %3627 = vmatmul.mubr.bf16.gmra.mxu1 %v3049_v19  ;;  %v2719_v29 = vadd.f32 %v6122_v59, %v2606_v49 }
 0x254   : > { %v2930_v1 = vpop.f32.mrf.mxu1  ;;  %v2927_v43 = vadd.f32 %v2926_v38, %v2814_v17  ;;  %v3001_v48 = vmax.f32 %v2925_v2, 0.0  ;;  %4575 = vmatpush3.bf16.msra.mxu1 %v5199_v27  ;;  %v2818_v53 = vadd.f32 %v2817_v15, %v6103_v51  ;;  %4508 = vmatpush3.bf16.msra.mxu0 %v5201_v11  ;;  %v2721_v15 = vadd.f32 %v6128_v55, %v2608_v46 }
 0x255   : > { %v2819_v41 = vpop.f32.mrf.mxu0  ;;  %4568 = vmatprep.subr.bf16.mxu1 %v5200_v0  ;;  %4509 = vmatprep.subr.bf16.mxu0 %v5202_v9 }
 0x256   : > { %v2932_v34 = vpop.f32.mrf.mxu1  ;;  %v3002_v63 = vmax.f32 %v2927_v43, 0.0  ;;  %v2820_v4 = vadd.f32 %v2819_v41, %v6110_v37  ;;  %v3053_v13 = vpack.c.bf16 %v3001_v48, %v2997_v21  ;;  %v5203_v37 = vld [vmem:[#allocation10 + $0x18] sm:$0xff]   ;;  %v2931_v51 = vadd.f32 %v2930_v1, %v2818_v53 }
 0x257   : > { %v2821_v47 = vpop.f32.mrf.mxu0  ;;  %v2616_v41 = vadd.f32 %v6134_v30, %v6055_v42 }
 0x258   : > { %v2934_v35 = vpop.f32.mrf.mxu1  ;;  %v3054_v33 = vpack.c.bf16 %v3002_v63, %v2998_v61  ;;  %v2822_v12 = vadd.f32 %v2821_v47, %v2709_v5  ;;  %4576 = vmatpush3.bf16.msra.mxu1 %v5201_v11  ;;  %v2933_v31 = vadd.f32 %v2932_v34, %v2820_v4  ;;  %4510 = vmatpush3.bf16.msra.mxu0 %v5203_v37  ;;  %v3005_v2 = vmax.f32 %v2931_v51, 0.0 }
 0x259   : > { %v2823_v36 = vpop.f32.mrf.mxu0  ;;  %4569 = vmatprep.subr.bf16.mxu1 %v5202_v9  ;;  %v2729_v21 = vadd.f32 %v6136_v54, %v2616_v41 }
 0x25a   : > { %v2936_v58 = vpop.f32.mrf.mxu1  ;;  %v2935_v25 = vadd.f32 %v2934_v35, %v2822_v12  ;;  %v2824_v7 = vadd.f32 %v2823_v36, %v2711_v62  ;;  %3636 = vmatprep.mubr.bf16.mxu1 %v3054_v33  ;;  %v3006_v38 = vmax.f32 %v2933_v31, 0.0  ;;  %v2626_v31 = vadd.f32 %v6148_v14, %v6055_v42 }
 0x25b   : > { %v2827_v22 = vpop.f32.mrf.mxu0  ;;  %3637 = vmatmul.mubr.bf16.gmra.mxu1 %v3053_v13 }
 0x25c   : > { %v2940_v24 = vpop.f32.mrf.mxu1  ;;  %v2937_v52 = vadd.f32 %v2936_v58, %v2824_v7  ;;  %v3009_v56 = vmax.f32 %v2935_v25, 0.0  ;;  %4577 = vmatpush3.bf16.msra.mxu1 %v5203_v37  ;;  %v2828_v17 = vadd.f32 %v2827_v22, %v6117_v26  ;;  %v2618_v26 = vadd.f32 %v6140_v3, %v6058_v45 }
 0x25d   : > { %v2829_v16 = vpop.f32.mrf.mxu0 }
 0x25e   : > { %v2942_v19 = vpop.f32.mrf.mxu1  ;;  %v3010_v27 = vmax.f32 %v2937_v52, 0.0  ;;  %v2830_v50 = vadd.f32 %v2829_v16, %v6124_v40  ;;  %v3057_v28 = vpack.c.bf16 %v3009_v56, %v3005_v2  ;;  %v2941_v40 = vadd.f32 %v2940_v24, %v2828_v17 }
 0x25f   : > { %v2831_v0 = vpop.f32.mrf.mxu0  ;;  %v2731_v49 = vadd.f32 %v6142_v60, %v2618_v26  ;;  %v2739_v56 = vadd.f32 %v6150_v32, %v2626_v31 }
 0x260   : > { %v2944_v18 = vpop.f32.mrf.mxu1  ;;  %v3058_v20 = vpack.c.bf16 %v3010_v27, %v3006_v38  ;;  %v2832_v1 = vadd.f32 %v2831_v0, %v2719_v29  ;;  %v2943_v59 = vadd.f32 %v2942_v19, %v2830_v50  ;;  %v3013_v35 = vmax.f32 %v2941_v40, 0.0  ;;  %v6455_v40 = vld [vmem:[#allocation22_spill] sm:$0xff] }
 0x261   : > { %v2833_v43 = vpop.f32.mrf.mxu0 }
 0x262   : > { %v2946_v48 = vpop.f32.mrf.mxu1  ;;  %v2945_v34 = vadd.f32 %v2944_v18, %v2832_v1  ;;  %v2834_v11 = vadd.f32 %v2833_v43, %v2721_v15  ;;  %3646 = vmatprep.mubr.bf16.mxu1 %v3058_v20  ;;  %v3014_v53 = vmax.f32 %v2943_v59, 0.0  ;;  %v2636_v20 = vadd.f32 %v6162_v23, %v6055_v42  ;;  %v6456_v42 = vld [vmem:[#allocation20_spill] sm:$0xff] }
 0x263   : > { %v2837_v5 = vpop.f32.mrf.mxu0  ;;  %3647 = vmatmul.mubr.bf16.gmra.mxu1 %v3057_v28 }
 0x264   : > { %v2950_v61 = vpop.f32.mrf.mxu1  ;;  %v2947_v55 = vadd.f32 %v2946_v48, %v2834_v11  ;;  %v3017_v63 = vmax.f32 %v2945_v34, 0.0  ;;  %v2838_v62 = vadd.f32 %v2837_v5, %v6131_v39  ;;  %v2628_v39 = vadd.f32 %v6154_v10, %v6058_v45 }
 0x265   : > { %v2839_v4 = vpop.f32.mrf.mxu0  ;;  %v2749_v5 = vadd.f32 %v6455_v40, %v2636_v20  ;;  %v3139_v20 = vld [vmem:[%s6403_s4] sm:$0x3] }
 0x266   : > { %v2952_v9 = vpop.f32.mrf.mxu1  ;;  %v3018_v47 = vmax.f32 %v2947_v55, 0.0  ;;  %v2840_v30 = vadd.f32 %v2839_v4, %v6138_v57  ;;  %v3061_v3 = vpack.c.bf16 %v3017_v63, %v3013_v35  ;;  %v2951_v57 = vadd.f32 %v2950_v61, %v2838_v62  ;;  %v6457_v63 = vld [vmem:[#allocation19_spill] sm:$0xff] }
 0x267   : > { %v2841_v33 = vpop.f32.mrf.mxu0  ;;  %v2741_v2 = vadd.f32 %v6156_v8, %v2628_v39  ;;  %v5207_v39 = vld [vmem:[#allocation10 + $0x8] sm:$0xff]  }
 0x268   : > { %v2954_v12 = vpop.f32.mrf.mxu1  ;;  %v3062_v13 = vpack.c.bf16 %v3018_v47, %v3014_v53  ;;  %v2842_v36 = vadd.f32 %v2841_v33, %v2729_v21  ;;  %v2953_v54 = vadd.f32 %v2952_v9, %v2840_v30  ;;  %v3021_v29 = vmax.f32 %v2951_v57, 0.0  ;;  %v6458_v53 = vld [vmem:[#allocation18_spill] sm:$0xff] }
 0x269   : > { %v2843_v58 = vpop.f32.mrf.mxu0  ;;  %v5204_v57 = vld [vmem:[#allocation10 + $0x50] sm:$0xff]  }
 0x26a   : > { %v2956_v37 = vpop.f32.mrf.mxu1  ;;  %v2955_v25 = vadd.f32 %v2954_v12, %v2842_v36  ;;  %v2844_v7 = vadd.f32 %v2843_v58, %v2731_v49  ;;  %3656 = vmatprep.mubr.bf16.mxu1 %v3062_v13  ;;  %v3022_v16 = vmax.f32 %v2953_v54, 0.0  ;;  %4511 = vmatprep.subr.bf16.mxu0 %v5204_v57 }
 0x26b   : > { %v2847_v51 = vpop.f32.mrf.mxu0  ;;  %3657 = vmatmul.mubr.bf16.gmra.mxu1 %v3061_v3  ;;  %4570 = vmatprep.subr.bf16.mxu1 %v5204_v57 }
 0x26c   : > { %v2960_v22 = vpop.f32.mrf.mxu1  ;;  %v2957_v60 = vadd.f32 %v2956_v37, %v2844_v7  ;;  %v3025_v24 = vmax.f32 %v2955_v25, 0.0  ;;  %v2848_v38 = vadd.f32 %v2847_v51, %v6145_v6  ;;  %v6454_v6 = vld [vmem:[#allocation21_spill] sm:$0xff]  ;;  %v5205_v51 = vld [vmem:[#allocation10 + $0x10] sm:$0xff]  }
 0x26d   : > { %v2849_v46 = vpop.f32.mrf.mxu0  ;;  %v2638_v41 = vadd.f32 %v6454_v6, %v6058_v45  ;;  %4512 = vmatpush3.bf16.msra.mxu0 %v5205_v51  ;;  %4578 = vmatpush3.bf16.msra.mxu1 %v5205_v51 }
 0x26e   : > { %v2962_v52 = vpop.f32.mrf.mxu1  ;;  %v3026_v19 = vmax.f32 %v2957_v60, 0.0  ;;  %v2850_v14 = vadd.f32 %v2849_v46, %v6152_v44  ;;  %v3065_v10 = vpack.c.bf16 %v3025_v24, %v3021_v29  ;;  %v2961_v44 = vadd.f32 %v2960_v22, %v2848_v38  ;;  %v5206_v22 = vld [vmem:[#allocation10 + $0x48] sm:$0xff]   ;;  %v5208_v60 = vld [vmem:[#allocation10 + $0x40] sm:$0xff]  }
 0x26f   : > { %v2851_v27 = vpop.f32.mrf.mxu0  ;;  %v2751_v47 = vadd.f32 %v6458_v53, %v2638_v41  ;;  %4513 = vmatprep.subr.bf16.mxu0 %v5206_v22  ;;  %4571 = vmatprep.subr.bf16.mxu1 %v5206_v22  ;;  %v5209_v24 = vld [vmem:[#allocation10] sm:$0xff]  }
 0x270   : > { %v2964_v50 = vpop.f32.mrf.mxu1  ;;  %v3066_v17 = vpack.c.bf16 %v3026_v19, %v3022_v16  ;;  %v2852_v0 = vadd.f32 %v2851_v27, %v2739_v56  ;;  %v2963_v32 = vadd.f32 %v2962_v52, %v2850_v14  ;;  %v3029_v55 = vmax.f32 %v2961_v44, 0.0 }
 0x271   : > { %v2853_v18 = vpop.f32.mrf.mxu0  ;;  %4514 = vmatpush3.bf16.msra.mxu0 %v5207_v39  ;;  %4579 = vmatpush3.bf16.msra.mxu1 %v5207_v39 }
 0x272   : > { %v2966_v15 = vpop.f32.mrf.mxu1  ;;  %v2965_v1 = vadd.f32 %v2964_v50, %v2852_v0  ;;  %v2854_v28 = vadd.f32 %v2853_v18, %v2741_v2  ;;  %3666 = vmatprep.mubr.bf16.mxu1 %v3066_v17  ;;  %v3030_v61 = vmax.f32 %v2963_v32, 0.0  ;;  %4515 = vmatprep.subr.bf16.mxu0 %v5208_v60 }
 0x273   : > { %v2857_v43 = vpop.f32.mrf.mxu0  ;;  %3667 = vmatmul.mubr.bf16.gmra.mxu1 %v3065_v10  ;;  %4572 = vmatprep.subr.bf16.mxu1 %v5208_v60 }
 0x274   : > { %v2970_v48 = vpop.f32.mrf.mxu1  ;;  %v2967_v8 = vadd.f32 %v2966_v15, %v2854_v28  ;;  %v3033_v59 = vmax.f32 %v2965_v1, 0.0  ;;  %v2858_v4 = vadd.f32 %v2857_v43, %v6457_v63  ;;  %v6459_v1 = vld [vmem:[#allocation16_spill] sm:$0xff] }
 0x275   : > { %v2859_v34 = vpop.f32.mrf.mxu0  ;;  %4516 = vmatpush3.bf16.msra.mxu0 %v5209_v24  ;;  %4580 = vmatpush3.bf16.msra.mxu1 %v5209_v24  ;;  %v6460_v28 = vsub.s32 1, %v6459_v1  ;;  %v6461_v43 = vsub.s32 0, %v6459_v1 }
 0x276   : > { %v2972_v11 = vpop.f32.mrf.mxu1  ;;  %v3034_v26 = vmax.f32 %v2967_v8, 0.0  ;;  %v2860_v23 = vadd.f32 %v2859_v34, %v6456_v42  ;;  %v3069_v45 = vpack.c.bf16 %v3033_v59, %v3029_v55  ;;  %v2971_v13 = vadd.f32 %v2970_v48, %v2858_v4 }
 0x277   : > { %v2861_v9 = vpop.f32.mrf.mxu0  ;;  %v6251_v44 = vrot.slane %v3139_v20, %v6460_v28  ;;  %v6255_v48 = vrot.slane %v3139_v20, %v6461_v43 }
 0x278   : > { %v2974_v21 = vpop.f32.mrf.mxu1  ;;  %v3070_v30 = vpack.c.bf16 %v3034_v26, %v3030_v61  ;;  %v2862_v35 = vadd.f32 %v2861_v9, %v2749_v5  ;;  %v2973_v33 = vadd.f32 %v2972_v11, %v2860_v23  ;;  %v3037_v54 = vmax.f32 %v2971_v13, 0.0 }
 0x279   : > { %v2863_v62 = vpop.f32.mrf.mxu0 }
 0x27a   : > { %v2975_v12 = vadd.f32 %v2974_v21, %v2862_v35  ;;  %v2864_v49 = vadd.f32 %v2863_v62, %v2751_v47  ;;  %3676 = vmatprep.mubr.bf16.mxu1 %v3070_v30  ;;  %v2976_v36 = vpop.f32.mrf.mxu1  ;;  %v3038_v37 = vmax.f32 %v2973_v33, 0.0 }
 0x27b   : > { %3677 = vmatmul.mubr.bf16.gmra.mxu1 %v3069_v45 }
 0x27c   : > { %v2977_v3 = vadd.f32 %v2976_v36, %v2864_v49  ;;  %v3041_v58 = vmax.f32 %v2975_v12, 0.0 }
 0x27e   : > { %v3042_v31 = vmax.f32 %v2977_v3, 0.0  ;;  %v3073_v7 = vpack.c.bf16 %v3041_v58, %v3037_v54 }
 0x280   : > { %v3074_v25 = vpack.c.bf16 %v3042_v31, %v3038_v37 }
 0x282   : > { %3686 = vmatprep.mubr.bf16.mxu1 %v3074_v25 }
 0x283   : > { %3687 = vmatmul.mubr.bf16.gmra.mxu1 %v3073_v7 }
 0x28b   : > { %v3505_v46 = vpop.f32.mrf.mxu0 }
 0x28c   : > { %v3506_v11 = vadd.f32 %v3505_v46, %v6255_v48 }
 0x28d   : > { %v3507_v52 = vpop.f32.mrf.mxu0 }
 0x28e   : > { %v3508_v59 = vadd.f32 %v3507_v52, %v6251_v44 }
 0x28f   : > { %v3509_v56 = vpop.f32.mrf.mxu0 }
 0x290   : > { %v3510_v34 = vadd.f32 %v3509_v56, %v6255_v48 }
 0x291   : > { %v3511_v16 = vpop.f32.mrf.mxu0 }
 0x292   : > { %v3512_v5 = vadd.f32 %v3511_v16, %v6251_v44 }
 0x293   : > { %v3515_v19 = vpop.f32.mrf.mxu0 }
 0x294   : > { %v3516_v12 = vadd.f32 %v3515_v19, %v6255_v48 }
 0x295   : > { %v3517_v14 = vpop.f32.mrf.mxu0 }
 0x296   : > { %v3518_v45 = vadd.f32 %v3517_v14, %v6251_v44 }
 0x297   : > { %v3519_v29 = vpop.f32.mrf.mxu0 }
 0x298   : > { %v3520_v62 = vadd.f32 %v3519_v29, %v6255_v48 }
 0x299   : > { %v3521_v38 = vpop.f32.mrf.mxu0 }
 0x29a   : > { %v3522_v36 = vadd.f32 %v3521_v38, %v6251_v44 }
 0x29b   : > { %v3525_v27 = vpop.f32.mrf.mxu0 }
 0x29c   : > { %v3526_v16 = vadd.f32 %v3525_v27, %v6255_v48 }
 0x29d   : > { %v3527_v50 = vpop.f32.mrf.mxu0 }
 0x29e   : > { %v3528_v46 = vadd.f32 %v3527_v50, %v6251_v44 }
 0x29f   : > { %v3529_v2 = vpop.f32.mrf.mxu0 }
 0x2a0   : > { %v3530_v52 = vadd.f32 %v3529_v2, %v6255_v48 }
 0x2a1   : > { %v3531_v17 = vpop.f32.mrf.mxu0 }
 0x2a2   : > { %v3532_v29 = vadd.f32 %v3531_v17, %v6251_v44 }
 0x2a3   : > { %v6236_v0 = vpop.f32.mrf.mxu0 }
 0x2a5   : > { %v6238_v10 = vpop.f32.mrf.mxu0 }
 0x2a6   : > { %v3538_v27 = vadd.f32 %v6238_v10, %v6251_v44 }
 0x2a7   : > { %v6240_v18 = vpop.f32.mrf.mxu0 }
 0x2a8   : > { %v3540_v17 = vadd.f32 %v6240_v18, %v6255_v48 }
 0x2a9   : > { %v6242_v15 = vpop.f32.mrf.mxu0 }
 0x2ab   : > { %v6247_v32 = vpop.f32.mrf.mxu0 }
 0x2ad   : > { %v6257_v41 = vpop.f32.mrf.mxu0 }
 0x2af   : > { %v6263_v42 = vpop.f32.mrf.mxu0 }
 0x2b1   : > { %v6265_v47 = vpop.f32.mrf.mxu0 }
 0x2b3   : > { %v6271_v37 = vpop.f32.mrf.mxu0 }
 0x2b5   : > { %v6273_v39 = vpop.f32.mrf.mxu0 }
 0x2b7   : > { %v3559_v1 = vpop.f32.mrf.mxu0 }
 0x2b9   : > { %v3561_v2 = vpop.f32.mrf.mxu0 }
 0x30b   : > { %v3618_v6 = vpop.f32.mrf.mxu1 }
 0x30c   : > { %v3619_v23 = vadd.f32 %v3618_v6, %v3506_v11 }
 0x30d   : > { %v3620_v8 = vpop.f32.mrf.mxu1 }
 0x30e   : > { %v3621_v61 = vadd.f32 %v3620_v8, %v3508_v59  ;;  %v3697_v30 = vmax.f32 %v3619_v23, 0.0 }
 0x30f   : > { %v3622_v40 = vpop.f32.mrf.mxu1 }
 0x310   : > { %v3623_v26 = vadd.f32 %v3622_v40, %v3510_v34  ;;  %v3698_v21 = vmax.f32 %v3621_v61, 0.0  ;;  %v3536_v61 = vadd.f32 %v6236_v0, %v6255_v48 }
 0x311   : > { %v3624_v55 = vpop.f32.mrf.mxu1 }
 0x312   : > { %v3625_v63 = vadd.f32 %v3624_v55, %v3512_v5  ;;  %v3699_v4 = vmax.f32 %v3623_v26, 0.0  ;;  %v3542_v55 = vadd.f32 %v6242_v15, %v6251_v44  ;;  %v3550_v15 = vadd.f32 %v6263_v42, %v6255_v48 }
 0x313   : > { %v3628_v9 = vpop.f32.mrf.mxu1 }
 0x314   : > { %v3700_v53 = vmax.f32 %v3625_v63, 0.0  ;;  %v3729_v49 = vpack.c.bf16 %v3699_v4, %v3697_v30  ;;  %v3629_v31 = vadd.f32 %v3628_v9, %v3516_v12  ;;  %v3565_v9 = vpop.f32.mrf.mxu0  ;;  %v3548_v12 = vadd.f32 %v6257_v41, %v6251_v44 }
 0x315   : > { %v3630_v35 = vpop.f32.mrf.mxu1 }
 0x316   : > { %v3730_v33 = vpack.c.bf16 %v3700_v53, %v3698_v21  ;;  %v3631_v3 = vadd.f32 %v3630_v35, %v3518_v45  ;;  %v3701_v60 = vmax.f32 %v3629_v31, 0.0 }
 0x317   : > { %v3632_v13 = vpop.f32.mrf.mxu1 }
 0x318   : > { %v3633_v58 = vadd.f32 %v3632_v13, %v3520_v62  ;;  %3912 = vmatprep.mubr.bf16.mxu0 %v3730_v33  ;;  %v3702_v51 = vmax.f32 %v3631_v3, 0.0  ;;  %v3567_v62 = vpop.f32.mrf.mxu0  ;;  %v3546_v13 = vadd.f32 %v6247_v32, %v6255_v48 }
 0x319   : > { %v3634_v54 = vpop.f32.mrf.mxu1  ;;  %3913 = vmatmul.mubr.bf16.vlgmr.msra.gmra.mxu0 %v3729_v49 }
 0x31a   : > { %v3635_v25 = vadd.f32 %v3634_v54, %v3522_v36  ;;  %v3703_v7 = vmax.f32 %v3633_v58, 0.0  ;;  %v3552_v58 = vadd.f32 %v6265_v47, %v6251_v44  ;;  %v3560_v47 = vadd.f32 %v3559_v1, %v6255_v48 }
 0x31b   : > { %v3638_v57 = vpop.f32.mrf.mxu1 }
 0x31c   : > { %v3704_v22 = vmax.f32 %v3635_v25, 0.0  ;;  %v3731_v19 = vpack.c.bf16 %v3703_v7, %v3701_v60  ;;  %v3639_v28 = vadd.f32 %v3638_v57, %v3526_v16  ;;  %v3569_v25 = vpop.f32.mrf.mxu0  ;;  %v3556_v16 = vadd.f32 %v6271_v37, %v6255_v48 }
 0x31d   : > { %v3640_v24 = vpop.f32.mrf.mxu1  ;;  %v3568_v37 = vadd.f32 %v3567_v62, %v6251_v44 }
 0x31e   : > { %v3732_v56 = vpack.c.bf16 %v3704_v22, %v3702_v51  ;;  %v3641_v38 = vadd.f32 %v3640_v24, %v3528_v46  ;;  %v3705_v11 = vmax.f32 %v3639_v28, 0.0  ;;  %v3571_v24 = vpop.f32.mrf.mxu0 }
 0x31f   : > { %v3642_v14 = vpop.f32.mrf.mxu1 }
 0x320   : > { %v3643_v20 = vadd.f32 %v3642_v14, %v3530_v52  ;;  %3920 = vmatprep.mubr.bf16.mxu0 %v3732_v56  ;;  %v3706_v50 = vmax.f32 %v3641_v38, 0.0  ;;  %v3558_v52 = vadd.f32 %v6273_v39, %v6251_v44  ;;  %v3575_v28 = vpop.f32.mrf.mxu0 }
 0x321   : > { %v3644_v43 = vpop.f32.mrf.mxu1  ;;  %3921 = vmatmul.mubr.bf16.gmra.mxu0 %v3731_v19 }
 0x322   : > { %v3645_v6 = vadd.f32 %v3644_v43, %v3532_v29  ;;  %v3707_v8 = vmax.f32 %v3643_v20, 0.0  ;;  %v3562_v29 = vadd.f32 %v3561_v2, %v6251_v44 }
 0x323   : > { %v3648_v59 = vpop.f32.mrf.mxu1 }
 0x324   : > { %v3708_v34 = vmax.f32 %v3645_v6, 0.0  ;;  %v3733_v26 = vpack.c.bf16 %v3707_v8, %v3705_v11  ;;  %v3649_v21 = vadd.f32 %v3648_v59, %v3536_v61 }
 0x325   : > { %v3650_v40 = vpop.f32.mrf.mxu1 }
 0x326   : > { %v3734_v5 = vpack.c.bf16 %v3708_v34, %v3706_v50  ;;  %v3651_v63 = vadd.f32 %v3650_v40, %v3538_v27  ;;  %v3709_v33 = vmax.f32 %v3649_v21, 0.0  ;;  %v3577_v34 = vpop.f32.mrf.mxu0  ;;  %v3570_v27 = vadd.f32 %v3569_v25, %v6255_v48 }
 0x327   : > { %v3652_v23 = vpop.f32.mrf.mxu1 }
 0x328   : > { %v3653_v4 = vadd.f32 %v3652_v23, %v3540_v17  ;;  %3928 = vmatprep.mubr.bf16.mxu0 %v3734_v5  ;;  %v3710_v18 = vmax.f32 %v3651_v63, 0.0  ;;  %v3566_v17 = vadd.f32 %v3565_v9, %v6255_v48  ;;  %v3579_v63 = vpop.f32.mrf.mxu0  ;;  %v3578_v9 = vadd.f32 %v3577_v34, %v6251_v44 }
 0x329   : > { %v3654_v53 = vpop.f32.mrf.mxu1  ;;  %3929 = vmatmul.mubr.bf16.gmra.mxu0 %v3733_v26  ;;  %v3572_v26 = vadd.f32 %v3571_v24, %v6251_v44 }
 0x32a   : > { %v3655_v10 = vadd.f32 %v3654_v53, %v3542_v55  ;;  %v3711_v30 = vmax.f32 %v3653_v4, 0.0 }
 0x32b   : > { %v3658_v35 = vpop.f32.mrf.mxu1 }
 0x32c   : > { %v3712_v45 = vmax.f32 %v3655_v10, 0.0  ;;  %v3735_v36 = vpack.c.bf16 %v3711_v30, %v3709_v33  ;;  %v3659_v7 = vadd.f32 %v3658_v35, %v3546_v13 }
 0x32d   : > { %v3660_v0 = vpop.f32.mrf.mxu1 }
 0x32e   : > { %v3736_v49 = vpack.c.bf16 %v3712_v45, %v3710_v18  ;;  %v3661_v31 = vadd.f32 %v3660_v0, %v3548_v12  ;;  %v3713_v46 = vmax.f32 %v3659_v7, 0.0  ;;  %v3581_v45 = vpop.f32.mrf.mxu0  ;;  %v3580_v0 = vadd.f32 %v3579_v63, %v6255_v48 }
 0x32f   : > { %v3662_v3 = vpop.f32.mrf.mxu1 }
 0x330   : > { %v3663_v54 = vadd.f32 %v3662_v3, %v3550_v15  ;;  %3936 = vmatprep.mubr.bf16.mxu0 %v3736_v49  ;;  %v3714_v42 = vmax.f32 %v3661_v31, 0.0  ;;  %v3576_v15 = vadd.f32 %v3575_v28, %v6255_v48 }
 0x331   : > { %v3664_v57 = vpop.f32.mrf.mxu1  ;;  %3937 = vmatmul.mubr.bf16.gmra.mxu0 %v3735_v36  ;;  %v3582_v36 = vadd.f32 %v3581_v45, %v6251_v44  ;;  %v6313_v44 = vld [vmem:[%s6405_s6] ss:$0 sm:$0xff] }
 0x332   : > { %v3665_v41 = vadd.f32 %v3664_v57, %v3552_v58  ;;  %v3715_v51 = vmax.f32 %v3663_v54, 0.0 }
 0x333   : > { %v3668_v22 = vpop.f32.mrf.mxu1 }
 0x334   : > { %v3716_v60 = vmax.f32 %v3665_v41, 0.0  ;;  %v3737_v19 = vpack.c.bf16 %v3715_v51, %v3713_v46  ;;  %v3669_v43 = vadd.f32 %v3668_v22, %v3556_v16 }
 0x335   : > { %v3670_v32 = vpop.f32.mrf.mxu1 }
 0x336   : > { %v3738_v56 = vpack.c.bf16 %v3716_v60, %v3714_v42  ;;  %v3671_v38 = vadd.f32 %v3670_v32, %v3558_v52  ;;  %v3717_v11 = vmax.f32 %v3669_v43, 0.0 }
 0x337   : > { %v3672_v14 = vpop.f32.mrf.mxu1 }
 0x338   : > { %v3673_v20 = vadd.f32 %v3672_v14, %v3560_v47  ;;  %3944 = vmatprep.mubr.bf16.mxu1 %v3738_v56  ;;  %v3718_v50 = vmax.f32 %v3671_v38, 0.0 }
 0x339   : > { %v3674_v6 = vpop.f32.mrf.mxu1  ;;  %3945 = vmatmul.mubr.bf16.vlgmr.msra.gmra.mxu1 %v3737_v19 }
 0x33a   : > { %v3675_v8 = vadd.f32 %v3674_v6, %v3562_v29  ;;  %v3719_v59 = vmax.f32 %v3673_v20, 0.0 }
 0x33b   : > { %v3678_v39 = vpop.f32.mrf.mxu1 }
 0x33c   : > { %v3720_v1 = vmax.f32 %v3675_v8, 0.0  ;;  %v3739_v5 = vpack.c.bf16 %v3719_v59, %v3717_v11  ;;  %v3679_v4 = vadd.f32 %v3678_v39, %v3566_v17 }
 0x33d   : > { %v3680_v40 = vpop.f32.mrf.mxu1 }
 0x33e   : > { %v3740_v2 = vpack.c.bf16 %v3720_v1, %v3718_v50  ;;  %v3681_v23 = vadd.f32 %v3680_v40, %v3568_v37  ;;  %v3721_v62 = vmax.f32 %v3679_v4, 0.0 }
 0x33f   : > { %v3682_v61 = vpop.f32.mrf.mxu1 }
 0x340   : > { %v3683_v55 = vadd.f32 %v3682_v61, %v3570_v27  ;;  %3952 = vmatprep.mubr.bf16.mxu1 %v3740_v2  ;;  %v3722_v35 = vmax.f32 %v3681_v23, 0.0 }
 0x341   : > { %v3684_v21 = vpop.f32.mrf.mxu1  ;;  %3953 = vmatmul.mubr.bf16.gmra.mxu1 %v3739_v5 }
 0x342   : > { %v3685_v53 = vadd.f32 %v3684_v21, %v3572_v26  ;;  %v3723_v10 = vmax.f32 %v3683_v55, 0.0 }
 0x343   : > { %v3688_v30 = vpop.f32.mrf.mxu1 }
 0x344   : > { %v3724_v18 = vmax.f32 %v3685_v53, 0.0  ;;  %v3741_v49 = vpack.c.bf16 %v3723_v10, %v3721_v62  ;;  %v3689_v31 = vadd.f32 %v3688_v30, %v3576_v15 }
 0x345   : > { %v3690_v33 = vpop.f32.mrf.mxu1 }
 0x346   : > { %v3742_v12 = vpack.c.bf16 %v3724_v18, %v3722_v35  ;;  %v3691_v3 = vadd.f32 %v3690_v33, %v3578_v9  ;;  %v3725_v51 = vmax.f32 %v3689_v31, 0.0 }
 0x347   : > { %v3692_v13 = vpop.f32.mrf.mxu1 }
 0x348   : > { %v3693_v58 = vadd.f32 %v3692_v13, %v3580_v0  ;;  %3960 = vmatprep.mubr.bf16.mxu1 %v3742_v12  ;;  %v3726_v57 = vmax.f32 %v3691_v3, 0.0 }
 0x349   : > { %v3694_v54 = vpop.f32.mrf.mxu1  ;;  %3961 = vmatmul.mubr.bf16.gmra.mxu1 %v3741_v49 }
 0x34a   : > { %v3695_v25 = vadd.f32 %v3694_v54, %v3582_v36  ;;  %v3727_v7 = vmax.f32 %v3693_v58, 0.0 }
 0x34c   : > { %v3728_v41 = vmax.f32 %v3695_v25, 0.0  ;;  %v3743_v42 = vpack.c.bf16 %v3727_v7, %v3725_v51 }
 0x34e   : > { %v3744_v22 = vpack.c.bf16 %v3728_v41, %v3726_v57 }
 0x350   : > { %3968 = vmatprep.mubr.bf16.mxu1 %v3744_v22 }
 0x351   : > { %3969 = vmatmul.mubr.bf16.gmra.mxu1 %v3743_v42 }
 0x3d9   : > { %v4517_v48 = vpop.f32.mrf.mxu0 }
 0x3db   : > { %v4518_v60 = vpop.f32.mrf.mxu0 }
 0x3dc   : > { %v4519_v24 = vadd.f32 %v4518_v60, %v4517_v48 }
 0x3dd   : > { %v4520_v46 = vpop.f32.mrf.mxu0 }
 0x3de   : > { %v3915_v32 = vadd.f32 %v4519_v24, %v6313_v44 }
 0x3df   : > { %v4521_v52 = vpop.f32.mrf.mxu0 }
 0x3e0   : > { %3977 = vst [vmem:[%s6316_s22] sm:$0xff] %v3915_v32  ;;  %v4522_v47 = vadd.f32 %v4521_v52, %v4520_v46 }
 0x3e1   : > { %v4523_v56 = vpop.f32.mrf.mxu0 }
 0x3e2   : > { %v3918_v16 = vadd.f32 %v4522_v47, %v6313_v44 }
 0x3e3   : > { %v4524_v19 = vpop.f32.mrf.mxu0 }
 0x3e4   : > { %3978 = vst [vmem:[%s6316_s22 + $0x8] sm:$0xff] %v3918_v16  ;;  %v4525_v14 = vadd.f32 %v4524_v19, %v4523_v56 }
 0x3e5   : > { %v4526_v29 = vpop.f32.mrf.mxu0 }
 0x3e6   : > { %v3923_v38 = vadd.f32 %v4525_v14, %v6313_v44 }
 0x3e7   : > { %v4527_v20 = vpop.f32.mrf.mxu0 }
 0x3e8   : > { %3979 = vst [vmem:[%s6316_s22 + $0x10] sm:$0xff] %v3923_v38  ;;  %v4528_v28 = vadd.f32 %v4527_v20, %v4526_v29 }
 0x3e9   : > { %v4529_v43 = vpop.f32.mrf.mxu0 }
 0x3ea   : > { %v3926_v6 = vadd.f32 %v4528_v28, %v6313_v44 }
 0x3eb   : > { %v4530_v8 = vpop.f32.mrf.mxu0 }
 0x3ec   : > { %3980 = vst [vmem:[%s6316_s22 + $0x18] sm:$0xff] %v3926_v6  ;;  %v4531_v59 = vadd.f32 %v4530_v8, %v4529_v43 }
 0x3ed   : > { %v4532_v39 = vpop.f32.mrf.mxu0 }
 0x3ee   : > { %v3931_v50 = vadd.f32 %v4531_v59, %v6313_v44 }
 0x3ef   : > { %v4533_v1 = vpop.f32.mrf.mxu0 }
 0x3f0   : > { %3981 = vst [vmem:[%s6316_s22 + $0x20] sm:$0xff] %v3931_v50  ;;  %v4534_v34 = vadd.f32 %v4533_v1, %v4532_v39 }
 0x3f1   : > { %v4535_v11 = vpop.f32.mrf.mxu0 }
 0x3f2   : > { %v3934_v40 = vadd.f32 %v4534_v34, %v6313_v44 }
 0x3f3   : > { %v4536_v37 = vpop.f32.mrf.mxu0 }
 0x3f4   : > { %3982 = vst [vmem:[%s6316_s22 + $0x28] sm:$0xff] %v3934_v40  ;;  %v4537_v27 = vadd.f32 %v4536_v37, %v4535_v11 }
 0x3f5   : > { %v4538_v2 = vpop.f32.mrf.mxu0 }
 0x3f6   : > { %v3939_v17 = vadd.f32 %v4537_v27, %v6313_v44 }
 0x3f7   : > { %v4539_v5 = vpop.f32.mrf.mxu0 }
 0x3f8   : > { %3983 = vst [vmem:[%s6316_s22 + $0x30] sm:$0xff] %v3939_v17  ;;  %v4540_v61 = vadd.f32 %v4539_v5, %v4538_v2 }
 0x3f9   : > { %v4541_v26 = vpop.f32.mrf.mxu1 }
 0x3fa   : > { %v3942_v23 = vadd.f32 %v4540_v61, %v6313_v44 }
 0x3fb   : > { %v4542_v55 = vpop.f32.mrf.mxu1 }
 0x3fc   : > { %3984 = vst [vmem:[%s6316_s22 + $0x38] sm:$0xff] %v3942_v23  ;;  %v4543_v63 = vadd.f32 %v4542_v55, %v4541_v26 }
 0x3fd   : > { %v4544_v4 = vpop.f32.mrf.mxu1 }
 0x3fe   : > { %v3947_v21 = vadd.f32 %v4543_v63, %v6313_v44 }
 0x3ff   : > { %v4545_v53 = vpop.f32.mrf.mxu1 }
 0x400   : > { %3985 = vst [vmem:[%s6316_s22 + $0x40] sm:$0xff] %v3947_v21  ;;  %v4546_v10 = vadd.f32 %v4545_v53, %v4544_v4 }
 0x401   : > { %v4547_v30 = vpop.f32.mrf.mxu1 }
 0x402   : > { %v3950_v35 = vadd.f32 %v4546_v10, %v6313_v44 }
 0x403   : > { %v4548_v18 = vpop.f32.mrf.mxu1 }
 0x404   : > { %3986 = vst [vmem:[%s6316_s22 + $0x48] sm:$0xff] %v3950_v35  ;;  %v4549_v45 = vadd.f32 %v4548_v18, %v4547_v30 }
 0x405   : > { %v4550_v62 = vpop.f32.mrf.mxu1 }
 0x406   : > { %v3955_v33 = vadd.f32 %v4549_v45, %v6313_v44 }
 0x407   : > { %v4551_v9 = vpop.f32.mrf.mxu1 }
 0x408   : > { %3987 = vst [vmem:[%s6316_s22 + $0x50] sm:$0xff] %v3955_v33  ;;  %v4552_v0 = vadd.f32 %v4551_v9, %v4550_v62 }
 0x409   : > { %v4553_v12 = vpop.f32.mrf.mxu1 }
 0x40a   : > { %v3958_v15 = vadd.f32 %v4552_v0, %v6313_v44 }
 0x40b   : > { %v4554_v49 = vpop.f32.mrf.mxu1 }
 0x40c   : > { %3988 = vst [vmem:[%s6316_s22 + $0x58] sm:$0xff] %v3958_v15  ;;  %v4555_v13 = vadd.f32 %v4554_v49, %v4553_v12 }
 0x40d   : > { %v4556_v36 = vpop.f32.mrf.mxu1 }
 0x40e   : > { %v3963_v3 = vadd.f32 %v4555_v13, %v6313_v44 }
 0x40f   : > { %v4557_v58 = vpop.f32.mrf.mxu1 }
 0x410   : > { %3989 = vst [vmem:[%s6316_s22 + $0x60] sm:$0xff] %v3963_v3  ;;  %v4558_v31 = vadd.f32 %v4557_v58, %v4556_v36 }
 0x411   : > { %v4559_v54 = vpop.f32.mrf.mxu1 }
 0x412   : > { %v3966_v25 = vadd.f32 %v4558_v31, %v6313_v44 }
 0x413   : > { %v4560_v7 = vpop.f32.mrf.mxu1 }
 0x414   : > { %3990 = vst [vmem:[%s6316_s22 + $0x68] sm:$0xff] %v3966_v25  ;;  %v4561_v57 = vadd.f32 %v4560_v7, %v4559_v54 }
 0x415   : > { %v4562_v41 = vpop.f32.mrf.mxu1 }
 0x416   : > { %v3971_v51 = vadd.f32 %v4561_v57, %v6313_v44 }
 0x417   : > { %v4563_v22 = vpop.f32.mrf.mxu1 }
 0x418   : > { %3991 = vst [vmem:[%s6316_s22 + $0x70] sm:$0xff] %v3971_v51  ;;  %v4564_v42 = vadd.f32 %v4563_v22, %v4562_v41 }
 0x41a   : > { %v3974_v48 = vadd.f32 %v4564_v42, %v6313_v44 }
 0x41c   : > { %3992 = vst [vmem:[%s6316_s22 + $0x78] sm:$0xff] %v3974_v48 }
 0x41d   : > { %5390 = shalt.err (!%p5387_p5)
}
 0x41e   : > { %s5391_s9 = scalar_lea.hbm %s6352_s29, 2048  ;;  %s5395_s21 = scalar_lea.hbm %s6406_s7, 4096 }
 0x41f   : > { %p5392_p0 = scmp.ne.s32.totalorder %s6352_s29, %s5391_s9  ;;  %p5396_p10 = scmp.lt.s32.totalorder %s6352_s29, %s6406_s7 }
 0x420   : > { %p5397_p1 = scmp.lt.s32.totalorder %s5395_s21, %s5391_s9 }
 0x421   : > { %p5393_p7 = pnand %p5392_p0, %p6462_p8 }
 0x422   : > { %p5398_p2 = por %p5397_p1, %p5396_p10 }
 0x423   : > { %p5394_p11 = pneg %p5393_p7 }
 0x425   : > { %p5399_p4 = pnand %p5398_p2, %p5394_p11 }
 0x427   : > { %5402 = shalt.err (!%p5399_p4)
}
 0x428   : > { %s5466_s10 = smov 128   ;;  %s5467_s1 = smov 8  }
 0x429   : > { %4602 = dma.vmem_to_hbm [thread:$0]  (%p6462_p8), %s6354_s20, 2048, %s6352_s29, %s3994_s15, %s5466_s10, %s5466_s10, %s5467_s1  }
 0x42a PF: > { %s4022_s18 = sand.u32 1, %s5437_s24   ;;  %p6463_p12 = scmp.ne.s32.totalorder %s6420_s8, 0 }
 0x42b   : > { %p6464_p6 = scmp.ge.s32.totalorder %s5449_s27, 2  ;;  %s4023_s28 = scalar_lea.sflag [#allocation4], %s4022_s18 }
 0x42d   : > { %p4622_p3 = pnand %p6464_p6, %p6463_p12 }
 0x42f   : > { %p4623_p9 = pneg %p4622_p3 }
 0x431   : > { %5432 = dma.done.wait (%p4623_p9), %s4023_s28, 2048  }
 0x432   : > { %5434 = vsyncadd (%p4623_p9), %s4023_s28, 4294965248  ;;  %p22_p13 = scmp.ge.s32.totalorder %s5596_s23, 4   ;;  %s6465_s24 = smov %s5441_s25 }
 0x433   : > { %s6466_s25 = smov %s5445_s26  ;;  %s6467_s26 = smov %s5605_s11 }
 0x434   : > { %s6468_s27 = smov %s5596_s23  ;;  %24 = sbr.rel (!%p22_p13) target bundleno = 9 (0x9), region = 109 }
 0x439   :  { %4028 = vsyncpa [#allocation3], 1 }
 0x43a   :  { %4030 = vsyncpa [#allocation3 + $0x1], 1 }
 0x43b   :  { %4031 = vsyncpa [#allocation6], 1 }
 0x43c   :  { %4032 = vsyncpa [#allocation9], 1 }
 0x43d   :  { %4033 = vsyncpa [#allocation4], 1 }
 0x43e   :  { %4035 = vsyncpa [#allocation4 + $0x1], 1 }

</bundles_post_ra>
